<compile_context>
chip_gen: v7x
topology: tpu7x:2x2x1
jax: 0.10.0
libtpu: 0.0.40
codegen_flags: <defaults>
</compile_context>

<pallas_src>
import jax
import jax.numpy as jnp
from jax.experimental import pallas as pl
from jax.experimental.pallas import tpu as pltpu


# -----------------------------------------------------------------------------
# Fused Pallas kernel: 4 LSTM layers (wavefront) + FC, single invocation, no grid.
# -----------------------------------------------------------------------------
def _fused_lstm_fc_kernel(
    x_ref,       # (B, T, D)      input, batch_first
    wih0_ref,    # (D, 4H)        layer-0 input weights (g-cols pre-scaled by 2)
    wf_ref,      # (4, 2H, 4H)    slot 0: rows 0:H = W_hh0 ; slots 1..3: [W_ih_l; W_hh_l] fused
    ball_ref,    # (4, 1, 4H)     per-layer bias (b_ih + b_hh, g-cols pre-scaled by 2)
    fcw_ref,     # (H+1, O)       rows 0:H = W_fc, row H = b_fc
    out_ref,     # (B, O)         only HBM output
):
    B, T, _ = x_ref.shape
    H = wf_ref.shape[1] // 2
    G = 4 * H

    # ---- weights / biases resident once; bias broadcasts hoisted out of all loops ----
    wih0 = wih0_ref[...]                    # (D, 4H)
    whh0 = wf_ref[0][:H, :]                 # (H, 4H)
    wfused = [None] + [wf_ref[l] for l in range(1, 4)]          # (2H, 4H) each
    b0 = jnp.broadcast_to(ball_ref[0], (B, G))
    biases = [None] + [jnp.broadcast_to(ball_ref[l], (B, G)) for l in range(1, 4)]

    # ---- layer-0 input projections hoisted off the recurrence (independent of h) ----
    xv = x_ref[...]                         # (B, T, D) resident in VMEM/vregs
    proj0 = [
        jnp.dot(xv[:, t, :], wih0, preferred_element_type=jnp.float32) + b0
        for t in range(T)
    ]

    def cell(gates, c_prev):
        # Single EUP push over the full (B, 4H) gate vreg; g recovered on the VPU
        # (g-gate pre-activations were pre-scaled by 2, so 2*sigmoid(.)-1 == tanh).
        s = jax.nn.sigmoid(gates)
        i_g = s[:, 0 * H:1 * H]
        f_g = s[:, 1 * H:2 * H]
        g_g = 2.0 * s[:, 2 * H:3 * H] - 1.0
        o_g = s[:, 3 * H:4 * H]
        c_new = f_g * c_prev + i_g * g_g
        h_new = o_g * jnp.tanh(c_new)
        return h_new, c_new

    zeros = jnp.zeros((B, H), jnp.float32)
    h = [zeros, zeros, zeros, zeros]
    c = [zeros, zeros, zeros, zeros]

    # ---- wavefront over diagonals d = l + t: up to 4 independent layer-steps per diagonal ----
    for d in range(T + 3):
        h_new = list(h)
        c_new = list(c)
        for l in range(4):
            t = d - l
            if 0 <= t < T:
                if l == 0:
                    gates = proj0[t] + jnp.dot(
                        h[0], whh0, preferred_element_type=jnp.float32)
                else:
                    # h[l-1] is layer (l-1)'s output at time t (produced on diagonal d-1);
                    # h[l] is this layer's state at time t-1.  One fused MXU push.
                    lhs = jnp.concatenate([h[l - 1], h[l]], axis=1)          # (B, 2H)
                    gates = jnp.dot(
                        lhs, wfused[l], preferred_element_type=jnp.float32) + biases[l]
                h_new[l], c_new[l] = cell(gates, c[l])
        h, c = h_new, c_new

    # ---- final Linear on the last timestep of the last layer ----
    wfc = fcw_ref[:H, :]                    # (H, O)
    bfc = fcw_ref[H:H + 1, :]               # (1, O)
    out_ref[...] = jnp.dot(h[3], wfc, preferred_element_type=jnp.float32) + bfc


# -----------------------------------------------------------------------------
# Host-side packing: 15 tensors -> 5 arrays, g-gate columns pre-scaled by 2.
# -----------------------------------------------------------------------------
def pack_params(params):
    (wih0, whh0, b0), (wih1, whh1, b1), (wih2, whh2, b2), (wih3, whh3, b3) = params["lstm"]
    w_fc, b_fc = params["fc"]
    H = whh0.shape[0]

    def prescale(w):   # scale g-gate columns (2H:3H) by 2 -> tanh via single sigmoid
        return w.at[..., 2 * H:3 * H].multiply(2.0)

    wih0_p = prescale(wih0)
    wf0 = jnp.concatenate([prescale(whh0), jnp.zeros_like(whh0)], axis=0)    # (2H, 4H)
    wf123 = [jnp.concatenate([prescale(wi), prescale(wh)], axis=0)
             for (wi, wh) in ((wih1, whh1), (wih2, whh2), (wih3, whh3))]
    wf = jnp.stack([wf0] + wf123, axis=0)                                    # (4, 2H, 4H)
    ball = jnp.stack([prescale(b) for b in (b0, b1, b2, b3)], axis=0)        # (4, 1, 4H)
    fcw = jnp.concatenate([w_fc, b_fc], axis=0)                              # (H+1, O)
    return (wih0_p, wf, ball, fcw)


# -----------------------------------------------------------------------------
# Wrapper
# -----------------------------------------------------------------------------
@jax.jit
def actuator_lstm_forward(x, packed):
    """x: (B, T, input_size) float32, batch_first. Returns (B, output_size) float32."""
    wih0, wf, ball, fcw = packed
    B, _, _ = x.shape
    O = fcw.shape[1]

    vmem = pl.BlockSpec(memory_space=pltpu.MemorySpace.VMEM)  # whole array, VMEM-resident
    return pl.pallas_call(
        _fused_lstm_fc_kernel,
        out_shape=jax.ShapeDtypeStruct((B, O), jnp.float32),
        in_specs=[vmem] * 5,
        out_specs=vmem,
    )(x, wih0, wf, ball, fcw)


# -----------------------------------------------------------------------------
# Deterministic parameter init (PyTorch shapes; uniform(-1/sqrt(H), 1/sqrt(H)))
# -----------------------------------------------------------------------------
def init_params(key, input_size, hidden_size, output_size):
    H = hidden_size
    bound = 1.0 / jnp.sqrt(jnp.float32(H))
    params = {"lstm": []}
    in_dim = input_size
    for _ in range(4):
        key, k1, k2, k3, k4 = jax.random.split(key, 5)
        # PyTorch stores weight_ih as (4H, in_dim); we keep it transposed: (in_dim, 4H).
        w_ih = jax.random.uniform(k1, (in_dim, 4 * H), jnp.float32, -bound, bound)
        w_hh = jax.random.uniform(k2, (H, 4 * H), jnp.float32, -bound, bound)
        b_ih = jax.random.uniform(k3, (4 * H,), jnp.float32, -bound, bound)
        b_hh = jax.random.uniform(k4, (4 * H,), jnp.float32, -bound, bound)
        params["lstm"].append((w_ih, w_hh, (b_ih + b_hh).reshape(1, 4 * H)))
        in_dim = H
    key, k1, k2 = jax.random.split(key, 3)
    w_fc = jax.random.uniform(k1, (H, output_size), jnp.float32, -bound, bound)
    b_fc = jax.random.uniform(k2, (1, output_size), jnp.float32, -bound, bound)
    params["fc"] = (w_fc, b_fc)
    return params


# -----------------------------------------------------------------------------
# Pure-JAX reference (correctness check, uses the original un-packed params)
# -----------------------------------------------------------------------------
def _ref_lstm_layer(x_tbd, w_ih, w_hh, b):
    _, B, _ = x_tbd.shape
    H = w_hh.shape[0]

    def step(carry, x_t):
        h, c = carry
        gates = x_t @ w_ih + h @ w_hh + b
        i = jax.nn.sigmoid(gates[:, 0 * H:1 * H])
        f = jax.nn.sigmoid(gates[:, 1 * H:2 * H])
        g = jnp.tanh(gates[:, 2 * H:3 * H])
        o = jax.nn.sigmoid(gates[:, 3 * H:4 * H])
        c = f * c + i * g
        h = o * jnp.tanh(c)
        return (h, c), h

    init = (jnp.zeros((B, H), jnp.float32), jnp.zeros((B, H), jnp.float32))
    _, hs = jax.lax.scan(step, init, x_tbd)
    return hs


def _ref_forward(x, params):
    out = jnp.transpose(x, (1, 0, 2))  # time-major
    for (w_ih, w_hh, b) in params["lstm"]:
        out = _ref_lstm_layer(out, w_ih, w_hh, b)
    w_fc, b_fc = params["fc"]
    return out[-1] @ w_fc + b_fc


# -----------------------------------------------------------------------------
# Main
# -----------------------------------------------------------------------------
if __name__ == "__main__":
    INPUT_SIZE = 4
    HIDDEN_SIZE = 32
    OUTPUT_SIZE = 3
    BATCH = 2
    SEQ = 8

    key = jax.random.PRNGKey(0)
    key, xkey, pkey = jax.random.split(key, 3)
    x = jax.random.normal(xkey, (BATCH, SEQ, INPUT_SIZE), jnp.float32)
    params = init_params(pkey, INPUT_SIZE, HIDDEN_SIZE, OUTPUT_SIZE)
    packed = pack_params(params)   # done once, outside the jitted forward

    out = actuator_lstm_forward(x, packed)
    out = jax.block_until_ready(out)

    ref = _ref_forward(x, params)
    assert out.shape == (BATCH, OUTPUT_SIZE), out.shape
    assert jnp.allclose(out, ref, atol=1e-4, rtol=1e-4), (out, ref)

    print("KERNEL_OK")
</pallas_src>

<mosaic_0001>
module attributes {stable_mosaic.version = 11 : i64} {
  func.func @_fused_lstm_fc_kernel(%arg0: memref<2x8x4xf32, #tpu.memory_space<vmem>>, %arg1: memref<4x128xf32, #tpu.memory_space<vmem>>, %arg2: memref<4x64x128xf32, #tpu.memory_space<vmem>>, %arg3: memref<4x1x128xf32, #tpu.memory_space<vmem>>, %arg4: memref<33x3xf32, #tpu.memory_space<vmem>>, %arg5: memref<2x3xf32, #tpu.memory_space<vmem>>) attributes {dimension_semantics = [], scalar_prefetch = 0 : i64, scratch_operands = 0 : i64, tpu.core_type = #tpu.core_type<tc>} {
    %c0 = arith.constant 0 : index
    %c0_0 = arith.constant 0 : index
    %0 = vector.load %arg1[%c0, %c0_0] : memref<4x128xf32, #tpu.memory_space<vmem>>, vector<4x128xf32>
    %c0_1 = arith.constant 0 : index
    %c0_2 = arith.constant 0 : index
    %c0_3 = arith.constant 0 : index
    %1 = vector.load %arg2[%c0_1, %c0_2, %c0_3] : memref<4x64x128xf32, #tpu.memory_space<vmem>>, vector<1x64x128xf32>
    %2 = vector.shape_cast %1 : vector<1x64x128xf32> to vector<64x128xf32>
    %3 = vector.extract_strided_slice %2 {offsets = [0, 0], sizes = [32, 128], strides = [1, 1]} : vector<64x128xf32> to vector<32x128xf32>
    %c1 = arith.constant 1 : index
    %c0_4 = arith.constant 0 : index
    %c0_5 = arith.constant 0 : index
    %4 = vector.load %arg2[%c1, %c0_4, %c0_5] : memref<4x64x128xf32, #tpu.memory_space<vmem>>, vector<1x64x128xf32>
    %5 = vector.shape_cast %4 : vector<1x64x128xf32> to vector<64x128xf32>
    %c2 = arith.constant 2 : index
    %c0_6 = arith.constant 0 : index
    %c0_7 = arith.constant 0 : index
    %6 = vector.load %arg2[%c2, %c0_6, %c0_7] : memref<4x64x128xf32, #tpu.memory_space<vmem>>, vector<1x64x128xf32>
    %7 = vector.shape_cast %6 : vector<1x64x128xf32> to vector<64x128xf32>
    %c3 = arith.constant 3 : index
    %c0_8 = arith.constant 0 : index
    %c0_9 = arith.constant 0 : index
    %8 = vector.load %arg2[%c3, %c0_8, %c0_9] : memref<4x64x128xf32, #tpu.memory_space<vmem>>, vector<1x64x128xf32>
    %9 = vector.shape_cast %8 : vector<1x64x128xf32> to vector<64x128xf32>
    %c0_10 = arith.constant 0 : index
    %c0_11 = arith.constant 0 : index
    %c0_12 = arith.constant 0 : index
    %10 = vector.load %arg3[%c0_10, %c0_11, %c0_12] : memref<4x1x128xf32, #tpu.memory_space<vmem>>, vector<1x1x128xf32>
    %11 = vector.shape_cast %10 : vector<1x1x128xf32> to vector<1x128xf32>
    %12 = vector.shape_cast %11 : vector<1x128xf32> to vector<1x128xf32>
    %13 = vector.broadcast %12 : vector<1x128xf32> to vector<2x128xf32>
    %c1_13 = arith.constant 1 : index
    %c0_14 = arith.constant 0 : index
    %c0_15 = arith.constant 0 : index
    %14 = vector.load %arg3[%c1_13, %c0_14, %c0_15] : memref<4x1x128xf32, #tpu.memory_space<vmem>>, vector<1x1x128xf32>
    %15 = vector.shape_cast %14 : vector<1x1x128xf32> to vector<1x128xf32>
    %16 = vector.shape_cast %15 : vector<1x128xf32> to vector<1x128xf32>
    %17 = vector.broadcast %16 : vector<1x128xf32> to vector<2x128xf32>
    %c2_16 = arith.constant 2 : index
    %c0_17 = arith.constant 0 : index
    %c0_18 = arith.constant 0 : index
    %18 = vector.load %arg3[%c2_16, %c0_17, %c0_18] : memref<4x1x128xf32, #tpu.memory_space<vmem>>, vector<1x1x128xf32>
    %19 = vector.shape_cast %18 : vector<1x1x128xf32> to vector<1x128xf32>
    %20 = vector.shape_cast %19 : vector<1x128xf32> to vector<1x128xf32>
    %21 = vector.broadcast %20 : vector<1x128xf32> to vector<2x128xf32>
    %c3_19 = arith.constant 3 : index
    %c0_20 = arith.constant 0 : index
    %c0_21 = arith.constant 0 : index
    %22 = vector.load %arg3[%c3_19, %c0_20, %c0_21] : memref<4x1x128xf32, #tpu.memory_space<vmem>>, vector<1x1x128xf32>
    %23 = vector.shape_cast %22 : vector<1x1x128xf32> to vector<1x128xf32>
    %24 = vector.shape_cast %23 : vector<1x128xf32> to vector<1x128xf32>
    %25 = vector.broadcast %24 : vector<1x128xf32> to vector<2x128xf32>
    %c0_22 = arith.constant 0 : index
    %c0_23 = arith.constant 0 : index
    %c0_24 = arith.constant 0 : index
    %26 = vector.load %arg0[%c0_22, %c0_23, %c0_24] : memref<2x8x4xf32, #tpu.memory_space<vmem>>, vector<2x8x4xf32>
    %27 = vector.extract_strided_slice %26 {offsets = [0, 0, 0], sizes = [2, 1, 4], strides = [1, 1, 1]} : vector<2x8x4xf32> to vector<2x1x4xf32>
    %28 = vector.shape_cast %27 : vector<2x1x4xf32> to vector<2x4xf32>
    %cst = arith.constant dense<0.000000e+00> : vector<2x128xf32>
    %29 = tpu.matmul %28, %0, %cst {dimension_numbers = #tpu.dot_dimension_numbers<[1], [0], [0], [1], [0, 0, 1, 1], [], []>} : vector<2x4xf32>, vector<4x128xf32>, vector<2x128xf32> -> vector<2x128xf32>
    %30 = arith.addf %29, %13 : vector<2x128xf32>
    %31 = vector.extract_strided_slice %26 {offsets = [0, 1, 0], sizes = [2, 1, 4], strides = [1, 1, 1]} : vector<2x8x4xf32> to vector<2x1x4xf32>
    %32 = vector.shape_cast %31 : vector<2x1x4xf32> to vector<2x4xf32>
    %cst_25 = arith.constant dense<0.000000e+00> : vector<2x128xf32>
    %33 = tpu.matmul %32, %0, %cst_25 {dimension_numbers = #tpu.dot_dimension_numbers<[1], [0], [0], [1], [0, 0, 1, 1], [], []>} : vector<2x4xf32>, vector<4x128xf32>, vector<2x128xf32> -> vector<2x128xf32>
    %34 = arith.addf %33, %13 : vector<2x128xf32>
    %35 = vector.extract_strided_slice %26 {offsets = [0, 2, 0], sizes = [2, 1, 4], strides = [1, 1, 1]} : vector<2x8x4xf32> to vector<2x1x4xf32>
    %36 = vector.shape_cast %35 : vector<2x1x4xf32> to vector<2x4xf32>
    %cst_26 = arith.constant dense<0.000000e+00> : vector<2x128xf32>
    %37 = tpu.matmul %36, %0, %cst_26 {dimension_numbers = #tpu.dot_dimension_numbers<[1], [0], [0], [1], [0, 0, 1, 1], [], []>} : vector<2x4xf32>, vector<4x128xf32>, vector<2x128xf32> -> vector<2x128xf32>
    %38 = arith.addf %37, %13 : vector<2x128xf32>
    %39 = vector.extract_strided_slice %26 {offsets = [0, 3, 0], sizes = [2, 1, 4], strides = [1, 1, 1]} : vector<2x8x4xf32> to vector<2x1x4xf32>
    %40 = vector.shape_cast %39 : vector<2x1x4xf32> to vector<2x4xf32>
    %cst_27 = arith.constant dense<0.000000e+00> : vector<2x128xf32>
    %41 = tpu.matmul %40, %0, %cst_27 {dimension_numbers = #tpu.dot_dimension_numbers<[1], [0], [0], [1], [0, 0, 1, 1], [], []>} : vector<2x4xf32>, vector<4x128xf32>, vector<2x128xf32> -> vector<2x128xf32>
    %42 = arith.addf %41, %13 : vector<2x128xf32>
    %43 = vector.extract_strided_slice %26 {offsets = [0, 4, 0], sizes = [2, 1, 4], strides = [1, 1, 1]} : vector<2x8x4xf32> to vector<2x1x4xf32>
    %44 = vector.shape_cast %43 : vector<2x1x4xf32> to vector<2x4xf32>
    %cst_28 = arith.constant dense<0.000000e+00> : vector<2x128xf32>
    %45 = tpu.matmul %44, %0, %cst_28 {dimension_numbers = #tpu.dot_dimension_numbers<[1], [0], [0], [1], [0, 0, 1, 1], [], []>} : vector<2x4xf32>, vector<4x128xf32>, vector<2x128xf32> -> vector<2x128xf32>
    %46 = arith.addf %45, %13 : vector<2x128xf32>
    %47 = vector.extract_strided_slice %26 {offsets = [0, 5, 0], sizes = [2, 1, 4], strides = [1, 1, 1]} : vector<2x8x4xf32> to vector<2x1x4xf32>
    %48 = vector.shape_cast %47 : vector<2x1x4xf32> to vector<2x4xf32>
    %cst_29 = arith.constant dense<0.000000e+00> : vector<2x128xf32>
    %49 = tpu.matmul %48, %0, %cst_29 {dimension_numbers = #tpu.dot_dimension_numbers<[1], [0], [0], [1], [0, 0, 1, 1], [], []>} : vector<2x4xf32>, vector<4x128xf32>, vector<2x128xf32> -> vector<2x128xf32>
    %50 = arith.addf %49, %13 : vector<2x128xf32>
    %51 = vector.extract_strided_slice %26 {offsets = [0, 6, 0], sizes = [2, 1, 4], strides = [1, 1, 1]} : vector<2x8x4xf32> to vector<2x1x4xf32>
    %52 = vector.shape_cast %51 : vector<2x1x4xf32> to vector<2x4xf32>
    %cst_30 = arith.constant dense<0.000000e+00> : vector<2x128xf32>
    %53 = tpu.matmul %52, %0, %cst_30 {dimension_numbers = #tpu.dot_dimension_numbers<[1], [0], [0], [1], [0, 0, 1, 1], [], []>} : vector<2x4xf32>, vector<4x128xf32>, vector<2x128xf32> -> vector<2x128xf32>
    %54 = arith.addf %53, %13 : vector<2x128xf32>
    %55 = vector.extract_strided_slice %26 {offsets = [0, 7, 0], sizes = [2, 1, 4], strides = [1, 1, 1]} : vector<2x8x4xf32> to vector<2x1x4xf32>
    %56 = vector.shape_cast %55 : vector<2x1x4xf32> to vector<2x4xf32>
    %cst_31 = arith.constant dense<0.000000e+00> : vector<2x128xf32>
    %57 = tpu.matmul %56, %0, %cst_31 {dimension_numbers = #tpu.dot_dimension_numbers<[1], [0], [0], [1], [0, 0, 1, 1], [], []>} : vector<2x4xf32>, vector<4x128xf32>, vector<2x128xf32> -> vector<2x128xf32>
    %58 = arith.addf %57, %13 : vector<2x128xf32>
    %cst_32 = arith.constant 0.000000e+00 : f32
    %59 = vector.broadcast %cst_32 : f32 to vector<2x32xf32>
    %cst_33 = arith.constant dense<0.000000e+00> : vector<2x128xf32>
    %60 = tpu.matmul %59, %3, %cst_33 {dimension_numbers = #tpu.dot_dimension_numbers<[1], [0], [0], [1], [0, 0, 1, 1], [], []>} : vector<2x32xf32>, vector<32x128xf32>, vector<2x128xf32> -> vector<2x128xf32>
    %61 = arith.addf %30, %60 : vector<2x128xf32>
    %62 = arith.negf %61 : vector<2x128xf32>
    %63 = math.exp %62 : vector<2x128xf32>
    %cst_34 = arith.constant 1.000000e+00 : f32
    %64 = vector.broadcast %cst_34 : f32 to vector<2x128xf32>
    %65 = arith.addf %64, %63 : vector<2x128xf32>
    %66 = arith.divf %64, %65 : vector<2x128xf32>
    %67 = vector.extract_strided_slice %66 {offsets = [0, 0], sizes = [2, 32], strides = [1, 1]} : vector<2x128xf32> to vector<2x32xf32>
    %68 = vector.extract_strided_slice %66 {offsets = [0, 32], sizes = [2, 32], strides = [1, 1]} : vector<2x128xf32> to vector<2x32xf32>
    %69 = vector.extract_strided_slice %66 {offsets = [0, 64], sizes = [2, 32], strides = [1, 1]} : vector<2x128xf32> to vector<2x32xf32>
    %cst_35 = arith.constant 2.000000e+00 : f32
    %70 = vector.broadcast %cst_35 : f32 to vector<2x32xf32>
    %71 = arith.mulf %70, %69 : vector<2x32xf32>
    %cst_36 = arith.constant 1.000000e+00 : f32
    %72 = vector.broadcast %cst_36 : f32 to vector<2x32xf32>
    %73 = arith.subf %71, %72 : vector<2x32xf32>
    %74 = vector.extract_strided_slice %66 {offsets = [0, 96], sizes = [2, 32], strides = [1, 1]} : vector<2x128xf32> to vector<2x32xf32>
    %75 = arith.mulf %68, %59 : vector<2x32xf32>
    %76 = arith.mulf %67, %73 : vector<2x32xf32>
    %77 = arith.addf %75, %76 : vector<2x32xf32>
    %78 = math.tanh %77 : vector<2x32xf32>
    %79 = arith.mulf %74, %78 : vector<2x32xf32>
    %cst_37 = arith.constant dense<0.000000e+00> : vector<2x128xf32>
    %80 = tpu.matmul %79, %3, %cst_37 {dimension_numbers = #tpu.dot_dimension_numbers<[1], [0], [0], [1], [0, 0, 1, 1], [], []>} : vector<2x32xf32>, vector<32x128xf32>, vector<2x128xf32> -> vector<2x128xf32>
    %81 = arith.addf %34, %80 : vector<2x128xf32>
    %82 = arith.negf %81 : vector<2x128xf32>
    %83 = math.exp %82 : vector<2x128xf32>
    %cst_38 = arith.constant 1.000000e+00 : f32
    %84 = vector.broadcast %cst_38 : f32 to vector<2x128xf32>
    %85 = arith.addf %84, %83 : vector<2x128xf32>
    %86 = arith.divf %84, %85 : vector<2x128xf32>
    %87 = vector.extract_strided_slice %86 {offsets = [0, 0], sizes = [2, 32], strides = [1, 1]} : vector<2x128xf32> to vector<2x32xf32>
    %88 = vector.extract_strided_slice %86 {offsets = [0, 32], sizes = [2, 32], strides = [1, 1]} : vector<2x128xf32> to vector<2x32xf32>
    %89 = vector.extract_strided_slice %86 {offsets = [0, 64], sizes = [2, 32], strides = [1, 1]} : vector<2x128xf32> to vector<2x32xf32>
    %cst_39 = arith.constant 2.000000e+00 : f32
    %90 = vector.broadcast %cst_39 : f32 to vector<2x32xf32>
    %91 = arith.mulf %90, %89 : vector<2x32xf32>
    %cst_40 = arith.constant 1.000000e+00 : f32
    %92 = vector.broadcast %cst_40 : f32 to vector<2x32xf32>
    %93 = arith.subf %91, %92 : vector<2x32xf32>
    %94 = vector.extract_strided_slice %86 {offsets = [0, 96], sizes = [2, 32], strides = [1, 1]} : vector<2x128xf32> to vector<2x32xf32>
    %95 = arith.mulf %88, %77 : vector<2x32xf32>
    %96 = arith.mulf %87, %93 : vector<2x32xf32>
    %97 = arith.addf %95, %96 : vector<2x32xf32>
    %98 = math.tanh %97 : vector<2x32xf32>
    %99 = arith.mulf %94, %98 : vector<2x32xf32>
    %100 = tpu.concatenate %79, %59 in 1 : vector<2x32xf32>, vector<2x32xf32> -> vector<2x64xf32>
    %cst_41 = arith.constant dense<0.000000e+00> : vector<2x128xf32>
    %101 = tpu.matmul %100, %5, %cst_41 {dimension_numbers = #tpu.dot_dimension_numbers<[1], [0], [0], [1], [0, 0, 1, 1], [], []>} : vector<2x64xf32>, vector<64x128xf32>, vector<2x128xf32> -> vector<2x128xf32>
    %102 = arith.addf %101, %17 : vector<2x128xf32>
    %103 = arith.negf %102 : vector<2x128xf32>
    %104 = math.exp %103 : vector<2x128xf32>
    %cst_42 = arith.constant 1.000000e+00 : f32
    %105 = vector.broadcast %cst_42 : f32 to vector<2x128xf32>
    %106 = arith.addf %105, %104 : vector<2x128xf32>
    %107 = arith.divf %105, %106 : vector<2x128xf32>
    %108 = vector.extract_strided_slice %107 {offsets = [0, 0], sizes = [2, 32], strides = [1, 1]} : vector<2x128xf32> to vector<2x32xf32>
    %109 = vector.extract_strided_slice %107 {offsets = [0, 32], sizes = [2, 32], strides = [1, 1]} : vector<2x128xf32> to vector<2x32xf32>
    %110 = vector.extract_strided_slice %107 {offsets = [0, 64], sizes = [2, 32], strides = [1, 1]} : vector<2x128xf32> to vector<2x32xf32>
    %cst_43 = arith.constant 2.000000e+00 : f32
    %111 = vector.broadcast %cst_43 : f32 to vector<2x32xf32>
    %112 = arith.mulf %111, %110 : vector<2x32xf32>
    %cst_44 = arith.constant 1.000000e+00 : f32
    %113 = vector.broadcast %cst_44 : f32 to vector<2x32xf32>
    %114 = arith.subf %112, %113 : vector<2x32xf32>
    %115 = vector.extract_strided_slice %107 {offsets = [0, 96], sizes = [2, 32], strides = [1, 1]} : vector<2x128xf32> to vector<2x32xf32>
    %116 = arith.mulf %109, %59 : vector<2x32xf32>
    %117 = arith.mulf %108, %114 : vector<2x32xf32>
    %118 = arith.addf %116, %117 : vector<2x32xf32>
    %119 = math.tanh %118 : vector<2x32xf32>
    %120 = arith.mulf %115, %119 : vector<2x32xf32>
    %cst_45 = arith.constant dense<0.000000e+00> : vector<2x128xf32>
    %121 = tpu.matmul %99, %3, %cst_45 {dimension_numbers = #tpu.dot_dimension_numbers<[1], [0], [0], [1], [0, 0, 1, 1], [], []>} : vector<2x32xf32>, vector<32x128xf32>, vector<2x128xf32> -> vector<2x128xf32>
    %122 = arith.addf %38, %121 : vector<2x128xf32>
    %123 = arith.negf %122 : vector<2x128xf32>
    %124 = math.exp %123 : vector<2x128xf32>
    %cst_46 = arith.constant 1.000000e+00 : f32
    %125 = vector.broadcast %cst_46 : f32 to vector<2x128xf32>
    %126 = arith.addf %125, %124 : vector<2x128xf32>
    %127 = arith.divf %125, %126 : vector<2x128xf32>
    %128 = vector.extract_strided_slice %127 {offsets = [0, 0], sizes = [2, 32], strides = [1, 1]} : vector<2x128xf32> to vector<2x32xf32>
    %129 = vector.extract_strided_slice %127 {offsets = [0, 32], sizes = [2, 32], strides = [1, 1]} : vector<2x128xf32> to vector<2x32xf32>
    %130 = vector.extract_strided_slice %127 {offsets = [0, 64], sizes = [2, 32], strides = [1, 1]} : vector<2x128xf32> to vector<2x32xf32>
    %cst_47 = arith.constant 2.000000e+00 : f32
    %131 = vector.broadcast %cst_47 : f32 to vector<2x32xf32>
    %132 = arith.mulf %131, %130 : vector<2x32xf32>
    %cst_48 = arith.constant 1.000000e+00 : f32
    %133 = vector.broadcast %cst_48 : f32 to vector<2x32xf32>
    %134 = arith.subf %132, %133 : vector<2x32xf32>
    %135 = vector.extract_strided_slice %127 {offsets = [0, 96], sizes = [2, 32], strides = [1, 1]} : vector<2x128xf32> to vector<2x32xf32>
    %136 = arith.mulf %129, %97 : vector<2x32xf32>
    %137 = arith.mulf %128, %134 : vector<2x32xf32>
    %138 = arith.addf %136, %137 : vector<2x32xf32>
    %139 = math.tanh %138 : vector<2x32xf32>
    %140 = arith.mulf %135, %139 : vector<2x32xf32>
    %141 = tpu.concatenate %99, %120 in 1 : vector<2x32xf32>, vector<2x32xf32> -> vector<2x64xf32>
    %cst_49 = arith.constant dense<0.000000e+00> : vector<2x128xf32>
    %142 = tpu.matmul %141, %5, %cst_49 {dimension_numbers = #tpu.dot_dimension_numbers<[1], [0], [0], [1], [0, 0, 1, 1], [], []>} : vector<2x64xf32>, vector<64x128xf32>, vector<2x128xf32> -> vector<2x128xf32>
    %143 = arith.addf %142, %17 : vector<2x128xf32>
    %144 = arith.negf %143 : vector<2x128xf32>
    %145 = math.exp %144 : vector<2x128xf32>
    %cst_50 = arith.constant 1.000000e+00 : f32
    %146 = vector.broadcast %cst_50 : f32 to vector<2x128xf32>
    %147 = arith.addf %146, %145 : vector<2x128xf32>
    %148 = arith.divf %146, %147 : vector<2x128xf32>
    %149 = vector.extract_strided_slice %148 {offsets = [0, 0], sizes = [2, 32], strides = [1, 1]} : vector<2x128xf32> to vector<2x32xf32>
    %150 = vector.extract_strided_slice %148 {offsets = [0, 32], sizes = [2, 32], strides = [1, 1]} : vector<2x128xf32> to vector<2x32xf32>
    %151 = vector.extract_strided_slice %148 {offsets = [0, 64], sizes = [2, 32], strides = [1, 1]} : vector<2x128xf32> to vector<2x32xf32>
    %cst_51 = arith.constant 2.000000e+00 : f32
    %152 = vector.broadcast %cst_51 : f32 to vector<2x32xf32>
    %153 = arith.mulf %152, %151 : vector<2x32xf32>
    %cst_52 = arith.constant 1.000000e+00 : f32
    %154 = vector.broadcast %cst_52 : f32 to vector<2x32xf32>
    %155 = arith.subf %153, %154 : vector<2x32xf32>
    %156 = vector.extract_strided_slice %148 {offsets = [0, 96], sizes = [2, 32], strides = [1, 1]} : vector<2x128xf32> to vector<2x32xf32>
    %157 = arith.mulf %150, %118 : vector<2x32xf32>
    %158 = arith.mulf %149, %155 : vector<2x32xf32>
    %159 = arith.addf %157, %158 : vector<2x32xf32>
    %160 = math.tanh %159 : vector<2x32xf32>
    %161 = arith.mulf %156, %160 : vector<2x32xf32>
    %162 = tpu.concatenate %120, %59 in 1 : vector<2x32xf32>, vector<2x32xf32> -> vector<2x64xf32>
    %cst_53 = arith.constant dense<0.000000e+00> : vector<2x128xf32>
    %163 = tpu.matmul %162, %7, %cst_53 {dimension_numbers = #tpu.dot_dimension_numbers<[1], [0], [0], [1], [0, 0, 1, 1], [], []>} : vector<2x64xf32>, vector<64x128xf32>, vector<2x128xf32> -> vector<2x128xf32>
    %164 = arith.addf %163, %21 : vector<2x128xf32>
    %165 = arith.negf %164 : vector<2x128xf32>
    %166 = math.exp %165 : vector<2x128xf32>
    %cst_54 = arith.constant 1.000000e+00 : f32
    %167 = vector.broadcast %cst_54 : f32 to vector<2x128xf32>
    %168 = arith.addf %167, %166 : vector<2x128xf32>
    %169 = arith.divf %167, %168 : vector<2x128xf32>
    %170 = vector.extract_strided_slice %169 {offsets = [0, 0], sizes = [2, 32], strides = [1, 1]} : vector<2x128xf32> to vector<2x32xf32>
    %171 = vector.extract_strided_slice %169 {offsets = [0, 32], sizes = [2, 32], strides = [1, 1]} : vector<2x128xf32> to vector<2x32xf32>
    %172 = vector.extract_strided_slice %169 {offsets = [0, 64], sizes = [2, 32], strides = [1, 1]} : vector<2x128xf32> to vector<2x32xf32>
    %cst_55 = arith.constant 2.000000e+00 : f32
    %173 = vector.broadcast %cst_55 : f32 to vector<2x32xf32>
    %174 = arith.mulf %173, %172 : vector<2x32xf32>
    %cst_56 = arith.constant 1.000000e+00 : f32
    %175 = vector.broadcast %cst_56 : f32 to vector<2x32xf32>
    %176 = arith.subf %174, %175 : vector<2x32xf32>
    %177 = vector.extract_strided_slice %169 {offsets = [0, 96], sizes = [2, 32], strides = [1, 1]} : vector<2x128xf32> to vector<2x32xf32>
    %178 = arith.mulf %171, %59 : vector<2x32xf32>
    %179 = arith.mulf %170, %176 : vector<2x32xf32>
    %180 = arith.addf %178, %179 : vector<2x32xf32>
    %181 = math.tanh %180 : vector<2x32xf32>
    %182 = arith.mulf %177, %181 : vector<2x32xf32>
    %cst_57 = arith.constant dense<0.000000e+00> : vector<2x128xf32>
    %183 = tpu.matmul %140, %3, %cst_57 {dimension_numbers = #tpu.dot_dimension_numbers<[1], [0], [0], [1], [0, 0, 1, 1], [], []>} : vector<2x32xf32>, vector<32x128xf32>, vector<2x128xf32> -> vector<2x128xf32>
    %184 = arith.addf %42, %183 : vector<2x128xf32>
    %185 = arith.negf %184 : vector<2x128xf32>
    %186 = math.exp %185 : vector<2x128xf32>
    %cst_58 = arith.constant 1.000000e+00 : f32
    %187 = vector.broadcast %cst_58 : f32 to vector<2x128xf32>
    %188 = arith.addf %187, %186 : vector<2x128xf32>
    %189 = arith.divf %187, %188 : vector<2x128xf32>
    %190 = vector.extract_strided_slice %189 {offsets = [0, 0], sizes = [2, 32], strides = [1, 1]} : vector<2x128xf32> to vector<2x32xf32>
    %191 = vector.extract_strided_slice %189 {offsets = [0, 32], sizes = [2, 32], strides = [1, 1]} : vector<2x128xf32> to vector<2x32xf32>
    %192 = vector.extract_strided_slice %189 {offsets = [0, 64], sizes = [2, 32], strides = [1, 1]} : vector<2x128xf32> to vector<2x32xf32>
    %cst_59 = arith.constant 2.000000e+00 : f32
    %193 = vector.broadcast %cst_59 : f32 to vector<2x32xf32>
    %194 = arith.mulf %193, %192 : vector<2x32xf32>
    %cst_60 = arith.constant 1.000000e+00 : f32
    %195 = vector.broadcast %cst_60 : f32 to vector<2x32xf32>
    %196 = arith.subf %194, %195 : vector<2x32xf32>
    %197 = vector.extract_strided_slice %189 {offsets = [0, 96], sizes = [2, 32], strides = [1, 1]} : vector<2x128xf32> to vector<2x32xf32>
    %198 = arith.mulf %191, %138 : vector<2x32xf32>
    %199 = arith.mulf %190, %196 : vector<2x32xf32>
    %200 = arith.addf %198, %199 : vector<2x32xf32>
    %201 = math.tanh %200 : vector<2x32xf32>
    %202 = arith.mulf %197, %201 : vector<2x32xf32>
    %203 = tpu.concatenate %140, %161 in 1 : vector<2x32xf32>, vector<2x32xf32> -> vector<2x64xf32>
    %cst_61 = arith.constant dense<0.000000e+00> : vector<2x128xf32>
    %204 = tpu.matmul %203, %5, %cst_61 {dimension_numbers = #tpu.dot_dimension_numbers<[1], [0], [0], [1], [0, 0, 1, 1], [], []>} : vector<2x64xf32>, vector<64x128xf32>, vector<2x128xf32> -> vector<2x128xf32>
    %205 = arith.addf %204, %17 : vector<2x128xf32>
    %206 = arith.negf %205 : vector<2x128xf32>
    %207 = math.exp %206 : vector<2x128xf32>
    %cst_62 = arith.constant 1.000000e+00 : f32
    %208 = vector.broadcast %cst_62 : f32 to vector<2x128xf32>
    %209 = arith.addf %208, %207 : vector<2x128xf32>
    %210 = arith.divf %208, %209 : vector<2x128xf32>
    %211 = vector.extract_strided_slice %210 {offsets = [0, 0], sizes = [2, 32], strides = [1, 1]} : vector<2x128xf32> to vector<2x32xf32>
    %212 = vector.extract_strided_slice %210 {offsets = [0, 32], sizes = [2, 32], strides = [1, 1]} : vector<2x128xf32> to vector<2x32xf32>
    %213 = vector.extract_strided_slice %210 {offsets = [0, 64], sizes = [2, 32], strides = [1, 1]} : vector<2x128xf32> to vector<2x32xf32>
    %cst_63 = arith.constant 2.000000e+00 : f32
    %214 = vector.broadcast %cst_63 : f32 to vector<2x32xf32>
    %215 = arith.mulf %214, %213 : vector<2x32xf32>
    %cst_64 = arith.constant 1.000000e+00 : f32
    %216 = vector.broadcast %cst_64 : f32 to vector<2x32xf32>
    %217 = arith.subf %215, %216 : vector<2x32xf32>
    %218 = vector.extract_strided_slice %210 {offsets = [0, 96], sizes = [2, 32], strides = [1, 1]} : vector<2x128xf32> to vector<2x32xf32>
    %219 = arith.mulf %212, %159 : vector<2x32xf32>
    %220 = arith.mulf %211, %217 : vector<2x32xf32>
    %221 = arith.addf %219, %220 : vector<2x32xf32>
    %222 = math.tanh %221 : vector<2x32xf32>
    %223 = arith.mulf %218, %222 : vector<2x32xf32>
    %224 = tpu.concatenate %161, %182 in 1 : vector<2x32xf32>, vector<2x32xf32> -> vector<2x64xf32>
    %cst_65 = arith.constant dense<0.000000e+00> : vector<2x128xf32>
    %225 = tpu.matmul %224, %7, %cst_65 {dimension_numbers = #tpu.dot_dimension_numbers<[1], [0], [0], [1], [0, 0, 1, 1], [], []>} : vector<2x64xf32>, vector<64x128xf32>, vector<2x128xf32> -> vector<2x128xf32>
    %226 = arith.addf %225, %21 : vector<2x128xf32>
    %227 = arith.negf %226 : vector<2x128xf32>
    %228 = math.exp %227 : vector<2x128xf32>
    %cst_66 = arith.constant 1.000000e+00 : f32
    %229 = vector.broadcast %cst_66 : f32 to vector<2x128xf32>
    %230 = arith.addf %229, %228 : vector<2x128xf32>
    %231 = arith.divf %229, %230 : vector<2x128xf32>
    %232 = vector.extract_strided_slice %231 {offsets = [0, 0], sizes = [2, 32], strides = [1, 1]} : vector<2x128xf32> to vector<2x32xf32>
    %233 = vector.extract_strided_slice %231 {offsets = [0, 32], sizes = [2, 32], strides = [1, 1]} : vector<2x128xf32> to vector<2x32xf32>
    %234 = vector.extract_strided_slice %231 {offsets = [0, 64], sizes = [2, 32], strides = [1, 1]} : vector<2x128xf32> to vector<2x32xf32>
    %cst_67 = arith.constant 2.000000e+00 : f32
    %235 = vector.broadcast %cst_67 : f32 to vector<2x32xf32>
    %236 = arith.mulf %235, %234 : vector<2x32xf32>
    %cst_68 = arith.constant 1.000000e+00 : f32
    %237 = vector.broadcast %cst_68 : f32 to vector<2x32xf32>
    %238 = arith.subf %236, %237 : vector<2x32xf32>
    %239 = vector.extract_strided_slice %231 {offsets = [0, 96], sizes = [2, 32], strides = [1, 1]} : vector<2x128xf32> to vector<2x32xf32>
    %240 = arith.mulf %233, %180 : vector<2x32xf32>
    %241 = arith.mulf %232, %238 : vector<2x32xf32>
    %242 = arith.addf %240, %241 : vector<2x32xf32>
    %243 = math.tanh %242 : vector<2x32xf32>
    %244 = arith.mulf %239, %243 : vector<2x32xf32>
    %245 = tpu.concatenate %182, %59 in 1 : vector<2x32xf32>, vector<2x32xf32> -> vector<2x64xf32>
    %cst_69 = arith.constant dense<0.000000e+00> : vector<2x128xf32>
    %246 = tpu.matmul %245, %9, %cst_69 {dimension_numbers = #tpu.dot_dimension_numbers<[1], [0], [0], [1], [0, 0, 1, 1], [], []>} : vector<2x64xf32>, vector<64x128xf32>, vector<2x128xf32> -> vector<2x128xf32>
    %247 = arith.addf %246, %25 : vector<2x128xf32>
    %248 = arith.negf %247 : vector<2x128xf32>
    %249 = math.exp %248 : vector<2x128xf32>
    %cst_70 = arith.constant 1.000000e+00 : f32
    %250 = vector.broadcast %cst_70 : f32 to vector<2x128xf32>
    %251 = arith.addf %250, %249 : vector<2x128xf32>
    %252 = arith.divf %250, %251 : vector<2x128xf32>
    %253 = vector.extract_strided_slice %252 {offsets = [0, 0], sizes = [2, 32], strides = [1, 1]} : vector<2x128xf32> to vector<2x32xf32>
    %254 = vector.extract_strided_slice %252 {offsets = [0, 32], sizes = [2, 32], strides = [1, 1]} : vector<2x128xf32> to vector<2x32xf32>
    %255 = vector.extract_strided_slice %252 {offsets = [0, 64], sizes = [2, 32], strides = [1, 1]} : vector<2x128xf32> to vector<2x32xf32>
    %cst_71 = arith.constant 2.000000e+00 : f32
    %256 = vector.broadcast %cst_71 : f32 to vector<2x32xf32>
    %257 = arith.mulf %256, %255 : vector<2x32xf32>
    %cst_72 = arith.constant 1.000000e+00 : f32
    %258 = vector.broadcast %cst_72 : f32 to vector<2x32xf32>
    %259 = arith.subf %257, %258 : vector<2x32xf32>
    %260 = vector.extract_strided_slice %252 {offsets = [0, 96], sizes = [2, 32], strides = [1, 1]} : vector<2x128xf32> to vector<2x32xf32>
    %261 = arith.mulf %254, %59 : vector<2x32xf32>
    %262 = arith.mulf %253, %259 : vector<2x32xf32>
    %263 = arith.addf %261, %262 : vector<2x32xf32>
    %264 = math.tanh %263 : vector<2x32xf32>
    %265 = arith.mulf %260, %264 : vector<2x32xf32>
    %cst_73 = arith.constant dense<0.000000e+00> : vector<2x128xf32>
    %266 = tpu.matmul %202, %3, %cst_73 {dimension_numbers = #tpu.dot_dimension_numbers<[1], [0], [0], [1], [0, 0, 1, 1], [], []>} : vector<2x32xf32>, vector<32x128xf32>, vector<2x128xf32> -> vector<2x128xf32>
    %267 = arith.addf %46, %266 : vector<2x128xf32>
    %268 = arith.negf %267 : vector<2x128xf32>
    %269 = math.exp %268 : vector<2x128xf32>
    %cst_74 = arith.constant 1.000000e+00 : f32
    %270 = vector.broadcast %cst_74 : f32 to vector<2x128xf32>
    %271 = arith.addf %270, %269 : vector<2x128xf32>
    %272 = arith.divf %270, %271 : vector<2x128xf32>
    %273 = vector.extract_strided_slice %272 {offsets = [0, 0], sizes = [2, 32], strides = [1, 1]} : vector<2x128xf32> to vector<2x32xf32>
    %274 = vector.extract_strided_slice %272 {offsets = [0, 32], sizes = [2, 32], strides = [1, 1]} : vector<2x128xf32> to vector<2x32xf32>
    %275 = vector.extract_strided_slice %272 {offsets = [0, 64], sizes = [2, 32], strides = [1, 1]} : vector<2x128xf32> to vector<2x32xf32>
    %cst_75 = arith.constant 2.000000e+00 : f32
    %276 = vector.broadcast %cst_75 : f32 to vector<2x32xf32>
    %277 = arith.mulf %276, %275 : vector<2x32xf32>
    %cst_76 = arith.constant 1.000000e+00 : f32
    %278 = vector.broadcast %cst_76 : f32 to vector<2x32xf32>
    %279 = arith.subf %277, %278 : vector<2x32xf32>
    %280 = vector.extract_strided_slice %272 {offsets = [0, 96], sizes = [2, 32], strides = [1, 1]} : vector<2x128xf32> to vector<2x32xf32>
    %281 = arith.mulf %274, %200 : vector<2x32xf32>
    %282 = arith.mulf %273, %279 : vector<2x32xf32>
    %283 = arith.addf %281, %282 : vector<2x32xf32>
    %284 = math.tanh %283 : vector<2x32xf32>
    %285 = arith.mulf %280, %284 : vector<2x32xf32>
    %286 = tpu.concatenate %202, %223 in 1 : vector<2x32xf32>, vector<2x32xf32> -> vector<2x64xf32>
    %cst_77 = arith.constant dense<0.000000e+00> : vector<2x128xf32>
    %287 = tpu.matmul %286, %5, %cst_77 {dimension_numbers = #tpu.dot_dimension_numbers<[1], [0], [0], [1], [0, 0, 1, 1], [], []>} : vector<2x64xf32>, vector<64x128xf32>, vector<2x128xf32> -> vector<2x128xf32>
    %288 = arith.addf %287, %17 : vector<2x128xf32>
    %289 = arith.negf %288 : vector<2x128xf32>
    %290 = math.exp %289 : vector<2x128xf32>
    %cst_78 = arith.constant 1.000000e+00 : f32
    %291 = vector.broadcast %cst_78 : f32 to vector<2x128xf32>
    %292 = arith.addf %291, %290 : vector<2x128xf32>
    %293 = arith.divf %291, %292 : vector<2x128xf32>
    %294 = vector.extract_strided_slice %293 {offsets = [0, 0], sizes = [2, 32], strides = [1, 1]} : vector<2x128xf32> to vector<2x32xf32>
    %295 = vector.extract_strided_slice %293 {offsets = [0, 32], sizes = [2, 32], strides = [1, 1]} : vector<2x128xf32> to vector<2x32xf32>
    %296 = vector.extract_strided_slice %293 {offsets = [0, 64], sizes = [2, 32], strides = [1, 1]} : vector<2x128xf32> to vector<2x32xf32>
    %cst_79 = arith.constant 2.000000e+00 : f32
    %297 = vector.broadcast %cst_79 : f32 to vector<2x32xf32>
    %298 = arith.mulf %297, %296 : vector<2x32xf32>
    %cst_80 = arith.constant 1.000000e+00 : f32
    %299 = vector.broadcast %cst_80 : f32 to vector<2x32xf32>
    %300 = arith.subf %298, %299 : vector<2x32xf32>
    %301 = vector.extract_strided_slice %293 {offsets = [0, 96], sizes = [2, 32], strides = [1, 1]} : vector<2x128xf32> to vector<2x32xf32>
    %302 = arith.mulf %295, %221 : vector<2x32xf32>
    %303 = arith.mulf %294, %300 : vector<2x32xf32>
    %304 = arith.addf %302, %303 : vector<2x32xf32>
    %305 = math.tanh %304 : vector<2x32xf32>
    %306 = arith.mulf %301, %305 : vector<2x32xf32>
    %307 = tpu.concatenate %223, %244 in 1 : vector<2x32xf32>, vector<2x32xf32> -> vector<2x64xf32>
    %cst_81 = arith.constant dense<0.000000e+00> : vector<2x128xf32>
    %308 = tpu.matmul %307, %7, %cst_81 {dimension_numbers = #tpu.dot_dimension_numbers<[1], [0], [0], [1], [0, 0, 1, 1], [], []>} : vector<2x64xf32>, vector<64x128xf32>, vector<2x128xf32> -> vector<2x128xf32>
    %309 = arith.addf %308, %21 : vector<2x128xf32>
    %310 = arith.negf %309 : vector<2x128xf32>
    %311 = math.exp %310 : vector<2x128xf32>
    %cst_82 = arith.constant 1.000000e+00 : f32
    %312 = vector.broadcast %cst_82 : f32 to vector<2x128xf32>
    %313 = arith.addf %312, %311 : vector<2x128xf32>
    %314 = arith.divf %312, %313 : vector<2x128xf32>
    %315 = vector.extract_strided_slice %314 {offsets = [0, 0], sizes = [2, 32], strides = [1, 1]} : vector<2x128xf32> to vector<2x32xf32>
    %316 = vector.extract_strided_slice %314 {offsets = [0, 32], sizes = [2, 32], strides = [1, 1]} : vector<2x128xf32> to vector<2x32xf32>
    %317 = vector.extract_strided_slice %314 {offsets = [0, 64], sizes = [2, 32], strides = [1, 1]} : vector<2x128xf32> to vector<2x32xf32>
    %cst_83 = arith.constant 2.000000e+00 : f32
    %318 = vector.broadcast %cst_83 : f32 to vector<2x32xf32>
    %319 = arith.mulf %318, %317 : vector<2x32xf32>
    %cst_84 = arith.constant 1.000000e+00 : f32
    %320 = vector.broadcast %cst_84 : f32 to vector<2x32xf32>
    %321 = arith.subf %319, %320 : vector<2x32xf32>
    %322 = vector.extract_strided_slice %314 {offsets = [0, 96], sizes = [2, 32], strides = [1, 1]} : vector<2x128xf32> to vector<2x32xf32>
    %323 = arith.mulf %316, %242 : vector<2x32xf32>
    %324 = arith.mulf %315, %321 : vector<2x32xf32>
    %325 = arith.addf %323, %324 : vector<2x32xf32>
    %326 = math.tanh %325 : vector<2x32xf32>
    %327 = arith.mulf %322, %326 : vector<2x32xf32>
    %328 = tpu.concatenate %244, %265 in 1 : vector<2x32xf32>, vector<2x32xf32> -> vector<2x64xf32>
    %cst_85 = arith.constant dense<0.000000e+00> : vector<2x128xf32>
    %329 = tpu.matmul %328, %9, %cst_85 {dimension_numbers = #tpu.dot_dimension_numbers<[1], [0], [0], [1], [0, 0, 1, 1], [], []>} : vector<2x64xf32>, vector<64x128xf32>, vector<2x128xf32> -> vector<2x128xf32>
    %330 = arith.addf %329, %25 : vector<2x128xf32>
    %331 = arith.negf %330 : vector<2x128xf32>
    %332 = math.exp %331 : vector<2x128xf32>
    %cst_86 = arith.constant 1.000000e+00 : f32
    %333 = vector.broadcast %cst_86 : f32 to vector<2x128xf32>
    %334 = arith.addf %333, %332 : vector<2x128xf32>
    %335 = arith.divf %333, %334 : vector<2x128xf32>
    %336 = vector.extract_strided_slice %335 {offsets = [0, 0], sizes = [2, 32], strides = [1, 1]} : vector<2x128xf32> to vector<2x32xf32>
    %337 = vector.extract_strided_slice %335 {offsets = [0, 32], sizes = [2, 32], strides = [1, 1]} : vector<2x128xf32> to vector<2x32xf32>
    %338 = vector.extract_strided_slice %335 {offsets = [0, 64], sizes = [2, 32], strides = [1, 1]} : vector<2x128xf32> to vector<2x32xf32>
    %cst_87 = arith.constant 2.000000e+00 : f32
    %339 = vector.broadcast %cst_87 : f32 to vector<2x32xf32>
    %340 = arith.mulf %339, %338 : vector<2x32xf32>
    %cst_88 = arith.constant 1.000000e+00 : f32
    %341 = vector.broadcast %cst_88 : f32 to vector<2x32xf32>
    %342 = arith.subf %340, %341 : vector<2x32xf32>
    %343 = vector.extract_strided_slice %335 {offsets = [0, 96], sizes = [2, 32], strides = [1, 1]} : vector<2x128xf32> to vector<2x32xf32>
    %344 = arith.mulf %337, %263 : vector<2x32xf32>
    %345 = arith.mulf %336, %342 : vector<2x32xf32>
    %346 = arith.addf %344, %345 : vector<2x32xf32>
    %347 = math.tanh %346 : vector<2x32xf32>
    %348 = arith.mulf %343, %347 : vector<2x32xf32>
    %cst_89 = arith.constant dense<0.000000e+00> : vector<2x128xf32>
    %349 = tpu.matmul %285, %3, %cst_89 {dimension_numbers = #tpu.dot_dimension_numbers<[1], [0], [0], [1], [0, 0, 1, 1], [], []>} : vector<2x32xf32>, vector<32x128xf32>, vector<2x128xf32> -> vector<2x128xf32>
    %350 = arith.addf %50, %349 : vector<2x128xf32>
    %351 = arith.negf %350 : vector<2x128xf32>
    %352 = math.exp %351 : vector<2x128xf32>
    %cst_90 = arith.constant 1.000000e+00 : f32
    %353 = vector.broadcast %cst_90 : f32 to vector<2x128xf32>
    %354 = arith.addf %353, %352 : vector<2x128xf32>
    %355 = arith.divf %353, %354 : vector<2x128xf32>
    %356 = vector.extract_strided_slice %355 {offsets = [0, 0], sizes = [2, 32], strides = [1, 1]} : vector<2x128xf32> to vector<2x32xf32>
    %357 = vector.extract_strided_slice %355 {offsets = [0, 32], sizes = [2, 32], strides = [1, 1]} : vector<2x128xf32> to vector<2x32xf32>
    %358 = vector.extract_strided_slice %355 {offsets = [0, 64], sizes = [2, 32], strides = [1, 1]} : vector<2x128xf32> to vector<2x32xf32>
    %cst_91 = arith.constant 2.000000e+00 : f32
    %359 = vector.broadcast %cst_91 : f32 to vector<2x32xf32>
    %360 = arith.mulf %359, %358 : vector<2x32xf32>
    %cst_92 = arith.constant 1.000000e+00 : f32
    %361 = vector.broadcast %cst_92 : f32 to vector<2x32xf32>
    %362 = arith.subf %360, %361 : vector<2x32xf32>
    %363 = vector.extract_strided_slice %355 {offsets = [0, 96], sizes = [2, 32], strides = [1, 1]} : vector<2x128xf32> to vector<2x32xf32>
    %364 = arith.mulf %357, %283 : vector<2x32xf32>
    %365 = arith.mulf %356, %362 : vector<2x32xf32>
    %366 = arith.addf %364, %365 : vector<2x32xf32>
    %367 = math.tanh %366 : vector<2x32xf32>
    %368 = arith.mulf %363, %367 : vector<2x32xf32>
    %369 = tpu.concatenate %285, %306 in 1 : vector<2x32xf32>, vector<2x32xf32> -> vector<2x64xf32>
    %cst_93 = arith.constant dense<0.000000e+00> : vector<2x128xf32>
    %370 = tpu.matmul %369, %5, %cst_93 {dimension_numbers = #tpu.dot_dimension_numbers<[1], [0], [0], [1], [0, 0, 1, 1], [], []>} : vector<2x64xf32>, vector<64x128xf32>, vector<2x128xf32> -> vector<2x128xf32>
    %371 = arith.addf %370, %17 : vector<2x128xf32>
    %372 = arith.negf %371 : vector<2x128xf32>
    %373 = math.exp %372 : vector<2x128xf32>
    %cst_94 = arith.constant 1.000000e+00 : f32
    %374 = vector.broadcast %cst_94 : f32 to vector<2x128xf32>
    %375 = arith.addf %374, %373 : vector<2x128xf32>
    %376 = arith.divf %374, %375 : vector<2x128xf32>
    %377 = vector.extract_strided_slice %376 {offsets = [0, 0], sizes = [2, 32], strides = [1, 1]} : vector<2x128xf32> to vector<2x32xf32>
    %378 = vector.extract_strided_slice %376 {offsets = [0, 32], sizes = [2, 32], strides = [1, 1]} : vector<2x128xf32> to vector<2x32xf32>
    %379 = vector.extract_strided_slice %376 {offsets = [0, 64], sizes = [2, 32], strides = [1, 1]} : vector<2x128xf32> to vector<2x32xf32>
    %cst_95 = arith.constant 2.000000e+00 : f32
    %380 = vector.broadcast %cst_95 : f32 to vector<2x32xf32>
    %381 = arith.mulf %380, %379 : vector<2x32xf32>
    %cst_96 = arith.constant 1.000000e+00 : f32
    %382 = vector.broadcast %cst_96 : f32 to vector<2x32xf32>
    %383 = arith.subf %381, %382 : vector<2x32xf32>
    %384 = vector.extract_strided_slice %376 {offsets = [0, 96], sizes = [2, 32], strides = [1, 1]} : vector<2x128xf32> to vector<2x32xf32>
    %385 = arith.mulf %378, %304 : vector<2x32xf32>
    %386 = arith.mulf %377, %383 : vector<2x32xf32>
    %387 = arith.addf %385, %386 : vector<2x32xf32>
    %388 = math.tanh %387 : vector<2x32xf32>
    %389 = arith.mulf %384, %388 : vector<2x32xf32>
    %390 = tpu.concatenate %306, %327 in 1 : vector<2x32xf32>, vector<2x32xf32> -> vector<2x64xf32>
    %cst_97 = arith.constant dense<0.000000e+00> : vector<2x128xf32>
    %391 = tpu.matmul %390, %7, %cst_97 {dimension_numbers = #tpu.dot_dimension_numbers<[1], [0], [0], [1], [0, 0, 1, 1], [], []>} : vector<2x64xf32>, vector<64x128xf32>, vector<2x128xf32> -> vector<2x128xf32>
    %392 = arith.addf %391, %21 : vector<2x128xf32>
    %393 = arith.negf %392 : vector<2x128xf32>
    %394 = math.exp %393 : vector<2x128xf32>
    %cst_98 = arith.constant 1.000000e+00 : f32
    %395 = vector.broadcast %cst_98 : f32 to vector<2x128xf32>
    %396 = arith.addf %395, %394 : vector<2x128xf32>
    %397 = arith.divf %395, %396 : vector<2x128xf32>
    %398 = vector.extract_strided_slice %397 {offsets = [0, 0], sizes = [2, 32], strides = [1, 1]} : vector<2x128xf32> to vector<2x32xf32>
    %399 = vector.extract_strided_slice %397 {offsets = [0, 32], sizes = [2, 32], strides = [1, 1]} : vector<2x128xf32> to vector<2x32xf32>
    %400 = vector.extract_strided_slice %397 {offsets = [0, 64], sizes = [2, 32], strides = [1, 1]} : vector<2x128xf32> to vector<2x32xf32>
    %cst_99 = arith.constant 2.000000e+00 : f32
    %401 = vector.broadcast %cst_99 : f32 to vector<2x32xf32>
    %402 = arith.mulf %401, %400 : vector<2x32xf32>
    %cst_100 = arith.constant 1.000000e+00 : f32
    %403 = vector.broadcast %cst_100 : f32 to vector<2x32xf32>
    %404 = arith.subf %402, %403 : vector<2x32xf32>
    %405 = vector.extract_strided_slice %397 {offsets = [0, 96], sizes = [2, 32], strides = [1, 1]} : vector<2x128xf32> to vector<2x32xf32>
    %406 = arith.mulf %399, %325 : vector<2x32xf32>
    %407 = arith.mulf %398, %404 : vector<2x32xf32>
    %408 = arith.addf %406, %407 : vector<2x32xf32>
    %409 = math.tanh %408 : vector<2x32xf32>
    %410 = arith.mulf %405, %409 : vector<2x32xf32>
    %411 = tpu.concatenate %327, %348 in 1 : vector<2x32xf32>, vector<2x32xf32> -> vector<2x64xf32>
    %cst_101 = arith.constant dense<0.000000e+00> : vector<2x128xf32>
    %412 = tpu.matmul %411, %9, %cst_101 {dimension_numbers = #tpu.dot_dimension_numbers<[1], [0], [0], [1], [0, 0, 1, 1], [], []>} : vector<2x64xf32>, vector<64x128xf32>, vector<2x128xf32> -> vector<2x128xf32>
    %413 = arith.addf %412, %25 : vector<2x128xf32>
    %414 = arith.negf %413 : vector<2x128xf32>
    %415 = math.exp %414 : vector<2x128xf32>
    %cst_102 = arith.constant 1.000000e+00 : f32
    %416 = vector.broadcast %cst_102 : f32 to vector<2x128xf32>
    %417 = arith.addf %416, %415 : vector<2x128xf32>
    %418 = arith.divf %416, %417 : vector<2x128xf32>
    %419 = vector.extract_strided_slice %418 {offsets = [0, 0], sizes = [2, 32], strides = [1, 1]} : vector<2x128xf32> to vector<2x32xf32>
    %420 = vector.extract_strided_slice %418 {offsets = [0, 32], sizes = [2, 32], strides = [1, 1]} : vector<2x128xf32> to vector<2x32xf32>
    %421 = vector.extract_strided_slice %418 {offsets = [0, 64], sizes = [2, 32], strides = [1, 1]} : vector<2x128xf32> to vector<2x32xf32>
    %cst_103 = arith.constant 2.000000e+00 : f32
    %422 = vector.broadcast %cst_103 : f32 to vector<2x32xf32>
    %423 = arith.mulf %422, %421 : vector<2x32xf32>
    %cst_104 = arith.constant 1.000000e+00 : f32
    %424 = vector.broadcast %cst_104 : f32 to vector<2x32xf32>
    %425 = arith.subf %423, %424 : vector<2x32xf32>
    %426 = vector.extract_strided_slice %418 {offsets = [0, 96], sizes = [2, 32], strides = [1, 1]} : vector<2x128xf32> to vector<2x32xf32>
    %427 = arith.mulf %420, %346 : vector<2x32xf32>
    %428 = arith.mulf %419, %425 : vector<2x32xf32>
    %429 = arith.addf %427, %428 : vector<2x32xf32>
    %430 = math.tanh %429 : vector<2x32xf32>
    %431 = arith.mulf %426, %430 : vector<2x32xf32>
    %cst_105 = arith.constant dense<0.000000e+00> : vector<2x128xf32>
    %432 = tpu.matmul %368, %3, %cst_105 {dimension_numbers = #tpu.dot_dimension_numbers<[1], [0], [0], [1], [0, 0, 1, 1], [], []>} : vector<2x32xf32>, vector<32x128xf32>, vector<2x128xf32> -> vector<2x128xf32>
    %433 = arith.addf %54, %432 : vector<2x128xf32>
    %434 = arith.negf %433 : vector<2x128xf32>
    %435 = math.exp %434 : vector<2x128xf32>
    %cst_106 = arith.constant 1.000000e+00 : f32
    %436 = vector.broadcast %cst_106 : f32 to vector<2x128xf32>
    %437 = arith.addf %436, %435 : vector<2x128xf32>
    %438 = arith.divf %436, %437 : vector<2x128xf32>
    %439 = vector.extract_strided_slice %438 {offsets = [0, 0], sizes = [2, 32], strides = [1, 1]} : vector<2x128xf32> to vector<2x32xf32>
    %440 = vector.extract_strided_slice %438 {offsets = [0, 32], sizes = [2, 32], strides = [1, 1]} : vector<2x128xf32> to vector<2x32xf32>
    %441 = vector.extract_strided_slice %438 {offsets = [0, 64], sizes = [2, 32], strides = [1, 1]} : vector<2x128xf32> to vector<2x32xf32>
    %cst_107 = arith.constant 2.000000e+00 : f32
    %442 = vector.broadcast %cst_107 : f32 to vector<2x32xf32>
    %443 = arith.mulf %442, %441 : vector<2x32xf32>
    %cst_108 = arith.constant 1.000000e+00 : f32
    %444 = vector.broadcast %cst_108 : f32 to vector<2x32xf32>
    %445 = arith.subf %443, %444 : vector<2x32xf32>
    %446 = vector.extract_strided_slice %438 {offsets = [0, 96], sizes = [2, 32], strides = [1, 1]} : vector<2x128xf32> to vector<2x32xf32>
    %447 = arith.mulf %440, %366 : vector<2x32xf32>
    %448 = arith.mulf %439, %445 : vector<2x32xf32>
    %449 = arith.addf %447, %448 : vector<2x32xf32>
    %450 = math.tanh %449 : vector<2x32xf32>
    %451 = arith.mulf %446, %450 : vector<2x32xf32>
    %452 = tpu.concatenate %368, %389 in 1 : vector<2x32xf32>, vector<2x32xf32> -> vector<2x64xf32>
    %cst_109 = arith.constant dense<0.000000e+00> : vector<2x128xf32>
    %453 = tpu.matmul %452, %5, %cst_109 {dimension_numbers = #tpu.dot_dimension_numbers<[1], [0], [0], [1], [0, 0, 1, 1], [], []>} : vector<2x64xf32>, vector<64x128xf32>, vector<2x128xf32> -> vector<2x128xf32>
    %454 = arith.addf %453, %17 : vector<2x128xf32>
    %455 = arith.negf %454 : vector<2x128xf32>
    %456 = math.exp %455 : vector<2x128xf32>
    %cst_110 = arith.constant 1.000000e+00 : f32
    %457 = vector.broadcast %cst_110 : f32 to vector<2x128xf32>
    %458 = arith.addf %457, %456 : vector<2x128xf32>
    %459 = arith.divf %457, %458 : vector<2x128xf32>
    %460 = vector.extract_strided_slice %459 {offsets = [0, 0], sizes = [2, 32], strides = [1, 1]} : vector<2x128xf32> to vector<2x32xf32>
    %461 = vector.extract_strided_slice %459 {offsets = [0, 32], sizes = [2, 32], strides = [1, 1]} : vector<2x128xf32> to vector<2x32xf32>
    %462 = vector.extract_strided_slice %459 {offsets = [0, 64], sizes = [2, 32], strides = [1, 1]} : vector<2x128xf32> to vector<2x32xf32>
    %cst_111 = arith.constant 2.000000e+00 : f32
    %463 = vector.broadcast %cst_111 : f32 to vector<2x32xf32>
    %464 = arith.mulf %463, %462 : vector<2x32xf32>
    %cst_112 = arith.constant 1.000000e+00 : f32
    %465 = vector.broadcast %cst_112 : f32 to vector<2x32xf32>
    %466 = arith.subf %464, %465 : vector<2x32xf32>
    %467 = vector.extract_strided_slice %459 {offsets = [0, 96], sizes = [2, 32], strides = [1, 1]} : vector<2x128xf32> to vector<2x32xf32>
    %468 = arith.mulf %461, %387 : vector<2x32xf32>
    %469 = arith.mulf %460, %466 : vector<2x32xf32>
    %470 = arith.addf %468, %469 : vector<2x32xf32>
    %471 = math.tanh %470 : vector<2x32xf32>
    %472 = arith.mulf %467, %471 : vector<2x32xf32>
    %473 = tpu.concatenate %389, %410 in 1 : vector<2x32xf32>, vector<2x32xf32> -> vector<2x64xf32>
    %cst_113 = arith.constant dense<0.000000e+00> : vector<2x128xf32>
    %474 = tpu.matmul %473, %7, %cst_113 {dimension_numbers = #tpu.dot_dimension_numbers<[1], [0], [0], [1], [0, 0, 1, 1], [], []>} : vector<2x64xf32>, vector<64x128xf32>, vector<2x128xf32> -> vector<2x128xf32>
    %475 = arith.addf %474, %21 : vector<2x128xf32>
    %476 = arith.negf %475 : vector<2x128xf32>
    %477 = math.exp %476 : vector<2x128xf32>
    %cst_114 = arith.constant 1.000000e+00 : f32
    %478 = vector.broadcast %cst_114 : f32 to vector<2x128xf32>
    %479 = arith.addf %478, %477 : vector<2x128xf32>
    %480 = arith.divf %478, %479 : vector<2x128xf32>
    %481 = vector.extract_strided_slice %480 {offsets = [0, 0], sizes = [2, 32], strides = [1, 1]} : vector<2x128xf32> to vector<2x32xf32>
    %482 = vector.extract_strided_slice %480 {offsets = [0, 32], sizes = [2, 32], strides = [1, 1]} : vector<2x128xf32> to vector<2x32xf32>
    %483 = vector.extract_strided_slice %480 {offsets = [0, 64], sizes = [2, 32], strides = [1, 1]} : vector<2x128xf32> to vector<2x32xf32>
    %cst_115 = arith.constant 2.000000e+00 : f32
    %484 = vector.broadcast %cst_115 : f32 to vector<2x32xf32>
    %485 = arith.mulf %484, %483 : vector<2x32xf32>
    %cst_116 = arith.constant 1.000000e+00 : f32
    %486 = vector.broadcast %cst_116 : f32 to vector<2x32xf32>
    %487 = arith.subf %485, %486 : vector<2x32xf32>
    %488 = vector.extract_strided_slice %480 {offsets = [0, 96], sizes = [2, 32], strides = [1, 1]} : vector<2x128xf32> to vector<2x32xf32>
    %489 = arith.mulf %482, %408 : vector<2x32xf32>
    %490 = arith.mulf %481, %487 : vector<2x32xf32>
    %491 = arith.addf %489, %490 : vector<2x32xf32>
    %492 = math.tanh %491 : vector<2x32xf32>
    %493 = arith.mulf %488, %492 : vector<2x32xf32>
    %494 = tpu.concatenate %410, %431 in 1 : vector<2x32xf32>, vector<2x32xf32> -> vector<2x64xf32>
    %cst_117 = arith.constant dense<0.000000e+00> : vector<2x128xf32>
    %495 = tpu.matmul %494, %9, %cst_117 {dimension_numbers = #tpu.dot_dimension_numbers<[1], [0], [0], [1], [0, 0, 1, 1], [], []>} : vector<2x64xf32>, vector<64x128xf32>, vector<2x128xf32> -> vector<2x128xf32>
    %496 = arith.addf %495, %25 : vector<2x128xf32>
    %497 = arith.negf %496 : vector<2x128xf32>
    %498 = math.exp %497 : vector<2x128xf32>
    %cst_118 = arith.constant 1.000000e+00 : f32
    %499 = vector.broadcast %cst_118 : f32 to vector<2x128xf32>
    %500 = arith.addf %499, %498 : vector<2x128xf32>
    %501 = arith.divf %499, %500 : vector<2x128xf32>
    %502 = vector.extract_strided_slice %501 {offsets = [0, 0], sizes = [2, 32], strides = [1, 1]} : vector<2x128xf32> to vector<2x32xf32>
    %503 = vector.extract_strided_slice %501 {offsets = [0, 32], sizes = [2, 32], strides = [1, 1]} : vector<2x128xf32> to vector<2x32xf32>
    %504 = vector.extract_strided_slice %501 {offsets = [0, 64], sizes = [2, 32], strides = [1, 1]} : vector<2x128xf32> to vector<2x32xf32>
    %cst_119 = arith.constant 2.000000e+00 : f32
    %505 = vector.broadcast %cst_119 : f32 to vector<2x32xf32>
    %506 = arith.mulf %505, %504 : vector<2x32xf32>
    %cst_120 = arith.constant 1.000000e+00 : f32
    %507 = vector.broadcast %cst_120 : f32 to vector<2x32xf32>
    %508 = arith.subf %506, %507 : vector<2x32xf32>
    %509 = vector.extract_strided_slice %501 {offsets = [0, 96], sizes = [2, 32], strides = [1, 1]} : vector<2x128xf32> to vector<2x32xf32>
    %510 = arith.mulf %503, %429 : vector<2x32xf32>
    %511 = arith.mulf %502, %508 : vector<2x32xf32>
    %512 = arith.addf %510, %511 : vector<2x32xf32>
    %513 = math.tanh %512 : vector<2x32xf32>
    %514 = arith.mulf %509, %513 : vector<2x32xf32>
    %cst_121 = arith.constant dense<0.000000e+00> : vector<2x128xf32>
    %515 = tpu.matmul %451, %3, %cst_121 {dimension_numbers = #tpu.dot_dimension_numbers<[1], [0], [0], [1], [0, 0, 1, 1], [], []>} : vector<2x32xf32>, vector<32x128xf32>, vector<2x128xf32> -> vector<2x128xf32>
    %516 = arith.addf %58, %515 : vector<2x128xf32>
    %517 = arith.negf %516 : vector<2x128xf32>
    %518 = math.exp %517 : vector<2x128xf32>
    %cst_122 = arith.constant 1.000000e+00 : f32
    %519 = vector.broadcast %cst_122 : f32 to vector<2x128xf32>
    %520 = arith.addf %519, %518 : vector<2x128xf32>
    %521 = arith.divf %519, %520 : vector<2x128xf32>
    %522 = vector.extract_strided_slice %521 {offsets = [0, 0], sizes = [2, 32], strides = [1, 1]} : vector<2x128xf32> to vector<2x32xf32>
    %523 = vector.extract_strided_slice %521 {offsets = [0, 32], sizes = [2, 32], strides = [1, 1]} : vector<2x128xf32> to vector<2x32xf32>
    %524 = vector.extract_strided_slice %521 {offsets = [0, 64], sizes = [2, 32], strides = [1, 1]} : vector<2x128xf32> to vector<2x32xf32>
    %cst_123 = arith.constant 2.000000e+00 : f32
    %525 = vector.broadcast %cst_123 : f32 to vector<2x32xf32>
    %526 = arith.mulf %525, %524 : vector<2x32xf32>
    %cst_124 = arith.constant 1.000000e+00 : f32
    %527 = vector.broadcast %cst_124 : f32 to vector<2x32xf32>
    %528 = arith.subf %526, %527 : vector<2x32xf32>
    %529 = vector.extract_strided_slice %521 {offsets = [0, 96], sizes = [2, 32], strides = [1, 1]} : vector<2x128xf32> to vector<2x32xf32>
    %530 = arith.mulf %523, %449 : vector<2x32xf32>
    %531 = arith.mulf %522, %528 : vector<2x32xf32>
    %532 = arith.addf %530, %531 : vector<2x32xf32>
    %533 = math.tanh %532 : vector<2x32xf32>
    %534 = arith.mulf %529, %533 : vector<2x32xf32>
    %535 = tpu.concatenate %451, %472 in 1 : vector<2x32xf32>, vector<2x32xf32> -> vector<2x64xf32>
    %cst_125 = arith.constant dense<0.000000e+00> : vector<2x128xf32>
    %536 = tpu.matmul %535, %5, %cst_125 {dimension_numbers = #tpu.dot_dimension_numbers<[1], [0], [0], [1], [0, 0, 1, 1], [], []>} : vector<2x64xf32>, vector<64x128xf32>, vector<2x128xf32> -> vector<2x128xf32>
    %537 = arith.addf %536, %17 : vector<2x128xf32>
    %538 = arith.negf %537 : vector<2x128xf32>
    %539 = math.exp %538 : vector<2x128xf32>
    %cst_126 = arith.constant 1.000000e+00 : f32
    %540 = vector.broadcast %cst_126 : f32 to vector<2x128xf32>
    %541 = arith.addf %540, %539 : vector<2x128xf32>
    %542 = arith.divf %540, %541 : vector<2x128xf32>
    %543 = vector.extract_strided_slice %542 {offsets = [0, 0], sizes = [2, 32], strides = [1, 1]} : vector<2x128xf32> to vector<2x32xf32>
    %544 = vector.extract_strided_slice %542 {offsets = [0, 32], sizes = [2, 32], strides = [1, 1]} : vector<2x128xf32> to vector<2x32xf32>
    %545 = vector.extract_strided_slice %542 {offsets = [0, 64], sizes = [2, 32], strides = [1, 1]} : vector<2x128xf32> to vector<2x32xf32>
    %cst_127 = arith.constant 2.000000e+00 : f32
    %546 = vector.broadcast %cst_127 : f32 to vector<2x32xf32>
    %547 = arith.mulf %546, %545 : vector<2x32xf32>
    %cst_128 = arith.constant 1.000000e+00 : f32
    %548 = vector.broadcast %cst_128 : f32 to vector<2x32xf32>
    %549 = arith.subf %547, %548 : vector<2x32xf32>
    %550 = vector.extract_strided_slice %542 {offsets = [0, 96], sizes = [2, 32], strides = [1, 1]} : vector<2x128xf32> to vector<2x32xf32>
    %551 = arith.mulf %544, %470 : vector<2x32xf32>
    %552 = arith.mulf %543, %549 : vector<2x32xf32>
    %553 = arith.addf %551, %552 : vector<2x32xf32>
    %554 = math.tanh %553 : vector<2x32xf32>
    %555 = arith.mulf %550, %554 : vector<2x32xf32>
    %556 = tpu.concatenate %472, %493 in 1 : vector<2x32xf32>, vector<2x32xf32> -> vector<2x64xf32>
    %cst_129 = arith.constant dense<0.000000e+00> : vector<2x128xf32>
    %557 = tpu.matmul %556, %7, %cst_129 {dimension_numbers = #tpu.dot_dimension_numbers<[1], [0], [0], [1], [0, 0, 1, 1], [], []>} : vector<2x64xf32>, vector<64x128xf32>, vector<2x128xf32> -> vector<2x128xf32>
    %558 = arith.addf %557, %21 : vector<2x128xf32>
    %559 = arith.negf %558 : vector<2x128xf32>
    %560 = math.exp %559 : vector<2x128xf32>
    %cst_130 = arith.constant 1.000000e+00 : f32
    %561 = vector.broadcast %cst_130 : f32 to vector<2x128xf32>
    %562 = arith.addf %561, %560 : vector<2x128xf32>
    %563 = arith.divf %561, %562 : vector<2x128xf32>
    %564 = vector.extract_strided_slice %563 {offsets = [0, 0], sizes = [2, 32], strides = [1, 1]} : vector<2x128xf32> to vector<2x32xf32>
    %565 = vector.extract_strided_slice %563 {offsets = [0, 32], sizes = [2, 32], strides = [1, 1]} : vector<2x128xf32> to vector<2x32xf32>
    %566 = vector.extract_strided_slice %563 {offsets = [0, 64], sizes = [2, 32], strides = [1, 1]} : vector<2x128xf32> to vector<2x32xf32>
    %cst_131 = arith.constant 2.000000e+00 : f32
    %567 = vector.broadcast %cst_131 : f32 to vector<2x32xf32>
    %568 = arith.mulf %567, %566 : vector<2x32xf32>
    %cst_132 = arith.constant 1.000000e+00 : f32
    %569 = vector.broadcast %cst_132 : f32 to vector<2x32xf32>
    %570 = arith.subf %568, %569 : vector<2x32xf32>
    %571 = vector.extract_strided_slice %563 {offsets = [0, 96], sizes = [2, 32], strides = [1, 1]} : vector<2x128xf32> to vector<2x32xf32>
    %572 = arith.mulf %565, %491 : vector<2x32xf32>
    %573 = arith.mulf %564, %570 : vector<2x32xf32>
    %574 = arith.addf %572, %573 : vector<2x32xf32>
    %575 = math.tanh %574 : vector<2x32xf32>
    %576 = arith.mulf %571, %575 : vector<2x32xf32>
    %577 = tpu.concatenate %493, %514 in 1 : vector<2x32xf32>, vector<2x32xf32> -> vector<2x64xf32>
    %cst_133 = arith.constant dense<0.000000e+00> : vector<2x128xf32>
    %578 = tpu.matmul %577, %9, %cst_133 {dimension_numbers = #tpu.dot_dimension_numbers<[1], [0], [0], [1], [0, 0, 1, 1], [], []>} : vector<2x64xf32>, vector<64x128xf32>, vector<2x128xf32> -> vector<2x128xf32>
    %579 = arith.addf %578, %25 : vector<2x128xf32>
    %580 = arith.negf %579 : vector<2x128xf32>
    %581 = math.exp %580 : vector<2x128xf32>
    %cst_134 = arith.constant 1.000000e+00 : f32
    %582 = vector.broadcast %cst_134 : f32 to vector<2x128xf32>
    %583 = arith.addf %582, %581 : vector<2x128xf32>
    %584 = arith.divf %582, %583 : vector<2x128xf32>
    %585 = vector.extract_strided_slice %584 {offsets = [0, 0], sizes = [2, 32], strides = [1, 1]} : vector<2x128xf32> to vector<2x32xf32>
    %586 = vector.extract_strided_slice %584 {offsets = [0, 32], sizes = [2, 32], strides = [1, 1]} : vector<2x128xf32> to vector<2x32xf32>
    %587 = vector.extract_strided_slice %584 {offsets = [0, 64], sizes = [2, 32], strides = [1, 1]} : vector<2x128xf32> to vector<2x32xf32>
    %cst_135 = arith.constant 2.000000e+00 : f32
    %588 = vector.broadcast %cst_135 : f32 to vector<2x32xf32>
    %589 = arith.mulf %588, %587 : vector<2x32xf32>
    %cst_136 = arith.constant 1.000000e+00 : f32
    %590 = vector.broadcast %cst_136 : f32 to vector<2x32xf32>
    %591 = arith.subf %589, %590 : vector<2x32xf32>
    %592 = vector.extract_strided_slice %584 {offsets = [0, 96], sizes = [2, 32], strides = [1, 1]} : vector<2x128xf32> to vector<2x32xf32>
    %593 = arith.mulf %586, %512 : vector<2x32xf32>
    %594 = arith.mulf %585, %591 : vector<2x32xf32>
    %595 = arith.addf %593, %594 : vector<2x32xf32>
    %596 = math.tanh %595 : vector<2x32xf32>
    %597 = arith.mulf %592, %596 : vector<2x32xf32>
    %598 = tpu.concatenate %534, %555 in 1 : vector<2x32xf32>, vector<2x32xf32> -> vector<2x64xf32>
    %cst_137 = arith.constant dense<0.000000e+00> : vector<2x128xf32>
    %599 = tpu.matmul %598, %5, %cst_137 {dimension_numbers = #tpu.dot_dimension_numbers<[1], [0], [0], [1], [0, 0, 1, 1], [], []>} : vector<2x64xf32>, vector<64x128xf32>, vector<2x128xf32> -> vector<2x128xf32>
    %600 = arith.addf %599, %17 : vector<2x128xf32>
    %601 = arith.negf %600 : vector<2x128xf32>
    %602 = math.exp %601 : vector<2x128xf32>
    %cst_138 = arith.constant 1.000000e+00 : f32
    %603 = vector.broadcast %cst_138 : f32 to vector<2x128xf32>
    %604 = arith.addf %603, %602 : vector<2x128xf32>
    %605 = arith.divf %603, %604 : vector<2x128xf32>
    %606 = vector.extract_strided_slice %605 {offsets = [0, 0], sizes = [2, 32], strides = [1, 1]} : vector<2x128xf32> to vector<2x32xf32>
    %607 = vector.extract_strided_slice %605 {offsets = [0, 32], sizes = [2, 32], strides = [1, 1]} : vector<2x128xf32> to vector<2x32xf32>
    %608 = vector.extract_strided_slice %605 {offsets = [0, 64], sizes = [2, 32], strides = [1, 1]} : vector<2x128xf32> to vector<2x32xf32>
    %cst_139 = arith.constant 2.000000e+00 : f32
    %609 = vector.broadcast %cst_139 : f32 to vector<2x32xf32>
    %610 = arith.mulf %609, %608 : vector<2x32xf32>
    %cst_140 = arith.constant 1.000000e+00 : f32
    %611 = vector.broadcast %cst_140 : f32 to vector<2x32xf32>
    %612 = arith.subf %610, %611 : vector<2x32xf32>
    %613 = vector.extract_strided_slice %605 {offsets = [0, 96], sizes = [2, 32], strides = [1, 1]} : vector<2x128xf32> to vector<2x32xf32>
    %614 = arith.mulf %607, %553 : vector<2x32xf32>
    %615 = arith.mulf %606, %612 : vector<2x32xf32>
    %616 = arith.addf %614, %615 : vector<2x32xf32>
    %617 = math.tanh %616 : vector<2x32xf32>
    %618 = arith.mulf %613, %617 : vector<2x32xf32>
    %619 = tpu.concatenate %555, %576 in 1 : vector<2x32xf32>, vector<2x32xf32> -> vector<2x64xf32>
    %cst_141 = arith.constant dense<0.000000e+00> : vector<2x128xf32>
    %620 = tpu.matmul %619, %7, %cst_141 {dimension_numbers = #tpu.dot_dimension_numbers<[1], [0], [0], [1], [0, 0, 1, 1], [], []>} : vector<2x64xf32>, vector<64x128xf32>, vector<2x128xf32> -> vector<2x128xf32>
    %621 = arith.addf %620, %21 : vector<2x128xf32>
    %622 = arith.negf %621 : vector<2x128xf32>
    %623 = math.exp %622 : vector<2x128xf32>
    %cst_142 = arith.constant 1.000000e+00 : f32
    %624 = vector.broadcast %cst_142 : f32 to vector<2x128xf32>
    %625 = arith.addf %624, %623 : vector<2x128xf32>
    %626 = arith.divf %624, %625 : vector<2x128xf32>
    %627 = vector.extract_strided_slice %626 {offsets = [0, 0], sizes = [2, 32], strides = [1, 1]} : vector<2x128xf32> to vector<2x32xf32>
    %628 = vector.extract_strided_slice %626 {offsets = [0, 32], sizes = [2, 32], strides = [1, 1]} : vector<2x128xf32> to vector<2x32xf32>
    %629 = vector.extract_strided_slice %626 {offsets = [0, 64], sizes = [2, 32], strides = [1, 1]} : vector<2x128xf32> to vector<2x32xf32>
    %cst_143 = arith.constant 2.000000e+00 : f32
    %630 = vector.broadcast %cst_143 : f32 to vector<2x32xf32>
    %631 = arith.mulf %630, %629 : vector<2x32xf32>
    %cst_144 = arith.constant 1.000000e+00 : f32
    %632 = vector.broadcast %cst_144 : f32 to vector<2x32xf32>
    %633 = arith.subf %631, %632 : vector<2x32xf32>
    %634 = vector.extract_strided_slice %626 {offsets = [0, 96], sizes = [2, 32], strides = [1, 1]} : vector<2x128xf32> to vector<2x32xf32>
    %635 = arith.mulf %628, %574 : vector<2x32xf32>
    %636 = arith.mulf %627, %633 : vector<2x32xf32>
    %637 = arith.addf %635, %636 : vector<2x32xf32>
    %638 = math.tanh %637 : vector<2x32xf32>
    %639 = arith.mulf %634, %638 : vector<2x32xf32>
    %640 = tpu.concatenate %576, %597 in 1 : vector<2x32xf32>, vector<2x32xf32> -> vector<2x64xf32>
    %cst_145 = arith.constant dense<0.000000e+00> : vector<2x128xf32>
    %641 = tpu.matmul %640, %9, %cst_145 {dimension_numbers = #tpu.dot_dimension_numbers<[1], [0], [0], [1], [0, 0, 1, 1], [], []>} : vector<2x64xf32>, vector<64x128xf32>, vector<2x128xf32> -> vector<2x128xf32>
    %642 = arith.addf %641, %25 : vector<2x128xf32>
    %643 = arith.negf %642 : vector<2x128xf32>
    %644 = math.exp %643 : vector<2x128xf32>
    %cst_146 = arith.constant 1.000000e+00 : f32
    %645 = vector.broadcast %cst_146 : f32 to vector<2x128xf32>
    %646 = arith.addf %645, %644 : vector<2x128xf32>
    %647 = arith.divf %645, %646 : vector<2x128xf32>
    %648 = vector.extract_strided_slice %647 {offsets = [0, 0], sizes = [2, 32], strides = [1, 1]} : vector<2x128xf32> to vector<2x32xf32>
    %649 = vector.extract_strided_slice %647 {offsets = [0, 32], sizes = [2, 32], strides = [1, 1]} : vector<2x128xf32> to vector<2x32xf32>
    %650 = vector.extract_strided_slice %647 {offsets = [0, 64], sizes = [2, 32], strides = [1, 1]} : vector<2x128xf32> to vector<2x32xf32>
    %cst_147 = arith.constant 2.000000e+00 : f32
    %651 = vector.broadcast %cst_147 : f32 to vector<2x32xf32>
    %652 = arith.mulf %651, %650 : vector<2x32xf32>
    %cst_148 = arith.constant 1.000000e+00 : f32
    %653 = vector.broadcast %cst_148 : f32 to vector<2x32xf32>
    %654 = arith.subf %652, %653 : vector<2x32xf32>
    %655 = vector.extract_strided_slice %647 {offsets = [0, 96], sizes = [2, 32], strides = [1, 1]} : vector<2x128xf32> to vector<2x32xf32>
    %656 = arith.mulf %649, %595 : vector<2x32xf32>
    %657 = arith.mulf %648, %654 : vector<2x32xf32>
    %658 = arith.addf %656, %657 : vector<2x32xf32>
    %659 = math.tanh %658 : vector<2x32xf32>
    %660 = arith.mulf %655, %659 : vector<2x32xf32>
    %661 = tpu.concatenate %618, %639 in 1 : vector<2x32xf32>, vector<2x32xf32> -> vector<2x64xf32>
    %cst_149 = arith.constant dense<0.000000e+00> : vector<2x128xf32>
    %662 = tpu.matmul %661, %7, %cst_149 {dimension_numbers = #tpu.dot_dimension_numbers<[1], [0], [0], [1], [0, 0, 1, 1], [], []>} : vector<2x64xf32>, vector<64x128xf32>, vector<2x128xf32> -> vector<2x128xf32>
    %663 = arith.addf %662, %21 : vector<2x128xf32>
    %664 = arith.negf %663 : vector<2x128xf32>
    %665 = math.exp %664 : vector<2x128xf32>
    %cst_150 = arith.constant 1.000000e+00 : f32
    %666 = vector.broadcast %cst_150 : f32 to vector<2x128xf32>
    %667 = arith.addf %666, %665 : vector<2x128xf32>
    %668 = arith.divf %666, %667 : vector<2x128xf32>
    %669 = vector.extract_strided_slice %668 {offsets = [0, 0], sizes = [2, 32], strides = [1, 1]} : vector<2x128xf32> to vector<2x32xf32>
    %670 = vector.extract_strided_slice %668 {offsets = [0, 32], sizes = [2, 32], strides = [1, 1]} : vector<2x128xf32> to vector<2x32xf32>
    %671 = vector.extract_strided_slice %668 {offsets = [0, 64], sizes = [2, 32], strides = [1, 1]} : vector<2x128xf32> to vector<2x32xf32>
    %cst_151 = arith.constant 2.000000e+00 : f32
    %672 = vector.broadcast %cst_151 : f32 to vector<2x32xf32>
    %673 = arith.mulf %672, %671 : vector<2x32xf32>
    %cst_152 = arith.constant 1.000000e+00 : f32
    %674 = vector.broadcast %cst_152 : f32 to vector<2x32xf32>
    %675 = arith.subf %673, %674 : vector<2x32xf32>
    %676 = vector.extract_strided_slice %668 {offsets = [0, 96], sizes = [2, 32], strides = [1, 1]} : vector<2x128xf32> to vector<2x32xf32>
    %677 = arith.mulf %670, %637 : vector<2x32xf32>
    %678 = arith.mulf %669, %675 : vector<2x32xf32>
    %679 = arith.addf %677, %678 : vector<2x32xf32>
    %680 = math.tanh %679 : vector<2x32xf32>
    %681 = arith.mulf %676, %680 : vector<2x32xf32>
    %682 = tpu.concatenate %639, %660 in 1 : vector<2x32xf32>, vector<2x32xf32> -> vector<2x64xf32>
    %cst_153 = arith.constant dense<0.000000e+00> : vector<2x128xf32>
    %683 = tpu.matmul %682, %9, %cst_153 {dimension_numbers = #tpu.dot_dimension_numbers<[1], [0], [0], [1], [0, 0, 1, 1], [], []>} : vector<2x64xf32>, vector<64x128xf32>, vector<2x128xf32> -> vector<2x128xf32>
    %684 = arith.addf %683, %25 : vector<2x128xf32>
    %685 = arith.negf %684 : vector<2x128xf32>
    %686 = math.exp %685 : vector<2x128xf32>
    %cst_154 = arith.constant 1.000000e+00 : f32
    %687 = vector.broadcast %cst_154 : f32 to vector<2x128xf32>
    %688 = arith.addf %687, %686 : vector<2x128xf32>
    %689 = arith.divf %687, %688 : vector<2x128xf32>
    %690 = vector.extract_strided_slice %689 {offsets = [0, 0], sizes = [2, 32], strides = [1, 1]} : vector<2x128xf32> to vector<2x32xf32>
    %691 = vector.extract_strided_slice %689 {offsets = [0, 32], sizes = [2, 32], strides = [1, 1]} : vector<2x128xf32> to vector<2x32xf32>
    %692 = vector.extract_strided_slice %689 {offsets = [0, 64], sizes = [2, 32], strides = [1, 1]} : vector<2x128xf32> to vector<2x32xf32>
    %cst_155 = arith.constant 2.000000e+00 : f32
    %693 = vector.broadcast %cst_155 : f32 to vector<2x32xf32>
    %694 = arith.mulf %693, %692 : vector<2x32xf32>
    %cst_156 = arith.constant 1.000000e+00 : f32
    %695 = vector.broadcast %cst_156 : f32 to vector<2x32xf32>
    %696 = arith.subf %694, %695 : vector<2x32xf32>
    %697 = vector.extract_strided_slice %689 {offsets = [0, 96], sizes = [2, 32], strides = [1, 1]} : vector<2x128xf32> to vector<2x32xf32>
    %698 = arith.mulf %691, %658 : vector<2x32xf32>
    %699 = arith.mulf %690, %696 : vector<2x32xf32>
    %700 = arith.addf %698, %699 : vector<2x32xf32>
    %701 = math.tanh %700 : vector<2x32xf32>
    %702 = arith.mulf %697, %701 : vector<2x32xf32>
    %703 = tpu.concatenate %681, %702 in 1 : vector<2x32xf32>, vector<2x32xf32> -> vector<2x64xf32>
    %cst_157 = arith.constant dense<0.000000e+00> : vector<2x128xf32>
    %704 = tpu.matmul %703, %9, %cst_157 {dimension_numbers = #tpu.dot_dimension_numbers<[1], [0], [0], [1], [0, 0, 1, 1], [], []>} : vector<2x64xf32>, vector<64x128xf32>, vector<2x128xf32> -> vector<2x128xf32>
    %705 = arith.addf %704, %25 : vector<2x128xf32>
    %706 = arith.negf %705 : vector<2x128xf32>
    %707 = math.exp %706 : vector<2x128xf32>
    %cst_158 = arith.constant 1.000000e+00 : f32
    %708 = vector.broadcast %cst_158 : f32 to vector<2x128xf32>
    %709 = arith.addf %708, %707 : vector<2x128xf32>
    %710 = arith.divf %708, %709 : vector<2x128xf32>
    %711 = vector.extract_strided_slice %710 {offsets = [0, 0], sizes = [2, 32], strides = [1, 1]} : vector<2x128xf32> to vector<2x32xf32>
    %712 = vector.extract_strided_slice %710 {offsets = [0, 32], sizes = [2, 32], strides = [1, 1]} : vector<2x128xf32> to vector<2x32xf32>
    %713 = vector.extract_strided_slice %710 {offsets = [0, 64], sizes = [2, 32], strides = [1, 1]} : vector<2x128xf32> to vector<2x32xf32>
    %cst_159 = arith.constant 2.000000e+00 : f32
    %714 = vector.broadcast %cst_159 : f32 to vector<2x32xf32>
    %715 = arith.mulf %714, %713 : vector<2x32xf32>
    %cst_160 = arith.constant 1.000000e+00 : f32
    %716 = vector.broadcast %cst_160 : f32 to vector<2x32xf32>
    %717 = arith.subf %715, %716 : vector<2x32xf32>
    %718 = vector.extract_strided_slice %710 {offsets = [0, 96], sizes = [2, 32], strides = [1, 1]} : vector<2x128xf32> to vector<2x32xf32>
    %719 = arith.mulf %712, %700 : vector<2x32xf32>
    %720 = arith.mulf %711, %717 : vector<2x32xf32>
    %721 = arith.addf %719, %720 : vector<2x32xf32>
    %722 = math.tanh %721 : vector<2x32xf32>
    %723 = arith.mulf %718, %722 : vector<2x32xf32>
    %c0_161 = arith.constant 0 : index
    %c0_162 = arith.constant 0 : index
    %724 = vector.load %arg4[%c0_161, %c0_162] : memref<33x3xf32, #tpu.memory_space<vmem>>, vector<32x3xf32>
    %c32 = arith.constant 32 : index
    %c0_163 = arith.constant 0 : index
    %725 = vector.load %arg4[%c32, %c0_163] : memref<33x3xf32, #tpu.memory_space<vmem>>, vector<1x3xf32>
    %cst_164 = arith.constant dense<0.000000e+00> : vector<2x3xf32>
    %726 = tpu.matmul %723, %724, %cst_164 {dimension_numbers = #tpu.dot_dimension_numbers<[1], [0], [0], [1], [0, 0, 1, 1], [], []>} : vector<2x32xf32>, vector<32x3xf32>, vector<2x3xf32> -> vector<2x3xf32>
    %727 = vector.broadcast %725 : vector<1x3xf32> to vector<2x3xf32>
    %728 = arith.addf %726, %727 : vector<2x3xf32>
    %c0_165 = arith.constant 0 : index
    %c0_166 = arith.constant 0 : index
    %729 = vector.load %arg5[%c0_165, %c0_166] : memref<2x3xf32, #tpu.memory_space<vmem>>, vector<2x3xf32>
    tpu.vector_store %arg5[%c0_165, %c0_166], %728 {strides = array<i32>} : memref<2x3xf32, #tpu.memory_space<vmem>>, vector<2x3xf32>,
    return
  }
}

</mosaic_0001>

<bundles_post_ra>
// kernel: actuator_lstm_forward.1
= control target key start
LH: loop header
LB: loop body
LE: loop exit
PB: predicated region body
PF: predicated region fallthrough
CT: control target
= control target key end

     0   :  { %10 = vsyncpa [#allocation3], 0  ;;  %s6622_s0 = inlined_call_operand.vmem [shape: f32[2,8,4], index: 0, kind: input, shape index: {}]   ;;  %s6623_s1 = inlined_call_operand.vmem [shape: f32[4,128], index: 1, kind: input, shape index: {}]   ;;  %s6624_s2 = inlined_call_operand.hbm [shape: f32[4,64,128], index: 2, kind: input, shape index: {}]   ;;  %s6625_s3 = inlined_call_operand.vmem [shape: f32[4,1,128], index: 3, kind: input, shape index: {}]   ;;  %s6626_s4 = inlined_call_operand.vmem [shape: f32[33,3], index: 4, kind: input, shape index: {}]   ;;  %s6627_s5 = inlined_call_operand.hbm [shape: f32[2,3], index: 5, kind: output, shape index: {}]  }
   0x1   :  { %11 = vsyncpa [#allocation4], 0  ;;  %s5746_s18 = smov [#allocation2]   ;;  %s5698_s22 = scalar_lea.hbm %s6624_s2, 4096 }
   0x2   :  { %s21_s19 = sshll.u32 %s5746_s18, 4  ;;  %p5699_p0 = scmp.ne.s32.totalorder %s6624_s2, %s5698_s22  ;;  %s22_s19 = int_to_ptr.vmem [resolvable:$true] %s21_s19 }
   0x3   :  { %p5702_p1 = scmp.lt.u32.totalorder %s5698_s22, %s6624_s2 }
   0x5   :  { %p5704_p2 = pnand %p5702_p1, %p5699_p0 }
   0x7   :  { %5707 = shalt.err (!%p5704_p2)
}
   0x8   :  { %s5708_s27 = scalar_lea.vmem %s22_s19, 4096  ;;  %p5713_p4 = scmp.lt.s32.totalorder %s22_s19, %s22_s19 }
   0x9   :  { %p5709_p3 = scmp.ne.s32.totalorder %s22_s19, %s5708_s27  ;;  %p5714_p5 = scmp.lt.s32.totalorder %s5708_s27, %s5708_s27 }
   0xb   :  { %p5715_p6 = por %p5714_p5, %p5713_p4 }
   0xd   :  { %p5716_p7 = pnand %p5715_p6, %p5709_p3 }
   0xf   :  { %5719 = shalt.err (!%p5716_p7)
}
  0x10   :  { %s5747_s28 = smov 128   ;;  %s5748_s29 = smov 8  }
  0x11   :  { %27 = dma.hbm_to_vmem [thread:$0]  %s6624_s2, 4096, %s22_s19, [#allocation3], %s5747_s28, %s5747_s28, %s5748_s29  }
  0x12   :  { %5742 = dma.done.wait [#allocation3], 4096  }
  0x13   :  { %5743 = vsyncadd [#allocation3], 4294963200  ;;  %v5749_v0 = vmov 0.0   ;;  %vm5750_vm0 = vmmov 0   ;;  %vm108_vm1 = vcmask 1043456   ;;  %v5811_v2 = vld [vmem:[%s6622_s0] sm:$0xff] }
  0x14   :  { %4543 = vmatprep.subr.mxu0 %v5749_v0  ;;  %4545 = vmatprep.mubr.msk.f32.mxu0 %vm5750_vm0, %v5749_v0  ;;  %v5806_v1 = vld [vmem:[%s6623_s1] sm:$0xf]  ;;  %v5816_v3 = vld [vmem:[%s6622_s0 + $0x8] sm:$0xff]  ;;  %vm103_vm2 = vcmask 1041409   ;;  %vm105_vm3 = vcmask 31744   ;;  %v256_v4 = vrot.slane %v5811_v2, 2 }
  0x15   :  { %4533 = vmatprep.subr.mxu1 %v5749_v0  ;;  %4535 = vmatprep.mubr.msk.f32.mxu1 %vm5750_vm0, %v5749_v0  ;;  %v257_v5 = vrot.slane %v5816_v3, 1  ;;  %v406_v6 = vrot.slane %v5811_v2, 4  ;;  %v407_v7 = vrot.slane %v5816_v3, 3  ;;  %v102_v8 = vrot.slane %v5816_v3, 7  ;;  %v36_v14 = vld [vmem:[#allocation2] sm:$0xff]  ;;  %v37_v15 = vld [vmem:[#allocation2 + $0x8] sm:$0xff] }
  0x16   :  { %4544 = vmatpush3.msk.msra.mxu0 %vm108_vm1, %v5806_v1  ;;  %4534 = vmatpush3.msk.msra.mxu1 %vm108_vm1, %v5806_v1  ;;  %v556_v12 = vrot.slane %v5811_v2, 6  ;;  %v557_v13 = vrot.slane %v5816_v3, 5  ;;  %v5853_v17 = vpack.c.bf16 %v37_v15, %v36_v14  ;;  %v5751_v18 = vmov 0.0|0.0   ;;  %v38_v19 = vld [vmem:[#allocation2 + $0x10] sm:$0xff]  ;;  %v39_v20 = vld [vmem:[#allocation2 + $0x18] sm:$0xff]  ;;  %s5752_s12 = smov 64  }
  0x17   :  { %4553 = vmatprep.subr.mxu0 %v5749_v0  ;;  %4538 = vmatprep.subr.mxu1 %v5749_v0  ;;  %v258_v9 = vsel %vm103_vm2, %v257_v5, %v256_v4  ;;  %v104_v10 = vsel %vm103_vm2, %v102_v8, %v5811_v2  ;;  %v408_v11 = vsel %vm103_vm2, %v407_v7, %v406_v6  ;;  %v5871_v24 = vld [vmem:[%s6625_s3] ss:$0 sm:$0xff]  ;;  %s5753_s13 = smov 32   ;;  %v182_v40 = vrot.slane %v5811_v2, 1  ;;  %v41_v43 = vld [vmem:[#allocation2 + $0x40] sm:$0xff]  ;;  %v42_v44 = vld [vmem:[#allocation2 + $0x48] sm:$0xff] }
  0x18   :  { %4546 = vmatmul.mubr.msk.f32.vlgmr.msra.gmra.mrb[0].mxu0 %vm105_vm3, %v258_v9  ;;  %4536 = vmatmul.mubr.msk.f32.vlgmr.msra.gmra.mrb[0].mxu1 %vm105_vm3, %v104_v10  ;;  %v558_v16 = vsel %vm103_vm2, %v557_v13, %v556_v12  ;;  %v5858_v21 = vpack.c.bf16 %v39_v20, %v38_v19  ;;  %v331_v41 = vrot.slane %v5811_v2, 3  ;;  %v332_v42 = vrot.slane %v5816_v3, 2  ;;  %v43_v45 = vld [vmem:[#allocation2 + $0x50] sm:$0xff]  ;;  %v44_v47 = vld [vmem:[#allocation2 + $0x58] sm:$0xff]  ;;  %v45_v53 = vld [vmem:[#allocation2 + $0x60] sm:$0xff]  ;;  %s5754_s11 = smov [#allocation5]  }
  0x19   :  { %4554 = vmatpush3.msk.msra.mxu0 %vm108_vm1, %v5806_v1  ;;  %4555 = vmatprep.mubr.msk.f32.mxu0 %vm5750_vm0, %v5749_v0  ;;  %v5887_v46 = vpack.c.bf16 %v42_v44, %v41_v43  ;;  %v183_v48 = vsel %vm103_vm2, %v5816_v3, %v182_v40  ;;  %v5893_v49 = vpack.c.bf16 %v44_v47, %v43_v45  ;;  %v481_v51 = vrot.slane %v5811_v2, 5  ;;  %v46_v54 = vld [vmem:[#allocation2 + $0x68] sm:$0xff]  ;;  %v47_v60 = vld [vmem:[#allocation2 + $0x70] sm:$0xff]  ;;  %v48_v61 = vld [vmem:[#allocation2 + $0x78] sm:$0xff]  ;;  %s4127_s0 = sshll.u32 %s5754_s11, 4  ;;  %s4128_s0 = int_to_ptr.vmem [resolvable:$true] %s4127_s0 }
  0x1a   :  { %4563 = vmatprep.subr.mxu0 %v5749_v0  ;;  %4539 = vmatpush3.msk.msra.mxu1 %vm108_vm1, %v5806_v1  ;;  %v333_v50 = vsel %vm103_vm2, %v332_v42, %v331_v41  ;;  %v482_v52 = vrot.slane %v5816_v3, 4  ;;  %v631_v56 = vrot.slane %v5811_v2, 7  ;;  %v632_v57 = vrot.slane %v5816_v3, 6  ;;  %v5962_v5 = vld [vmem:[%s6625_s3 + $0x1] ss:$0 sm:$0xff]  ;;  %v50_v44 = vld [vmem:[#allocation2 + $0x80] sm:$0xff]  ;;  %p5725_p9 = scmp.lt.s32.totalorder %s4128_s0, %s4128_s0 }
  0x1b   :  { %4540 = vmatprep.mubr.msk.f32.mxu1 %vm5750_vm0, %v5749_v0  ;;  %4548 = vmatprep.subr.mxu1 %v5749_v0  ;;  %v5915_v58 = vpack.c.bf16 %v46_v54, %v45_v53  ;;  %v5926_v63 = vpack.c.bf16 %v48_v61, %v47_v60  ;;  %vm706_vm4 = vcmask 261120   ;;  %vm909_vm5 = vcmask 523264   ;;  %v51_v45 = vld [vmem:[#allocation2 + $0x88] sm:$0xff]  ;;  %v57_v60 = vld [vmem:[#allocation2 + $0xb8] sm:$0xff]  ;;  %s5720_s1 = scalar_lea.vmem %s4128_s0, 32 }
  0x1c   :  { %4556 = vmatmul.mubr.msk.f32.vlgmr.msra.gmra.mrb[2].mxu0 %vm105_vm3, %v408_v11  ;;  %4541 = vmatmul.mubr.msk.f32.vlgmr.msra.gmra.mrb[2].mxu1 %vm105_vm3, %v183_v48  ;;  %v483_v55 = vsel %vm103_vm2, %v482_v52, %v481_v51  ;;  %v633_v62 = vsel %vm103_vm2, %v632_v57, %v631_v56  ;;  %v5982_v48 = vpack.c.bf16 %v51_v45, %v50_v44  ;;  %v52_v51 = vld [vmem:[#allocation2 + $0x90] sm:$0xff]  ;;  %v53_v52 = vld [vmem:[#allocation2 + $0x98] sm:$0xff]  ;;  %v55_v56 = vld [vmem:[#allocation2 + $0xa8] sm:$0xff]  ;;  %vm4119_vm6 = vcmask 17408   ;;  %p5721_p8 = scmp.ne.s32.totalorder %s4128_s0, %s5720_s1  ;;  %p5726_p10 = scmp.lt.s32.totalorder %s5720_s1, %s5720_s1 }
  0x1d   :  { %4564 = vmatpush3.msk.msra.mxu0 %vm108_vm1, %v5806_v1  ;;  %4565 = vmatprep.mubr.msk.f32.mxu0 %vm5750_vm0, %v5749_v0  ;;  %v5992_v54 = vpack.c.bf16 %v53_v52, %v52_v51 }
  0x1e   :  { %5128 = vmatprep.subr.bf16.mxu0 %v5751_v18  ;;  %4549 = vmatpush3.msk.msra.mxu1 %vm108_vm1, %v5806_v1  ;;  %p5727_p11 = por %p5726_p10, %p5725_p9 }
  0x1f   :  { %4550 = vmatprep.mubr.msk.f32.mxu1 %vm5750_vm0, %v5749_v0  ;;  %4558 = vmatprep.subr.mxu1 %v5749_v0 }
  0x20   :  { %4566 = vmatmul.mubr.msk.f32.vlgmr.msra.gmra.mrb[4].mxu0 %vm105_vm3, %v558_v16  ;;  %4551 = vmatmul.mubr.msk.f32.vlgmr.msra.gmra.mrb[4].mxu1 %vm105_vm3, %v333_v50  ;;  %p5728_p12 = pnand %p5727_p11, %p5721_p8 }
  0x21   :  { %5130 = vmatpush3.bf16.msra.mxu0 %v5853_v17  ;;  %4581 = vmatprep.mubr.msk.f32.mxu0 %vm5750_vm0, %v5749_v0 }
  0x22   :  { %5131 = vmatprep.subr.bf16.mxu0 %v5751_v18  ;;  %4559 = vmatpush3.msk.msra.mxu1 %vm108_vm1, %v5806_v1 }
  0x23   :  { %4560 = vmatprep.mubr.msk.f32.mxu1 %vm5750_vm0, %v5749_v0  ;;  %4568 = vmatprep.subr.mxu1 %v5749_v0 }
  0x24   :  { %4561 = vmatmul.mubr.msk.f32.vlgmr.msra.gmra.mrb[6].mxu1 %vm105_vm3, %v483_v55  ;;  %v54_v55 = vld [vmem:[#allocation2 + $0xa0] sm:$0xff] }
  0x25   :  { %5133 = vmatpush3.bf16.msra.mxu0 %v5858_v21  ;;  %4569 = vmatpush3.msk.msra.mxu1 %vm108_vm1, %v5806_v1  ;;  %v6000_v57 = vpack.c.bf16 %v55_v56, %v54_v55 }
  0x26   :  { %5140 = vmatprep.subr.bf16.mxu0 %v5751_v18  ;;  %4570 = vmatprep.mubr.msk.f32.mxu1 %vm5750_vm0, %v5749_v0 }
  0x27   :  { %5134 = vmatprep.subr.bf16.mxu1 %v5751_v18 }
  0x28   :  { %4582 = vmatmul.mubr.f32.vlgmr.msra.gmra.mrb[6].mxu0 %v5749_v0  ;;  %4571 = vmatmul.mubr.msk.f32.vlgmr.msra.gmra.mrb[8].mxu1 %vm105_vm3, %v633_v62 }
  0x29   :  { %4611 = vmatprep.mubr.msk.f32.mxu0 %vm5750_vm0, %v5749_v0  ;;  %5142 = vmatpush3.bf16.msra.mxu0 %v5887_v46 }
  0x2a   :  { %5143 = vmatprep.subr.bf16.mxu0 %v5751_v18  ;;  %5136 = vmatpush3.bf16.msra.mxu1 %v5853_v17 }
  0x2b   :  { %4592 = vmatprep.mubr.msk.f32.mxu1 %vm5750_vm0, %v5749_v0  ;;  %5137 = vmatprep.subr.bf16.mxu1 %v5751_v18 }
  0x2d   :  { %5145 = vmatpush3.bf16.msra.mxu0 %v5893_v49 }
  0x2e   :  { %5146 = vmatprep.subr.bf16.mxu0 %v5751_v18  ;;  %5139 = vmatpush3.bf16.msra.mxu1 %v5858_v21 }
  0x2f   :  { %5158 = vmatprep.subr.bf16.mxu1 %v5751_v18 }
  0x31   :  { %5148 = vmatpush3.bf16.msra.mxu0 %v5915_v58 }
  0x32   :  { %5149 = vmatprep.subr.bf16.mxu0 %v5751_v18 }
  0x35   :  { %5151 = vmatpush3.bf16.msra.mxu0 %v5926_v63 }
  0x36   :  { %5152 = vmatprep.subr.bf16.mxu0 %v5751_v18 }
  0xeb   :  { %v178_v22 = vpop.f32.mrb[0].mxu1 }
  0xec   :  { %v4537_v23 = vpop.f32.mrb[1].mxu1  ;;  %v179_v25 = vadd.f32 %v5871_v24, %v178_v22 }
  0xfb   :  { %v776_v26 = vpop.f32.mrb[6].mxu0 }
  0xfc   :  { %v780_v27 = vadd.f32 %v776_v26, %v179_v25  ;;  %v4583_v28 = vpop.f32.mrb[7].mxu0 }
  0xfe   :  { %v4159_v29 = vmul.f32 -1.442695, %v780_v27 }
 0x100   :  { %5502 = vpow2.f32 %v4159_v29 }
 0x10a   :  { %v5503_v30 = vpop.eup %5502 }
 0x10b   :  { %v784_v31 = vadd.f32 1.0, %v5503_v30 }
 0x10d   :  { %5504 = vrcp.f32 %v784_v31 }
 0x117   :  { %v5874_v32 = vpop.eup %5504 }
 0x118   :  { %v787_v33 = vmul.f32 2.0, %v5874_v32  ;;  %v789_v37 = vmul.f32 0.0, %v5874_v32 }
 0x11a   :  { %v4160_v34 = vadd.f32 -1.0, %v787_v33 }
 0x11c   :  { %791 = vrot.lane.b32.xlu0 %v4160_v34, %s5752_s12 }
 0x18e   :  { %v792_v35 = vpop.permute.xlu0 %791 }
 0x18f   :  { %v794_v36 = vmul.f32 %v5874_v32, %v792_v35 }
 0x191   :  { %796 = vrot.lane.b32.xlu0 %v794_v36, %s5753_s13 }
 0x203   :  { %v797_v38 = vpop.permute.xlu0 %796 }
 0x204   :  { %v5881_v39 = vadd.f32 %v797_v38, %v789_v37 }
 0x206   :  { %5506 = vtanh.f32 %v5881_v39 }
 0x210   :  { %v5507_v59 = vpop.eup %5506 }
 0x211   :  { %802 = vrot.lane.b32.xlu1 %v5507_v59, %s5752_s12  ;;  %v56_v59 = vld [vmem:[#allocation2 + $0xb0] sm:$0xff] }
 0x212   :  { %v6006_v61 = vpack.c.bf16 %v57_v60, %v56_v59 }
 0x283   :  { %v803_v1 = vpop.permute.xlu1 %802 }
 0x284   :  { %v805_v2 = vmul.f32 %v5874_v32, %v803_v1 }
 0x286   :  { %807 = vrot.lane.b32.xlu1 %v805_v2, %s5753_s13 }
 0x2f8   :  { %v808_v3 = vpop.permute.xlu1 %807 }
 0x2f9   :  { %v908_v4 = vsel %vm706_vm4, %v808_v3, 0.0  ;;  %4593 = vmatmul.mubr.msk.f32.vlgmr.msra.gmra.mrb[2].mxu1 %vm706_vm4, %v808_v3 }
 0x2fa   :  { %4612 = vmatmul.mubr.msk.f32.vlgmr.msra.gmra.mrb[8].mxu0 %vm909_vm5, %v908_v4  ;;  %5160 = vmatpush3.bf16.msra.mxu1 %v5887_v46 }
 0x2fb   :  { %5161 = vmatprep.subr.bf16.mxu1 %v5751_v18  ;;  %5154 = vmatpush3.bf16.msra.mxu0 %v5853_v17 }
 0x2fc   :  { %5155 = vmatprep.subr.bf16.mxu0 %v5751_v18  ;;  %4622 = vmatprep.mubr.msk.f32.mxu0 %vm5750_vm0, %v5749_v0 }
 0x2fd   :  { %4641 = vmatprep.mubr.msk.f32.mxu1 %vm5750_vm0, %v5749_v0 }
 0x2fe   :  { %5163 = vmatpush3.bf16.msra.mxu1 %v5893_v49 }
 0x2ff   :  { %5164 = vmatprep.subr.bf16.mxu1 %v5751_v18  ;;  %5157 = vmatpush3.bf16.msra.mxu0 %v5858_v21 }
 0x300   :  { %5188 = vmatprep.subr.bf16.mxu0 %v5751_v18 }
 0x302   :  { %5166 = vmatpush3.bf16.msra.mxu1 %v5915_v58 }
 0x303   :  { %5167 = vmatprep.subr.bf16.mxu1 %v5751_v18 }
 0x306   :  { %5169 = vmatpush3.bf16.msra.mxu1 %v5926_v63 }
 0x307   :  { %5170 = vmatprep.subr.bf16.mxu1 %v5751_v18 }
 0x3cc   :  { %v877_v6 = vpop.f32.mrb[2].mxu1 }
 0x3cd   :  { %v5472_v7 = vadd.f32 %v5871_v24, %v877_v6  ;;  %v4594_v8 = vpop.f32.mrb[3].mxu1  ;;  %v979_v9 = vpop.f32.mrb[8].mxu0 }
 0x3ce   :  { %v980_v10 = vadd.f32 %v5962_v5, %v979_v9  ;;  %v4613_v11 = vpop.f32.mrb[9].mxu0 }
 0x3cf   :  { %v4162_v12 = vmul.f32 -1.442695, %v5472_v7 }
 0x3d0   :  { %v4165_v13 = vmul.f32 -1.442695, %v980_v10 }
 0x3d1   :  { %5508 = vpow2.f32 %v4162_v12 }
 0x3d2   :  { %5510 = vpow2.f32 %v4165_v13  ;;  %v6026_v13 = vld [vmem:[%s6625_s3 + $0x2] ss:$0 sm:$0xff] }
 0x3db   :  { %v5509_v14 = vpop.eup %5508 }
 0x3dc   :  { %v5511_v15 = vpop.eup %5510  ;;  %v885_v16 = vadd.f32 1.0, %v5509_v14 }
 0x3dd   :  { %v986_v19 = vadd.f32 1.0, %v5511_v15 }
 0x3de   :  { %5512 = vrcp.f32 %v885_v16 }
 0x3df   :  { %5514 = vrcp.f32 %v986_v19 }
 0x3e8   :  { %v5513_v20 = vpop.eup %5512 }
 0x3e9   :  { %v5515_v22 = vpop.eup %5514  ;;  %v888_v23 = vmul.f32 2.0, %v5513_v20  ;;  %v890_v32 = vmul.f32 %v5513_v20, %v5881_v39 }
 0x3ea   :  { %v989_v25 = vmul.f32 2.0, %v5515_v22  ;;  %v991_v34 = vmul.f32 0.0, %v5515_v22 }
 0x3eb   :  { %v4163_v26 = vadd.f32 -1.0, %v888_v23 }
 0x3ec   :  { %v4166_v27 = vadd.f32 -1.0, %v989_v25 }
 0x3ed   :  { %892 = vrot.lane.b32.xlu0 %v4163_v26, %s5752_s12 }
 0x3ee   :  { %993 = vrot.lane.b32.xlu1 %v4166_v27, %s5752_s12 }
 0x45f   :  { %v893_v28 = vpop.permute.xlu0 %892 }
 0x460   :  { %v895_v29 = vmul.f32 %v5513_v20, %v893_v28  ;;  %v994_v30 = vpop.permute.xlu1 %993 }
 0x461   :  { %v996_v31 = vmul.f32 %v5515_v22, %v994_v30 }
 0x462   :  { %897 = vrot.lane.b32.xlu0 %v895_v29, %s5753_s13 }
 0x463   :  { %998 = vrot.lane.b32.xlu1 %v996_v31, %s5753_s13 }
 0x4d4   :  { %v898_v33 = vpop.permute.xlu0 %897 }
 0x4d5   :  { %v5971_v35 = vadd.f32 %v898_v33, %v890_v32  ;;  %v999_v36 = vpop.permute.xlu1 %998 }
 0x4d6   :  { %v5973_v37 = vadd.f32 %v999_v36, %v991_v34 }
 0x4d7   :  { %5516 = vtanh.f32 %v5971_v35 }
 0x4d8   :  { %5518 = vtanh.f32 %v5973_v37 }
 0x4e1   :  { %v5517_v38 = vpop.eup %5516 }
 0x4e2   :  { %v5519_v40 = vpop.eup %5518  ;;  %903 = vrot.lane.b32.xlu0 %v5517_v38, %s5752_s12 }
 0x4e3   :  { %1004 = vrot.lane.b32.xlu1 %v5519_v40, %s5752_s12 }
 0x554   :  { %v904_v41 = vpop.permute.xlu0 %903 }
 0x555   :  { %v906_v42 = vmul.f32 %v5513_v20, %v904_v41  ;;  %v1005_v39 = vpop.permute.xlu1 %1004 }
 0x556   :  { %v1007_v43 = vmul.f32 %v5515_v22, %v1005_v39 }
 0x557   :  { %1009 = vrot.lane.b32.xlu0 %v906_v42, %s5753_s13 }
 0x558   :  { %1111 = vrot.lane.b32.xlu1 %v1007_v43, %s5752_s12 }
 0x55b   :  { %1213 = vrot.lane.b32.xlu0 %v1007_v43, %s5753_s13 }
 0x5c9   :  { %v1010_v47 = vpop.permute.xlu0 %1009 }
 0x5ca   :  { %v1112_v50 = vpop.permute.xlu1 %1111  ;;  %4623 = vmatmul.mubr.msk.f32.vlgmr.msra.gmra.mrb[0].mxu0 %vm706_vm4, %v1010_v47 }
 0x5cb   :  { %v1114_v53 = vsel %vm706_vm4, %v1010_v47, %v1112_v50  ;;  %5190 = vmatpush3.bf16.msra.mxu0 %v5887_v46  ;;  %4690 = vmatprep.mubr.msk.f32.mxu0 %vm5750_vm0, %v5749_v0 }
 0x5cc   :  { %4642 = vmatmul.mubr.msk.f32.vlgmr.msra.gmra.mrb[10].mxu1 %vm909_vm5, %v1114_v53  ;;  %5191 = vmatprep.subr.bf16.mxu0 %v5751_v18 }
 0x5cd   :  { %5172 = vmatpush3.bf16.msra.mxu1 %v5982_v48  ;;  %4660 = vmatprep.mubr.msk.f32.mxu1 %vm5750_vm0, %v5749_v0  ;;  %v1214_v62 = vpop.permute.xlu0 %1213 }
 0x5ce   :  { %5173 = vmatprep.subr.bf16.mxu1 %v5751_v18  ;;  %v1216_v1 = vsel %vm706_vm4, %v1214_v62, 0.0 }
 0x5cf   :  { %5193 = vmatpush3.bf16.msra.mxu0 %v5893_v49 }
 0x5d0   :  { %5194 = vmatprep.subr.bf16.mxu0 %v5751_v18 }
 0x5d1   :  { %5175 = vmatpush3.bf16.msra.mxu1 %v5992_v54 }
 0x5d2   :  { %5176 = vmatprep.subr.bf16.mxu1 %v5751_v18 }
 0x5d3   :  { %5196 = vmatpush3.bf16.msra.mxu0 %v5915_v58 }
 0x5d4   :  { %5197 = vmatprep.subr.bf16.mxu0 %v5751_v18 }
 0x5d5   :  { %5178 = vmatpush3.bf16.msra.mxu1 %v6000_v57 }
 0x5d6   :  { %5179 = vmatprep.subr.bf16.mxu1 %v5751_v18 }
 0x5d7   :  { %5199 = vmatpush3.bf16.msra.mxu0 %v5926_v63 }
 0x5d8   :  { %5200 = vmatprep.subr.bf16.mxu0 %v5751_v18 }
 0x5d9   :  { %5181 = vmatpush3.bf16.msra.mxu1 %v6006_v61 }
 0x5da   :  { %5182 = vmatprep.subr.bf16.mxu1 %v5751_v18 }
 0x5dc   :  { %4661 = vmatmul.mubr.msk.f32.vlgmr.msra.gmra.mrb[12].mxu1 %vm909_vm5, %v1216_v1 }
 0x5dd   :  { %5184 = vmatpush3.bf16.msra.mxu1 %v5853_v17  ;;  %4671 = vmatprep.mubr.msk.f32.mxu1 %vm5750_vm0, %v5749_v0 }
 0x5de   :  { %5185 = vmatprep.subr.bf16.mxu1 %v5751_v18 }
 0x5e1   :  { %5187 = vmatpush3.bf16.msra.mxu1 %v5858_v21 }
 0x5e2   :  { %5212 = vmatprep.subr.bf16.mxu1 %v5751_v18 }
 0x69d   :  { %v1079_v2 = vpop.f32.mrb[0].mxu0 }
 0x69e   :  { %v5473_v3 = vadd.f32 %v5871_v24, %v1079_v2  ;;  %v4624_v4 = vpop.f32.mrb[1].mxu0 }
 0x69f   :  { %v1184_v6 = vpop.f32.mrb[10].mxu1  ;;  %v59_v4 = vld [vmem:[#allocation2 + $0xc0] sm:$0xff] }
 0x6a0   :  { %v4168_v7 = vmul.f32 -1.442695, %v5473_v3  ;;  %v1185_v8 = vadd.f32 %v5962_v5, %v1184_v6  ;;  %v4643_v9 = vpop.f32.mrb[11].mxu1  ;;  %v60_v6 = vld [vmem:[#allocation2 + $0xc8] sm:$0xff] }
 0x6a1   :  { %v62_v9 = vld [vmem:[#allocation2 + $0xd8] sm:$0xff] }
 0x6a2   :  { %5520 = vpow2.f32 %v4168_v7  ;;  %v4171_v10 = vmul.f32 -1.442695, %v1185_v8  ;;  %v6054_v7 = vpack.c.bf16 %v60_v6, %v59_v4  ;;  %v61_v8 = vld [vmem:[#allocation2 + $0xd0] sm:$0xff] }
 0x6a4   :  { %5522 = vpow2.f32 %v4171_v10 }
 0x6ac   :  { %v5521_v11 = vpop.eup %5520 }
 0x6ad   :  { %v1087_v12 = vadd.f32 1.0, %v5521_v11 }
 0x6ae   :  { %v5523_v14 = vpop.eup %5522 }
 0x6af   :  { %5524 = vrcp.f32 %v1087_v12  ;;  %v1191_v15 = vadd.f32 1.0, %v5523_v14  ;;  %v1286_v16 = vpop.f32.mrb[12].mxu1  ;;  %v6058_v12 = vpack.c.bf16 %v62_v9, %v61_v8 }
 0x6b0   :  { %v1287_v19 = vadd.f32 %v6026_v13, %v1286_v16  ;;  %v4662_v20 = vpop.f32.mrb[13].mxu1  ;;  %v64_v16 = vld [vmem:[#allocation2 + $0xe8] sm:$0xff] }
 0x6b1   :  { %5526 = vrcp.f32 %v1191_v15  ;;  %v63_v15 = vld [vmem:[#allocation2 + $0xe0] sm:$0xff]  ;;  %v65_v20 = vld [vmem:[#allocation2 + $0xf0] sm:$0xff] }
 0x6b2   :  { %v4174_v22 = vmul.f32 -1.442695, %v1287_v19  ;;  %v6070_v19 = vpack.c.bf16 %v64_v16, %v63_v15 }
 0x6b4   :  { %5528 = vpow2.f32 %v4174_v22  ;;  %v66_v22 = vld [vmem:[#allocation2 + $0xf8] sm:$0xff] }
 0x6b9   :  { %v5525_v23 = vpop.eup %5524 }
 0x6ba   :  { %v1090_v25 = vmul.f32 2.0, %v5525_v23  ;;  %v1092_v43 = vmul.f32 %v5525_v23, %v5971_v35 }
 0x6bb   :  { %v5527_v26 = vpop.eup %5526 }
 0x6bc   :  { %v4169_v27 = vadd.f32 -1.0, %v1090_v25  ;;  %v1194_v28 = vmul.f32 2.0, %v5527_v26  ;;  %v1196_v47 = vmul.f32 %v5527_v26, %v5973_v37 }
 0x6be   :  { %v5529_v29 = vpop.eup %5528  ;;  %1094 = vrot.lane.b32.xlu1 %v4169_v27, %s5752_s12  ;;  %v4172_v30 = vadd.f32 -1.0, %v1194_v28 }
 0x6bf   :  { %v1293_v31 = vadd.f32 1.0, %v5529_v29 }
 0x6c0   :  { %1198 = vrot.lane.b32.xlu0 %v4172_v30, %s5752_s12 }
 0x6c1   :  { %5530 = vrcp.f32 %v1293_v31 }
 0x6cb   :  { %v5531_v32 = vpop.eup %5530 }
 0x6cc   :  { %v1296_v33 = vmul.f32 2.0, %v5531_v32  ;;  %v1298_v55 = vmul.f32 0.0, %v5531_v32 }
 0x6ce   :  { %v4175_v34 = vadd.f32 -1.0, %v1296_v33 }
 0x6d0   :  { %1300 = vrot.lane.b32.xlu1 %v4175_v34, %s5752_s12 }
 0x730   :  { %v1095_v36 = vpop.permute.xlu1 %1094 }
 0x731   :  { %v1097_v38 = vmul.f32 %v5525_v23, %v1095_v36 }
 0x732   :  { %v1199_v40 = vpop.permute.xlu0 %1198 }
 0x733   :  { %v1201_v41 = vmul.f32 %v5527_v26, %v1199_v40  ;;  %1099 = vrot.lane.b32.xlu0 %v1097_v38, %s5753_s13 }
 0x735   :  { %1203 = vrot.lane.b32.xlu1 %v1201_v41, %s5753_s13 }
 0x742   :  { %v1301_v42 = vpop.permute.xlu1 %1300 }
 0x743   :  { %v1303_v39 = vmul.f32 %v5531_v32, %v1301_v42 }
 0x745   :  { %1305 = vrot.lane.b32.xlu0 %v1303_v39, %s5753_s13  ;;  %v6110_v39 = vld [vmem:[%s6625_s3 + $0x3] ss:$0 sm:$0xff] }
 0x7a5   :  { %v1100_v44 = vpop.permute.xlu0 %1099 }
 0x7a6   :  { %v6036_v45 = vadd.f32 %v1100_v44, %v1092_v43 }
 0x7a7   :  { %v1204_v50 = vpop.permute.xlu1 %1203 }
 0x7a8   :  { %5532 = vtanh.f32 %v6036_v45  ;;  %v6040_v51 = vadd.f32 %v1204_v50, %v1196_v47 }
 0x7aa   :  { %5534 = vtanh.f32 %v6040_v51 }
 0x7b2   :  { %v5533_v52 = vpop.eup %5532 }
 0x7b3   :  { %1105 = vrot.lane.b32.xlu1 %v5533_v52, %s5752_s12 }
 0x7b4   :  { %v5535_v53 = vpop.eup %5534 }
 0x7b5   :  { %1209 = vrot.lane.b32.xlu0 %v5535_v53, %s5752_s12 }
 0x7b7   :  { %v1306_v35 = vpop.permute.xlu0 %1305 }
 0x7b8   :  { %v6045_v56 = vadd.f32 %v1306_v35, %v1298_v55 }
 0x7ba   :  { %5536 = vtanh.f32 %v6045_v56 }
 0x7c4   :  { %v5537_v37 = vpop.eup %5536 }
 0x7c5   :  { %1311 = vrot.lane.b32.xlu1 %v5537_v37, %s5752_s12 }
 0x825   :  { %v1106_v59 = vpop.permute.xlu1 %1105 }
 0x826   :  { %v1108_v60 = vmul.f32 %v5525_v23, %v1106_v59  ;;  %v6076_v23 = vpack.c.bf16 %v66_v22, %v65_v20 }
 0x827   :  { %v1210_v62 = vpop.permute.xlu0 %1209 }
 0x828   :  { %v1212_v1 = vmul.f32 %v5527_v26, %v1210_v62  ;;  %1316 = vrot.lane.b32.xlu0 %v1108_v60, %s5753_s13 }
 0x82a   :  { %1418 = vrot.lane.b32.xlu1 %v1212_v1, %s5752_s12 }
 0x82c   :  { %1520 = vrot.lane.b32.xlu0 %v1212_v1, %s5753_s13 }
 0x837   :  { %v1312_v2 = vpop.permute.xlu1 %1311 }
 0x838   :  { %v1314_v3 = vmul.f32 %v5531_v32, %v1312_v2 }
 0x83a   :  { %1626 = vrot.lane.b32.xlu0 %v1314_v3, %s5753_s13  ;;  %1524 = vrot.lane.b32.xlu1 %v1314_v3, %s5752_s12 }
 0x89a   :  { %v1317_v10 = vpop.permute.xlu0 %1316 }
 0x89b   :  { %4672 = vmatmul.mubr.msk.f32.vlgmr.msra.gmra.mrb[4].mxu1 %vm706_vm4, %v1317_v10 }
 0x89c   :  { %v1419_v11 = vpop.permute.xlu1 %1418  ;;  %5214 = vmatpush3.bf16.msra.mxu1 %v6054_v7  ;;  %4728 = vmatprep.mubr.msk.f32.mxu1 %vm5750_vm0, %v5749_v0 }
 0x89d   :  { %v1421_v14 = vsel %vm706_vm4, %v1317_v10, %v1419_v11  ;;  %5215 = vmatprep.subr.bf16.mxu1 %v5751_v18 }
 0x89e   :  { %4691 = vmatmul.mubr.msk.f32.vlgmr.msra.gmra.mrb[10].mxu0 %vm909_vm5, %v1421_v14  ;;  %v1521_v25 = vpop.permute.xlu0 %1520 }
 0x89f   :  { %5202 = vmatpush3.bf16.msra.mxu0 %v5982_v48  ;;  %4709 = vmatprep.mubr.msk.f32.mxu0 %vm5750_vm0, %v5749_v0 }
 0x8a0   :  { %5203 = vmatprep.subr.bf16.mxu0 %v5751_v18  ;;  %5217 = vmatpush3.bf16.msra.mxu1 %v6058_v12 }
 0x8a1   :  { %5218 = vmatprep.subr.bf16.mxu1 %v5751_v18 }
 0x8a3   :  { %5205 = vmatpush3.bf16.msra.mxu0 %v5992_v54 }
 0x8a4   :  { %5206 = vmatprep.subr.bf16.mxu0 %v5751_v18  ;;  %5220 = vmatpush3.bf16.msra.mxu1 %v6070_v19 }
 0x8a5   :  { %5221 = vmatprep.subr.bf16.mxu1 %v5751_v18 }
 0x8a7   :  { %5208 = vmatpush3.bf16.msra.mxu0 %v6000_v57 }
 0x8a8   :  { %5209 = vmatprep.subr.bf16.mxu0 %v5751_v18  ;;  %5223 = vmatpush3.bf16.msra.mxu1 %v6076_v23 }
 0x8a9   :  { %5230 = vmatprep.subr.bf16.mxu1 %v5751_v18 }
 0x8ab   :  { %5211 = vmatpush3.bf16.msra.mxu0 %v6006_v61 }
 0x8ac   :  { %v1627_v26 = vpop.permute.xlu0 %1626  ;;  %v1525_v27 = vpop.permute.xlu1 %1524  ;;  %5224 = vmatprep.subr.bf16.mxu0 %v5751_v18 }
 0x8ad   :  { %v1629_v28 = vsel %vm706_vm4, %v1627_v26, 0.0  ;;  %v1527_v29 = vsel %vm706_vm4, %v1521_v25, %v1525_v27 }
 0x8ae   :  { %4710 = vmatmul.mubr.msk.f32.vlgmr.msra.gmra.mrb[12].mxu0 %vm909_vm5, %v1527_v29  ;;  %4729 = vmatmul.mubr.msk.f32.vlgmr.msra.gmra.mrb[14].mxu1 %vm909_vm5, %v1629_v28 }
 0x8af   :  { %5232 = vmatpush3.bf16.msra.mxu1 %v5887_v46  ;;  %5226 = vmatpush3.bf16.msra.mxu0 %v5853_v17 }
 0x8b0   :  { %5233 = vmatprep.subr.bf16.mxu1 %v5751_v18  ;;  %5227 = vmatprep.subr.bf16.mxu0 %v5751_v18 }
 0x8b1   :  { %4739 = vmatprep.mubr.msk.f32.mxu0 %vm5750_vm0, %v5749_v0  ;;  %4758 = vmatprep.mubr.msk.f32.mxu1 %vm5750_vm0, %v5749_v0 }
 0x8b3   :  { %5235 = vmatpush3.bf16.msra.mxu1 %v5893_v49  ;;  %5229 = vmatpush3.bf16.msra.mxu0 %v5858_v21 }
 0x8b4   :  { %5236 = vmatprep.subr.bf16.mxu1 %v5751_v18  ;;  %5242 = vmatprep.subr.bf16.mxu0 %v5751_v18 }
 0x8b7   :  { %5238 = vmatpush3.bf16.msra.mxu1 %v5915_v58 }
 0x8b8   :  { %5239 = vmatprep.subr.bf16.mxu1 %v5751_v18 }
 0x8bb   :  { %5241 = vmatpush3.bf16.msra.mxu1 %v5926_v63 }
 0x8bc   :  { %5254 = vmatprep.subr.bf16.mxu1 %v5751_v18 }
 0x96e   :  { %v1386_v30 = vpop.f32.mrb[4].mxu1 }
 0x96f   :  { %v5474_v31 = vadd.f32 %v5871_v24, %v1386_v30  ;;  %v4673_v32 = vpop.f32.mrb[5].mxu1 }
 0x971   :  { %v4177_v33 = vmul.f32 -1.442695, %v5474_v31  ;;  %v1491_v34 = vpop.f32.mrb[10].mxu0 }
 0x972   :  { %v1492_v36 = vadd.f32 %v5962_v5, %v1491_v34  ;;  %v4692_v38 = vpop.f32.mrb[11].mxu0 }
 0x973   :  { %5538 = vpow2.f32 %v4177_v33 }
 0x974   :  { %v4180_v40 = vmul.f32 -1.442695, %v1492_v36 }
 0x976   :  { %5540 = vpow2.f32 %v4180_v40 }
 0x97d   :  { %v5539_v41 = vpop.eup %5538 }
 0x97e   :  { %v1394_v42 = vadd.f32 1.0, %v5539_v41 }
 0x980   :  { %v5541_v43 = vpop.eup %5540  ;;  %5542 = vrcp.f32 %v1394_v42 }
 0x981   :  { %v1498_v44 = vadd.f32 1.0, %v5541_v43  ;;  %v1597_v47 = vpop.f32.mrb[12].mxu0  ;;  %v1699_v50 = vpop.f32.mrb[14].mxu1 }
 0x982   :  { %v1598_v52 = vadd.f32 %v6026_v13, %v1597_v47  ;;  %v1700_v53 = vadd.f32 %v6110_v39, %v1699_v50  ;;  %v4711_v55 = vpop.f32.mrb[13].mxu0  ;;  %v4730_v35 = vpop.f32.mrb[15].mxu1 }
 0x983   :  { %5544 = vrcp.f32 %v1498_v44 }
 0x984   :  { %v4183_v37 = vmul.f32 -1.442695, %v1598_v52  ;;  %v4186_v59 = vmul.f32 -1.442695, %v1700_v53 }
 0x986   :  { %5546 = vpow2.f32 %v4183_v37 }
 0x987   :  { %5548 = vpow2.f32 %v4186_v59 }
 0x98a   :  { %v5543_v60 = vpop.eup %5542 }
 0x98b   :  { %v1397_v62 = vmul.f32 2.0, %v5543_v60  ;;  %v1399_v33 = vmul.f32 %v5543_v60, %v6036_v45 }
 0x98d   :  { %v5545_v1 = vpop.eup %5544  ;;  %v4178_v2 = vadd.f32 -1.0, %v1397_v62 }
 0x98e   :  { %v1501_v3 = vmul.f32 2.0, %v5545_v1  ;;  %v1503_v38 = vmul.f32 %v5545_v1, %v6040_v51 }
 0x98f   :  { %1401 = vrot.lane.b32.xlu1 %v4178_v2, %s5752_s12 }
 0x990   :  { %v5547_v4 = vpop.eup %5546  ;;  %v4181_v6 = vadd.f32 -1.0, %v1501_v3 }
 0x991   :  { %v5549_v8 = vpop.eup %5548  ;;  %v1604_v9 = vadd.f32 1.0, %v5547_v4 }
 0x992   :  { %v1706_v10 = vadd.f32 1.0, %v5549_v8  ;;  %1505 = vrot.lane.b32.xlu0 %v4181_v6, %s5752_s12 }
 0x993   :  { %5550 = vrcp.f32 %v1604_v9 }
 0x994   :  { %5552 = vrcp.f32 %v1706_v10 }
 0x99d   :  { %v5551_v11 = vpop.eup %5550 }
 0x99e   :  { %v5553_v14 = vpop.eup %5552  ;;  %v1607_v15 = vmul.f32 2.0, %v5551_v11  ;;  %v1609_v45 = vmul.f32 %v5551_v11, %v6045_v56 }
 0x99f   :  { %v1709_v16 = vmul.f32 2.0, %v5553_v14  ;;  %v1711_v47 = vmul.f32 0.0, %v5553_v14 }
 0x9a0   :  { %v4184_v20 = vadd.f32 -1.0, %v1607_v15 }
 0x9a1   :  { %v4187_v22 = vadd.f32 -1.0, %v1709_v16 }
 0x9a2   :  { %1611 = vrot.lane.b32.xlu1 %v4184_v20, %s5752_s12 }
 0x9a3   :  { %1713 = vrot.lane.b32.xlu0 %v4187_v22, %s5752_s12 }
 0xa01   :  { %v1402_v25 = vpop.permute.xlu1 %1401 }
 0xa02   :  { %v1404_v26 = vmul.f32 %v5543_v60, %v1402_v25 }
 0xa04   :  { %v1506_v27 = vpop.permute.xlu0 %1505  ;;  %1406 = vrot.lane.b32.xlu1 %v1404_v26, %s5753_s13 }
 0xa05   :  { %v1508_v28 = vmul.f32 %v5545_v1, %v1506_v27 }
 0xa07   :  { %1510 = vrot.lane.b32.xlu0 %v1508_v28, %s5753_s13 }
 0xa14   :  { %v1612_v29 = vpop.permute.xlu1 %1611 }
 0xa15   :  { %v1614_v30 = vmul.f32 %v5551_v11, %v1612_v29  ;;  %v1714_v31 = vpop.permute.xlu0 %1713 }
 0xa16   :  { %v1716_v32 = vmul.f32 %v5553_v14, %v1714_v31 }
 0xa17   :  { %1616 = vrot.lane.b32.xlu1 %v1614_v30, %s5753_s13 }
 0xa18   :  { %1718 = vrot.lane.b32.xlu0 %v1716_v32, %s5753_s13 }
 0xa76   :  { %v1407_v34 = vpop.permute.xlu1 %1406 }
 0xa77   :  { %v6123_v36 = vadd.f32 %v1407_v34, %v1399_v33 }
 0xa79   :  { %5554 = vtanh.f32 %v6123_v36  ;;  %v1511_v40 = vpop.permute.xlu0 %1510 }
 0xa7a   :  { %v6127_v41 = vadd.f32 %v1511_v40, %v1503_v38 }
 0xa7c   :  { %5556 = vtanh.f32 %v6127_v41 }
 0xa83   :  { %v5555_v42 = vpop.eup %5554 }
 0xa84   :  { %1412 = vrot.lane.b32.xlu1 %v5555_v42, %s5752_s12 }
 0xa86   :  { %v5557_v43 = vpop.eup %5556 }
 0xa87   :  { %1516 = vrot.lane.b32.xlu0 %v5557_v43, %s5752_s12 }
 0xa89   :  { %v1617_v44 = vpop.permute.xlu1 %1616 }
 0xa8a   :  { %v6133_v50 = vadd.f32 %v1617_v44, %v1609_v45  ;;  %v1719_v51 = vpop.permute.xlu0 %1718 }
 0xa8b   :  { %v6135_v52 = vadd.f32 %v1719_v51, %v1711_v47 }
 0xa8c   :  { %5558 = vtanh.f32 %v6133_v50 }
 0xa8d   :  { %5560 = vtanh.f32 %v6135_v52 }
 0xa96   :  { %v5559_v53 = vpop.eup %5558 }
 0xa97   :  { %v5561_v55 = vpop.eup %5560  ;;  %1622 = vrot.lane.b32.xlu1 %v5559_v53, %s5752_s12 }
 0xa98   :  { %1724 = vrot.lane.b32.xlu0 %v5561_v55, %s5752_s12 }
 0xaf6   :  { %v1413_v35 = vpop.permute.xlu1 %1412 }
 0xaf7   :  { %v1415_v37 = vmul.f32 %v5543_v60, %v1413_v35 }
 0xaf9   :  { %1729 = vrot.lane.b32.xlu1 %v1415_v37, %s5753_s13  ;;  %v1517_v56 = vpop.permute.xlu0 %1516 }
 0xafa   :  { %v1519_v59 = vmul.f32 %v5545_v1, %v1517_v56 }
 0xafc   :  { %1831 = vrot.lane.b32.xlu0 %v1519_v59, %s5752_s12 }
 0xafd   :  { %1933 = vrot.lane.b32.xlu1 %v1519_v59, %s5753_s13 }
 0xb09   :  { %v1623_v62 = vpop.permute.xlu1 %1622 }
 0xb0a   :  { %v1625_v2 = vmul.f32 %v5551_v11, %v1623_v62  ;;  %v1725_v3 = vpop.permute.xlu0 %1724 }
 0xb0b   :  { %v1727_v4 = vmul.f32 %v5553_v14, %v1725_v3 }
 0xb0c   :  { %2039 = vrot.lane.b32.xlu1 %v1625_v2, %s5753_s13  ;;  %1937 = vrot.lane.b32.xlu0 %v1625_v2, %s5752_s12 }
 0xb10   :  { %2043 = vrot.lane.b32.xlu0 %v1727_v4, %s5752_s12 }
 0xb6b   :  { %v1730_v6 = vpop.permute.xlu1 %1729 }
 0xb6c   :  { %4740 = vmatmul.mubr.msk.f32.vlgmr.msra.gmra.mrb[2].mxu0 %vm706_vm4, %v1730_v6 }
 0xb6d   :  { %5244 = vmatpush3.bf16.msra.mxu0 %v5982_v48  ;;  %4777 = vmatprep.mubr.msk.f32.mxu0 %vm5750_vm0, %v5749_v0 }
 0xb6e   :  { %v1832_v60 = vpop.permute.xlu0 %1831  ;;  %5245 = vmatprep.subr.bf16.mxu0 %v5751_v18 }
 0xb6f   :  { %v1834_v1 = vsel %vm706_vm4, %v1730_v6, %v1832_v60  ;;  %v1934_v8 = vpop.permute.xlu1 %1933 }
 0xb70   :  { %4759 = vmatmul.mubr.msk.f32.vlgmr.msra.gmra.mrb[16].mxu1 %vm909_vm5, %v1834_v1 }
 0xb71   :  { %5247 = vmatpush3.bf16.msra.mxu0 %v5992_v54  ;;  %5256 = vmatpush3.bf16.msra.mxu1 %v6054_v7 }
 0xb72   :  { %5248 = vmatprep.subr.bf16.mxu0 %v5751_v18  ;;  %5257 = vmatprep.subr.bf16.mxu1 %v5751_v18 }
 0xb73   :  { %4796 = vmatprep.mubr.msk.f32.mxu1 %vm5750_vm0, %v5749_v0 }
 0xb75   :  { %5250 = vmatpush3.bf16.msra.mxu0 %v6000_v57  ;;  %5259 = vmatpush3.bf16.msra.mxu1 %v6058_v12 }
 0xb76   :  { %5251 = vmatprep.subr.bf16.mxu0 %v5751_v18  ;;  %5260 = vmatprep.subr.bf16.mxu1 %v5751_v18 }
 0xb79   :  { %5253 = vmatpush3.bf16.msra.mxu0 %v6006_v61  ;;  %5262 = vmatpush3.bf16.msra.mxu1 %v6070_v19 }
 0xb7a   :  { %5263 = vmatprep.subr.bf16.mxu1 %v5751_v18  ;;  %5272 = vmatprep.subr.bf16.mxu0 %v5751_v18 }
 0xb7d   :  { %5265 = vmatpush3.bf16.msra.mxu1 %v6076_v23 }
 0xb7e   :  { %v1938_v9 = vpop.permute.xlu0 %1937  ;;  %5266 = vmatprep.subr.bf16.mxu1 %v5751_v18  ;;  %v2040_v11 = vpop.permute.xlu1 %2039 }
 0xb7f   :  { %v1940_v10 = vsel %vm706_vm4, %v1934_v8, %v1938_v9 }
 0xb80   :  { %4778 = vmatmul.mubr.msk.f32.vlgmr.msra.gmra.mrb[14].mxu0 %vm909_vm5, %v1940_v10 }
 0xb81   :  { %5274 = vmatpush3.bf16.msra.mxu0 %v5887_v46  ;;  %4826 = vmatprep.mubr.msk.f32.mxu0 %vm5750_vm0, %v5749_v0 }
 0xb82   :  { %v2044_v14 = vpop.permute.xlu0 %2043  ;;  %5275 = vmatprep.subr.bf16.mxu0 %v5751_v18 }
 0xb83   :  { %v2046_v15 = vsel %vm706_vm4, %v2040_v11, %v2044_v14 }
 0xb84   :  { %4797 = vmatmul.mubr.msk.f32.vlgmr.msra.gmra.mrb[18].mxu1 %vm909_vm5, %v2046_v15 }
 0xb85   :  { %5268 = vmatpush3.bf16.msra.mxu1 %v5853_v17  ;;  %5277 = vmatpush3.bf16.msra.mxu0 %v5893_v49 }
 0xb86   :  { %5269 = vmatprep.subr.bf16.mxu1 %v5751_v18  ;;  %5278 = vmatprep.subr.bf16.mxu0 %v5751_v18 }
 0xb87   :  { %4807 = vmatprep.mubr.msk.f32.mxu1 %vm5750_vm0, %v5749_v0 }
 0xb89   :  { %5271 = vmatpush3.bf16.msra.mxu1 %v5858_v21  ;;  %5280 = vmatpush3.bf16.msra.mxu0 %v5915_v58 }
 0xb8a   :  { %5281 = vmatprep.subr.bf16.mxu0 %v5751_v18  ;;  %5296 = vmatprep.subr.bf16.mxu1 %v5751_v18 }
 0xb8d   :  { %5283 = vmatpush3.bf16.msra.mxu0 %v5926_v63 }
 0xb8e   :  { %5284 = vmatprep.subr.bf16.mxu0 %v5751_v18 }
 0xc3f   :  { %v1799_v16 = vpop.f32.mrb[2].mxu0 }
 0xc40   :  { %v5475_v20 = vadd.f32 %v5871_v24, %v1799_v16  ;;  %v4741_v22 = vpop.f32.mrb[3].mxu0 }
 0xc42   :  { %v4189_v25 = vmul.f32 -1.442695, %v5475_v20 }
 0xc43   :  { %v1904_v26 = vpop.f32.mrb[16].mxu1 }
 0xc44   :  { %5562 = vpow2.f32 %v4189_v25  ;;  %v1905_v27 = vadd.f32 %v5962_v5, %v1904_v26  ;;  %v4760_v28 = vpop.f32.mrb[17].mxu1 }
 0xc46   :  { %v4192_v29 = vmul.f32 -1.442695, %v1905_v27 }
 0xc48   :  { %5564 = vpow2.f32 %v4192_v29 }
 0xc4e   :  { %v5563_v30 = vpop.eup %5562 }
 0xc4f   :  { %v1807_v31 = vadd.f32 1.0, %v5563_v30 }
 0xc51   :  { %5566 = vrcp.f32 %v1807_v31 }
 0xc52   :  { %v5565_v32 = vpop.eup %5564 }
 0xc53   :  { %v1911_v33 = vadd.f32 1.0, %v5565_v32  ;;  %v2010_v34 = vpop.f32.mrb[14].mxu0 }
 0xc54   :  { %v2011_v38 = vadd.f32 %v6026_v13, %v2010_v34  ;;  %v4779_v40 = vpop.f32.mrb[15].mxu0 }
 0xc55   :  { %5568 = vrcp.f32 %v1911_v33 }
 0xc56   :  { %v4195_v24 = vmul.f32 -1.442695, %v2011_v38 }
 0xc57   :  { %v2116_v42 = vpop.f32.mrb[18].mxu1 }
 0xc58   :  { %5570 = vpow2.f32 %v4195_v24  ;;  %v2117_v43 = vadd.f32 %v6110_v39, %v2116_v42  ;;  %v4798_v45 = vpop.f32.mrb[19].mxu1 }
 0xc5a   :  { %v4198_v5 = vmul.f32 -1.442695, %v2117_v43 }
 0xc5b   :  { %v5567_v44 = vpop.eup %5566 }
 0xc5c   :  { %5572 = vpow2.f32 %v4198_v5  ;;  %v1810_v47 = vmul.f32 2.0, %v5567_v44  ;;  %v1812_v22 = vmul.f32 %v5567_v44, %v6123_v36 }
 0xc5e   :  { %v4190_v51 = vadd.f32 -1.0, %v1810_v47 }
 0xc5f   :  { %v5569_v53 = vpop.eup %5568 }
 0xc60   :  { %1814 = vrot.lane.b32.xlu1 %v4190_v51, %s5752_s12  ;;  %v1914_v55 = vmul.f32 2.0, %v5569_v53  ;;  %v1916_v27 = vmul.f32 %v5569_v53, %v6127_v41 }
 0xc62   :  { %v5571_v35 = vpop.eup %5570  ;;  %v4193_v37 = vadd.f32 -1.0, %v1914_v55 }
 0xc63   :  { %v2017_v56 = vadd.f32 1.0, %v5571_v35 }
 0xc64   :  { %1918 = vrot.lane.b32.xlu0 %v4193_v37, %s5752_s12 }
 0xc65   :  { %5574 = vrcp.f32 %v2017_v56 }
 0xc66   :  { %v5573_v59 = vpop.eup %5572 }
 0xc67   :  { %v2123_v62 = vadd.f32 1.0, %v5573_v59 }
 0xc69   :  { %5576 = vrcp.f32 %v2123_v62 }
 0xc6f   :  { %v5575_v2 = vpop.eup %5574 }
 0xc70   :  { %v2020_v3 = vmul.f32 2.0, %v5575_v2  ;;  %v2022_v36 = vmul.f32 %v5575_v2, %v6133_v50 }
 0xc72   :  { %v4196_v4 = vadd.f32 -1.0, %v2020_v3 }
 0xc73   :  { %v5577_v6 = vpop.eup %5576 }
 0xc74   :  { %2024 = vrot.lane.b32.xlu1 %v4196_v4, %s5752_s12  ;;  %v2126_v60 = vmul.f32 2.0, %v5577_v6  ;;  %v2128_v41 = vmul.f32 %v5577_v6, %v6135_v52  ;;  %v6274_v4 = vld [vmem:[%s6625_s3] ss:$0 sm:$0xff] }
 0xc76   :  { %v4199_v1 = vadd.f32 -1.0, %v2126_v60 }
 0xc78   :  { %2130 = vrot.lane.b32.xlu0 %v4199_v1, %s5752_s12 }
 0xcd2   :  { %v1815_v8 = vpop.permute.xlu1 %1814 }
 0xcd3   :  { %v1817_v9 = vmul.f32 %v5567_v44, %v1815_v8 }
 0xcd5   :  { %1819 = vrot.lane.b32.xlu1 %v1817_v9, %s5753_s13  ;;  %v6280_v9 = vld [vmem:[%s6625_s3 + $0x1] ss:$0 sm:$0xff] }
 0xcd6   :  { %v1919_v10 = vpop.permute.xlu0 %1918 }
 0xcd7   :  { %v1921_v11 = vmul.f32 %v5569_v53, %v1919_v10 }
 0xcd9   :  { %1923 = vrot.lane.b32.xlu0 %v1921_v11, %s5753_s13 }
 0xce6   :  { %v2025_v14 = vpop.permute.xlu1 %2024 }
 0xce7   :  { %v2027_v15 = vmul.f32 %v5575_v2, %v2025_v14 }
 0xce9   :  { %2029 = vrot.lane.b32.xlu1 %v2027_v15, %s5753_s13 }
 0xcea   :  { %v2131_v16 = vpop.permute.xlu0 %2130 }
 0xceb   :  { %v2133_v20 = vmul.f32 %v5577_v6, %v2131_v16 }
 0xced   :  { %2135 = vrot.lane.b32.xlu0 %v2133_v20, %s5753_s13 }
 0xd47   :  { %v1820_v25 = vpop.permute.xlu1 %1819 }
 0xd48   :  { %v6203_v26 = vadd.f32 %v1820_v25, %v1812_v22 }
 0xd4a   :  { %5578 = vtanh.f32 %v6203_v26 }
 0xd4b   :  { %v1924_v28 = vpop.permute.xlu0 %1923 }
 0xd4c   :  { %v6207_v29 = vadd.f32 %v1924_v28, %v1916_v27 }
 0xd4e   :  { %5580 = vtanh.f32 %v6207_v29 }
 0xd54   :  { %v5579_v30 = vpop.eup %5578 }
 0xd55   :  { %1825 = vrot.lane.b32.xlu1 %v5579_v30, %s5752_s12 }
 0xd58   :  { %v5581_v31 = vpop.eup %5580 }
 0xd59   :  { %1929 = vrot.lane.b32.xlu0 %v5581_v31, %s5752_s12 }
 0xd5b   :  { %v2030_v32 = vpop.permute.xlu1 %2029 }
 0xd5c   :  { %v6213_v33 = vadd.f32 %v2030_v32, %v2022_v36 }
 0xd5e   :  { %5582 = vtanh.f32 %v6213_v33 }
 0xd5f   :  { %v2136_v34 = vpop.permute.xlu0 %2135 }
 0xd60   :  { %v6217_v38 = vadd.f32 %v2136_v34, %v2128_v41 }
 0xd62   :  { %5584 = vtanh.f32 %v6217_v38 }
 0xd68   :  { %v5583_v40 = vpop.eup %5582 }
 0xd69   :  { %2035 = vrot.lane.b32.xlu1 %v5583_v40, %s5752_s12 }
 0xd6c   :  { %v5585_v24 = vpop.eup %5584 }
 0xd6d   :  { %2141 = vrot.lane.b32.xlu0 %v5585_v24, %s5752_s12 }
 0xdc7   :  { %v1826_v42 = vpop.permute.xlu1 %1825 }
 0xdc8   :  { %v1828_v50 = vmul.f32 %v5567_v44, %v1826_v42 }
 0xdca   :  { %2146 = vrot.lane.b32.xlu1 %v1828_v50, %s5753_s13 }
 0xdcb   :  { %v1930_v43 = vpop.permute.xlu0 %1929 }
 0xdcc   :  { %v1932_v45 = vmul.f32 %v5569_v53, %v1930_v43 }
 0xdce   :  { %2350 = vrot.lane.b32.xlu1 %v1932_v45, %s5753_s13  ;;  %2248 = vrot.lane.b32.xlu0 %v1932_v45, %s5752_s12 }
 0xddb   :  { %v2036_v52 = vpop.permute.xlu1 %2035 }
 0xddc   :  { %v2038_v5 = vmul.f32 %v5575_v2, %v2036_v52 }
 0xdde   :  { %2456 = vrot.lane.b32.xlu1 %v2038_v5, %s5753_s13  ;;  %2354 = vrot.lane.b32.xlu0 %v2038_v5, %s5752_s12 }
 0xddf   :  { %v2142_v47 = vpop.permute.xlu0 %2141 }
 0xde0   :  { %v2144_v51 = vmul.f32 %v5577_v6, %v2142_v47 }
 0xde2   :  { %2460 = vrot.lane.b32.xlu0 %v2144_v51, %s5752_s12 }
 0xe3c   :  { %v2147_v55 = vpop.permute.xlu1 %2146 }
 0xe3d   :  { %4808 = vmatmul.mubr.msk.f32.vlgmr.msra.gmra.mrb[6].mxu1 %vm706_vm4, %v2147_v55 }
 0xe3e   :  { %5298 = vmatpush3.bf16.msra.mxu1 %v6054_v7  ;;  %4864 = vmatprep.mubr.msk.f32.mxu1 %vm5750_vm0, %v5749_v0 }
 0xe3f   :  { %5299 = vmatprep.subr.bf16.mxu1 %v5751_v18 }
 0xe40   :  { %v2249_v44 = vpop.permute.xlu0 %2248  ;;  %v2351_v35 = vpop.permute.xlu1 %2350 }
 0xe41   :  { %v2251_v53 = vsel %vm706_vm4, %v2147_v55, %v2249_v44 }
 0xe42   :  { %4827 = vmatmul.mubr.msk.f32.vlgmr.msra.gmra.mrb[16].mxu0 %vm909_vm5, %v2251_v53  ;;  %5301 = vmatpush3.bf16.msra.mxu1 %v6058_v12 }
 0xe43   :  { %5286 = vmatpush3.bf16.msra.mxu0 %v5982_v48  ;;  %5302 = vmatprep.subr.bf16.mxu1 %v5751_v18 }
 0xe44   :  { %5287 = vmatprep.subr.bf16.mxu0 %v5751_v18  ;;  %4845 = vmatprep.mubr.msk.f32.mxu0 %vm5750_vm0, %v5749_v0 }
 0xe46   :  { %5304 = vmatpush3.bf16.msra.mxu1 %v6070_v19 }
 0xe47   :  { %5289 = vmatpush3.bf16.msra.mxu0 %v5992_v54  ;;  %5305 = vmatprep.subr.bf16.mxu1 %v5751_v18 }
 0xe48   :  { %5290 = vmatprep.subr.bf16.mxu0 %v5751_v18 }
 0xe4a   :  { %5307 = vmatpush3.bf16.msra.mxu1 %v6076_v23 }
 0xe4b   :  { %5292 = vmatpush3.bf16.msra.mxu0 %v6000_v57  ;;  %5314 = vmatprep.subr.bf16.mxu1 %v5751_v18 }
 0xe4c   :  { %5293 = vmatprep.subr.bf16.mxu0 %v5751_v18 }
 0xe4f   :  { %5295 = vmatpush3.bf16.msra.mxu0 %v6006_v61 }
 0xe50   :  { %v2355_v37 = vpop.permute.xlu0 %2354  ;;  %5308 = vmatprep.subr.bf16.mxu0 %v5751_v18  ;;  %v2457_v59 = vpop.permute.xlu1 %2456 }
 0xe51   :  { %v2357_v56 = vsel %vm706_vm4, %v2351_v35, %v2355_v37 }
 0xe52   :  { %4846 = vmatmul.mubr.msk.f32.vlgmr.msra.gmra.mrb[18].mxu0 %vm909_vm5, %v2357_v56 }
 0xe53   :  { %5310 = vmatpush3.bf16.msra.mxu0 %v5853_v17  ;;  %4875 = vmatprep.mubr.msk.f32.mxu0 %vm5750_vm0, %v5749_v0 }
 0xe54   :  { %v2461_v62 = vpop.permute.xlu0 %2460  ;;  %5311 = vmatprep.subr.bf16.mxu0 %v5751_v18 }
 0xe55   :  { %v2463_v2 = vsel %vm706_vm4, %v2457_v59, %v2461_v62 }
 0xe56   :  { %4865 = vmatmul.mubr.msk.f32.vlgmr.msra.gmra.mrb[20].mxu1 %vm909_vm5, %v2463_v2 }
 0xe57   :  { %5316 = vmatpush3.bf16.msra.mxu1 %v5887_v46  ;;  %5313 = vmatpush3.bf16.msra.mxu0 %v5858_v21 }
 0xe58   :  { %5317 = vmatprep.subr.bf16.mxu1 %v5751_v18  ;;  %4894 = vmatprep.mubr.msk.f32.mxu1 %vm5750_vm0, %v5749_v0 }
 0xe59   :  { %5326 = vmatprep.subr.bf16.mxu0 %v5751_v18 }
 0xe5b   :  { %5319 = vmatpush3.bf16.msra.mxu1 %v5893_v49 }
 0xe5c   :  { %5320 = vmatprep.subr.bf16.mxu1 %v5751_v18 }
 0xe5f   :  { %5322 = vmatpush3.bf16.msra.mxu1 %v5915_v58 }
 0xe60   :  { %5323 = vmatprep.subr.bf16.mxu1 %v5751_v18 }
 0xe63   :  { %5325 = vmatpush3.bf16.msra.mxu1 %v5926_v63 }
 0xe64   :  { %5338 = vmatprep.subr.bf16.mxu1 %v5751_v18 }
 0xf10   :  { %v2216_v3 = vpop.f32.mrb[6].mxu1 }
 0xf11   :  { %v5476_v6 = vadd.f32 %v6274_v4, %v2216_v3  ;;  %v4809_v60 = vpop.f32.mrb[7].mxu1 }
 0xf13   :  { %v4201_v1 = vmul.f32 -1.442695, %v5476_v6 }
 0xf15   :  { %5586 = vpow2.f32 %v4201_v1  ;;  %v2321_v8 = vpop.f32.mrb[16].mxu0 }
 0xf16   :  { %v2322_v10 = vadd.f32 %v6280_v9, %v2321_v8  ;;  %v4828_v11 = vpop.f32.mrb[17].mxu0 }
 0xf18   :  { %v4204_v14 = vmul.f32 -1.442695, %v2322_v10 }
 0xf1a   :  { %5588 = vpow2.f32 %v4204_v14 }
 0xf1f   :  { %v5587_v15 = vpop.eup %5586 }
 0xf20   :  { %v2224_v16 = vadd.f32 1.0, %v5587_v15 }
 0xf22   :  { %5590 = vrcp.f32 %v2224_v16 }
 0xf24   :  { %v5589_v20 = vpop.eup %5588 }
 0xf25   :  { %v2328_v22 = vadd.f32 1.0, %v5589_v20  ;;  %v2427_v25 = vpop.f32.mrb[18].mxu0 }
 0xf26   :  { %v2428_v27 = vadd.f32 %v6026_v13, %v2427_v25  ;;  %v4847_v28 = vpop.f32.mrb[19].mxu0 }
 0xf27   :  { %5592 = vrcp.f32 %v2328_v22 }
 0xf28   :  { %v4207_v30 = vmul.f32 -1.442695, %v2428_v27 }
 0xf29   :  { %v2533_v31 = vpop.f32.mrb[20].mxu1 }
 0xf2a   :  { %5594 = vpow2.f32 %v4207_v30  ;;  %v2534_v36 = vadd.f32 %v6110_v39, %v2533_v31  ;;  %v4866_v32 = vpop.f32.mrb[21].mxu1 }
 0xf2c   :  { %v5591_v41 = vpop.eup %5590  ;;  %v4210_v34 = vmul.f32 -1.442695, %v2534_v36 }
 0xf2d   :  { %v2227_v40 = vmul.f32 2.0, %v5591_v41  ;;  %v2229_v1 = vmul.f32 %v5591_v41, %v6203_v26 }
 0xf2e   :  { %5596 = vpow2.f32 %v4210_v34 }
 0xf2f   :  { %v4202_v24 = vadd.f32 -1.0, %v2227_v40 }
 0xf31   :  { %v5593_v42 = vpop.eup %5592  ;;  %2231 = vrot.lane.b32.xlu1 %v4202_v24, %s5752_s12 }
 0xf32   :  { %v2331_v50 = vmul.f32 2.0, %v5593_v42  ;;  %v2333_v11 = vmul.f32 %v5593_v42, %v6207_v29 }
 0xf34   :  { %v5595_v43 = vpop.eup %5594  ;;  %v4205_v45 = vadd.f32 -1.0, %v2331_v50 }
 0xf35   :  { %v2434_v13 = vadd.f32 1.0, %v5595_v43 }
 0xf36   :  { %2335 = vrot.lane.b32.xlu0 %v4205_v45, %s5752_s12 }
 0xf37   :  { %5598 = vrcp.f32 %v2434_v13 }
 0xf38   :  { %v5597_v52 = vpop.eup %5596 }
 0xf39   :  { %v2540_v5 = vadd.f32 1.0, %v5597_v52 }
 0xf3b   :  { %5600 = vrcp.f32 %v2540_v5 }
 0xf41   :  { %v5599_v47 = vpop.eup %5598 }
 0xf42   :  { %v2437_v51 = vmul.f32 2.0, %v5599_v47  ;;  %v2439_v26 = vmul.f32 %v5599_v47, %v6213_v33 }
 0xf44   :  { %v4208_v55 = vadd.f32 -1.0, %v2437_v51 }
 0xf45   :  { %v5601_v44 = vpop.eup %5600 }
 0xf46   :  { %2441 = vrot.lane.b32.xlu1 %v4208_v55, %s5752_s12  ;;  %v2543_v53 = vmul.f32 2.0, %v5601_v44  ;;  %v2545_v29 = vmul.f32 %v5601_v44, %v6217_v38 }
 0xf48   :  { %v4211_v35 = vadd.f32 -1.0, %v2543_v53 }
 0xf4a   :  { %2547 = vrot.lane.b32.xlu0 %v4211_v35, %s5752_s12 }
 0xfa3   :  { %v2232_v37 = vpop.permute.xlu1 %2231 }
 0xfa4   :  { %v2234_v56 = vmul.f32 %v5591_v41, %v2232_v37 }
 0xfa6   :  { %2236 = vrot.lane.b32.xlu1 %v2234_v56, %s5753_s13 }
 0xfa8   :  { %v2336_v59 = vpop.permute.xlu0 %2335 }
 0xfa9   :  { %v2338_v62 = vmul.f32 %v5593_v42, %v2336_v59 }
 0xfab   :  { %2340 = vrot.lane.b32.xlu0 %v2338_v62, %s5753_s13 }
 0xfb8   :  { %v2442_v2 = vpop.permute.xlu1 %2441 }
 0xfb9   :  { %v2444_v3 = vmul.f32 %v5599_v47, %v2442_v2 }
 0xfbb   :  { %2446 = vrot.lane.b32.xlu1 %v2444_v3, %s5753_s13 }
 0xfbc   :  { %v2548_v6 = vpop.permute.xlu0 %2547 }
 0xfbd   :  { %v2550_v60 = vmul.f32 %v5601_v44, %v2548_v6 }
 0xfbf   :  { %2552 = vrot.lane.b32.xlu0 %v2550_v60, %s5753_s13  ;;  %v6367_v60 = vld [vmem:[%s6625_s3 + $0x2] ss:$0 sm:$0xff] }
0x1018   :  { %v2237_v8 = vpop.permute.xlu1 %2236 }
0x1019   :  { %v6294_v10 = vadd.f32 %v2237_v8, %v2229_v1 }
0x101b   :  { %5602 = vtanh.f32 %v6294_v10 }
0x101d   :  { %v2341_v14 = vpop.permute.xlu0 %2340 }
0x101e   :  { %v6298_v15 = vadd.f32 %v2341_v14, %v2333_v11 }
0x1020   :  { %5604 = vtanh.f32 %v6298_v15 }
0x1025   :  { %v5603_v16 = vpop.eup %5602 }
0x1026   :  { %2242 = vrot.lane.b32.xlu1 %v5603_v16, %s5752_s12 }
0x102a   :  { %v5605_v20 = vpop.eup %5604 }
0x102b   :  { %2346 = vrot.lane.b32.xlu0 %v5605_v20, %s5752_s12 }
0x102d   :  { %v2447_v22 = vpop.permute.xlu1 %2446 }
0x102e   :  { %v6304_v25 = vadd.f32 %v2447_v22, %v2439_v26 }
0x1030   :  { %5606 = vtanh.f32 %v6304_v25 }
0x1031   :  { %v2553_v27 = vpop.permute.xlu0 %2552 }
0x1032   :  { %v6308_v28 = vadd.f32 %v2553_v27, %v2545_v29 }
0x1034   :  { %5608 = vtanh.f32 %v6308_v28 }
0x103a   :  { %v5607_v30 = vpop.eup %5606 }
0x103b   :  { %2452 = vrot.lane.b32.xlu1 %v5607_v30, %s5752_s12 }
0x103e   :  { %v5609_v31 = vpop.eup %5608 }
0x103f   :  { %2558 = vrot.lane.b32.xlu0 %v5609_v31, %s5752_s12 }
0x1098   :  { %v2243_v36 = vpop.permute.xlu1 %2242 }
0x1099   :  { %v2245_v33 = vmul.f32 %v5591_v41, %v2243_v36 }
0x109b   :  { %2563 = vrot.lane.b32.xlu1 %v2245_v33, %s5753_s13 }
0x109d   :  { %v2347_v32 = vpop.permute.xlu0 %2346 }
0x109e   :  { %v2349_v34 = vmul.f32 %v5593_v42, %v2347_v32 }
0x10a0   :  { %2767 = vrot.lane.b32.xlu1 %v2349_v34, %s5753_s13  ;;  %2665 = vrot.lane.b32.xlu0 %v2349_v34, %s5752_s12 }
0x10ad   :  { %v2453_v38 = vpop.permute.xlu1 %2452 }
0x10ae   :  { %v2455_v40 = vmul.f32 %v5599_v47, %v2453_v38 }
0x10b0   :  { %2873 = vrot.lane.b32.xlu1 %v2455_v40, %s5753_s13  ;;  %2771 = vrot.lane.b32.xlu0 %v2455_v40, %s5752_s12 }
0x10b1   :  { %v2559_v24 = vpop.permute.xlu0 %2558 }
0x10b2   :  { %v2561_v50 = vmul.f32 %v5601_v44, %v2559_v24 }
0x10b4   :  { %2877 = vrot.lane.b32.xlu0 %v2561_v50, %s5752_s12 }
0x110d   :  { %v2564_v43 = vpop.permute.xlu1 %2563 }
0x110e   :  { %4876 = vmatmul.mubr.msk.f32.vlgmr.msra.gmra.mrb[4].mxu0 %vm706_vm4, %v2564_v43 }
0x110f   :  { %5328 = vmatpush3.bf16.msra.mxu0 %v5982_v48  ;;  %4913 = vmatprep.mubr.msk.f32.mxu0 %vm5750_vm0, %v5749_v0 }
0x1110   :  { %5329 = vmatprep.subr.bf16.mxu0 %v5751_v18 }
0x1112   :  { %v2666_v41 = vpop.permute.xlu0 %2665  ;;  %v2768_v45 = vpop.permute.xlu1 %2767 }
0x1113   :  { %v2668_v42 = vsel %vm706_vm4, %v2564_v43, %v2666_v41  ;;  %5331 = vmatpush3.bf16.msra.mxu0 %v5992_v54 }
0x1114   :  { %4895 = vmatmul.mubr.msk.f32.vlgmr.msra.gmra.mrb[22].mxu1 %vm909_vm5, %v2668_v42  ;;  %5332 = vmatprep.subr.bf16.mxu0 %v5751_v18 }
0x1115   :  { %5340 = vmatpush3.bf16.msra.mxu1 %v6054_v7  ;;  %4932 = vmatprep.mubr.msk.f32.mxu1 %vm5750_vm0, %v5749_v0 }
0x1116   :  { %5341 = vmatprep.subr.bf16.mxu1 %v5751_v18 }
0x1117   :  { %5334 = vmatpush3.bf16.msra.mxu0 %v6000_v57 }
0x1118   :  { %5335 = vmatprep.subr.bf16.mxu0 %v5751_v18 }
0x1119   :  { %5343 = vmatpush3.bf16.msra.mxu1 %v6058_v12 }
0x111a   :  { %5344 = vmatprep.subr.bf16.mxu1 %v5751_v18 }
0x111b   :  { %5337 = vmatpush3.bf16.msra.mxu0 %v6006_v61 }
0x111c   :  { %5356 = vmatprep.subr.bf16.mxu0 %v5751_v18 }
0x111d   :  { %5346 = vmatpush3.bf16.msra.mxu1 %v6070_v19 }
0x111e   :  { %5347 = vmatprep.subr.bf16.mxu1 %v5751_v18 }
0x1121   :  { %5349 = vmatpush3.bf16.msra.mxu1 %v6076_v23 }
0x1122   :  { %v2772_v13 = vpop.permute.xlu0 %2771  ;;  %5350 = vmatprep.subr.bf16.mxu1 %v5751_v18  ;;  %v2874_v5 = vpop.permute.xlu1 %2873 }
0x1123   :  { %v2774_v52 = vsel %vm706_vm4, %v2768_v45, %v2772_v13 }
0x1124   :  { %4914 = vmatmul.mubr.msk.f32.vlgmr.msra.gmra.mrb[20].mxu0 %vm909_vm5, %v2774_v52 }
0x1125   :  { %5358 = vmatpush3.bf16.msra.mxu0 %v5887_v46  ;;  %4962 = vmatprep.mubr.msk.f32.mxu0 %vm5750_vm0, %v5749_v0 }
0x1126   :  { %v2878_v47 = vpop.permute.xlu0 %2877  ;;  %5359 = vmatprep.subr.bf16.mxu0 %v5751_v18 }
0x1127   :  { %v2880_v51 = vsel %vm706_vm4, %v2874_v5, %v2878_v47 }
0x1128   :  { %4933 = vmatmul.mubr.msk.f32.vlgmr.msra.gmra.mrb[24].mxu1 %vm909_vm5, %v2880_v51 }
0x1129   :  { %5352 = vmatpush3.bf16.msra.mxu1 %v5853_v17  ;;  %5361 = vmatpush3.bf16.msra.mxu0 %v5893_v49 }
0x112a   :  { %5353 = vmatprep.subr.bf16.mxu1 %v5751_v18  ;;  %5362 = vmatprep.subr.bf16.mxu0 %v5751_v18 }
0x112b   :  { %4943 = vmatprep.mubr.msk.f32.mxu1 %vm5750_vm0, %v5749_v0 }
0x112d   :  { %5355 = vmatpush3.bf16.msra.mxu1 %v5858_v21  ;;  %5364 = vmatpush3.bf16.msra.mxu0 %v5915_v58 }
0x112e   :  { %5365 = vmatprep.subr.bf16.mxu0 %v5751_v18  ;;  %5380 = vmatprep.subr.bf16.mxu1 %v5751_v18 }
0x1131   :  { %5367 = vmatpush3.bf16.msra.mxu0 %v5926_v63 }
0x1132   :  { %5368 = vmatprep.subr.bf16.mxu0 %v5751_v18 }
0x11e1   :  { %v2633_v17 = vpop.f32.mrb[4].mxu0 }
0x11e2   :  { %v5477_v55 = vadd.f32 %v6274_v4, %v2633_v17  ;;  %v4877_v44 = vpop.f32.mrb[5].mxu0 }
0x11e4   :  { %v4213_v53 = vmul.f32 -1.442695, %v5477_v55 }
0x11e6   :  { %5610 = vpow2.f32 %v4213_v53 }
0x11e7   :  { %v2738_v35 = vpop.f32.mrb[22].mxu1 }
0x11e8   :  { %v2739_v37 = vadd.f32 %v6280_v9, %v2738_v35  ;;  %v4896_v21 = vpop.f32.mrb[23].mxu1 }
0x11ea   :  { %v4216_v56 = vmul.f32 -1.442695, %v2739_v37 }
0x11ec   :  { %5612 = vpow2.f32 %v4216_v56 }
0x11f0   :  { %v5611_v59 = vpop.eup %5610 }
0x11f1   :  { %v2641_v62 = vadd.f32 1.0, %v5611_v59 }
0x11f3   :  { %5614 = vrcp.f32 %v2641_v62 }
0x11f6   :  { %v5613_v2 = vpop.eup %5612 }
0x11f7   :  { %v2745_v3 = vadd.f32 1.0, %v5613_v2  ;;  %v2844_v6 = vpop.f32.mrb[20].mxu0 }
0x11f8   :  { %v2845_v1 = vadd.f32 %v6367_v60, %v2844_v6  ;;  %v4915_v8 = vpop.f32.mrb[21].mxu0 }
0x11f9   :  { %5616 = vrcp.f32 %v2745_v3 }
0x11fa   :  { %v4219_v11 = vmul.f32 -1.442695, %v2845_v1 }
0x11fb   :  { %v2950_v14 = vpop.f32.mrb[24].mxu1 }
0x11fc   :  { %5618 = vpow2.f32 %v4219_v11  ;;  %v2951_v16 = vadd.f32 %v6110_v39, %v2950_v14  ;;  %v4934_v20 = vpop.f32.mrb[25].mxu1 }
0x11fd   :  { %v5615_v26 = vpop.eup %5614 }
0x11fe   :  { %v4222_v22 = vmul.f32 -1.442695, %v2951_v16  ;;  %v2644_v29 = vmul.f32 2.0, %v5615_v26  ;;  %v2646_v55 = vmul.f32 %v5615_v26, %v6294_v10 }
0x1200   :  { %5620 = vpow2.f32 %v4222_v22  ;;  %v4214_v27 = vadd.f32 -1.0, %v2644_v29 }
0x1202   :  { %2648 = vrot.lane.b32.xlu1 %v4214_v27, %s5752_s12 }
0x1203   :  { %v5617_v30 = vpop.eup %5616 }
0x1204   :  { %v2748_v31 = vmul.f32 2.0, %v5617_v30  ;;  %v2750_v35 = vmul.f32 %v5617_v30, %v6298_v15 }
0x1206   :  { %v5619_v36 = vpop.eup %5618  ;;  %v4217_v33 = vadd.f32 -1.0, %v2748_v31 }
0x1207   :  { %v2851_v32 = vadd.f32 1.0, %v5619_v36 }
0x1208   :  { %2752 = vrot.lane.b32.xlu0 %v4217_v33, %s5752_s12 }
0x1209   :  { %5622 = vrcp.f32 %v2851_v32 }
0x120a   :  { %v5621_v34 = vpop.eup %5620 }
0x120b   :  { %v2957_v38 = vadd.f32 1.0, %v5621_v34 }
0x120d   :  { %5624 = vrcp.f32 %v2957_v38 }
0x1213   :  { %v5623_v39 = vpop.eup %5622 }
0x1214   :  { %v2854_v40 = vmul.f32 2.0, %v5623_v39  ;;  %v2856_v10 = vmul.f32 %v5623_v39, %v6304_v25 }
0x1216   :  { %v4220_v24 = vadd.f32 -1.0, %v2854_v40 }
0x1217   :  { %v5625_v50 = vpop.eup %5624 }
0x1218   :  { %2858 = vrot.lane.b32.xlu1 %v4220_v24, %s5752_s12  ;;  %v2960_v43 = vmul.f32 2.0, %v5625_v50  ;;  %v2962_v15 = vmul.f32 %v5625_v50, %v6308_v28 }
0x121a   :  { %v4223_v41 = vadd.f32 -1.0, %v2960_v43 }
0x121c   :  { %2964 = vrot.lane.b32.xlu0 %v4223_v41, %s5752_s12 }
0x1274   :  { %v2649_v42 = vpop.permute.xlu1 %2648 }
0x1275   :  { %v2651_v45 = vmul.f32 %v5615_v26, %v2649_v42 }
0x1277   :  { %2653 = vrot.lane.b32.xlu1 %v2651_v45, %s5753_s13 }
0x127a   :  { %v2753_v13 = vpop.permute.xlu0 %2752 }
0x127b   :  { %v2755_v52 = vmul.f32 %v5617_v30, %v2753_v13 }
0x127d   :  { %2757 = vrot.lane.b32.xlu0 %v2755_v52, %s5753_s13 }
0x128a   :  { %v2859_v5 = vpop.permute.xlu1 %2858 }
0x128b   :  { %v2861_v47 = vmul.f32 %v5623_v39, %v2859_v5 }
0x128d   :  { %2863 = vrot.lane.b32.xlu1 %v2861_v47, %s5753_s13 }
0x128e   :  { %v2965_v51 = vpop.permute.xlu0 %2964 }
0x128f   :  { %v2967_v17 = vmul.f32 %v5625_v50, %v2965_v51 }
0x1291   :  { %2969 = vrot.lane.b32.xlu0 %v2967_v17, %s5753_s13  ;;  %v6460_v17 = vld [vmem:[%s6625_s3 + $0x3] ss:$0 sm:$0xff] }
0x12e9   :  { %v2654_v44 = vpop.permute.xlu1 %2653 }
0x12ea   :  { %v6380_v53 = vadd.f32 %v2654_v44, %v2646_v55 }
0x12ec   :  { %5626 = vtanh.f32 %v6380_v53 }
0x12ef   :  { %v2758_v37 = vpop.permute.xlu0 %2757 }
0x12f0   :  { %v6384_v21 = vadd.f32 %v2758_v37, %v2750_v35 }
0x12f2   :  { %5628 = vtanh.f32 %v6384_v21 }
0x12f6   :  { %v5627_v56 = vpop.eup %5626 }
0x12f7   :  { %2659 = vrot.lane.b32.xlu1 %v5627_v56, %s5752_s12 }
0x12fc   :  { %v5629_v59 = vpop.eup %5628 }
0x12fd   :  { %2763 = vrot.lane.b32.xlu0 %v5629_v59, %s5752_s12 }
0x12ff   :  { %v2864_v62 = vpop.permute.xlu1 %2863 }
0x1300   :  { %v6390_v2 = vadd.f32 %v2864_v62, %v2856_v10 }
0x1302   :  { %5630 = vtanh.f32 %v6390_v2 }
0x1303   :  { %v2970_v3 = vpop.permute.xlu0 %2969 }
0x1304   :  { %v6394_v6 = vadd.f32 %v2970_v3, %v2962_v15 }
0x1306   :  { %5632 = vtanh.f32 %v6394_v6 }
0x130c   :  { %v5631_v1 = vpop.eup %5630 }
0x130d   :  { %2869 = vrot.lane.b32.xlu1 %v5631_v1, %s5752_s12 }
0x1310   :  { %v5633_v8 = vpop.eup %5632 }
0x1311   :  { %2975 = vrot.lane.b32.xlu0 %v5633_v8, %s5752_s12 }
0x1369   :  { %v2660_v11 = vpop.permute.xlu1 %2659 }
0x136a   :  { %v2662_v25 = vmul.f32 %v5615_v26, %v2660_v11 }
0x136c   :  { %2980 = vrot.lane.b32.xlu1 %v2662_v25, %s5753_s13 }
0x136f   :  { %v2764_v14 = vpop.permute.xlu0 %2763 }
0x1370   :  { %v2766_v16 = vmul.f32 %v5617_v30, %v2764_v14 }
0x1372   :  { %3184 = vrot.lane.b32.xlu1 %v2766_v16, %s5753_s13  ;;  %3082 = vrot.lane.b32.xlu0 %v2766_v16, %s5752_s12 }
0x137f   :  { %v2870_v28 = vpop.permute.xlu1 %2869 }
0x1380   :  { %v2872_v20 = vmul.f32 %v5623_v39, %v2870_v28 }
0x1382   :  { %3290 = vrot.lane.b32.xlu1 %v2872_v20, %s5753_s13  ;;  %3188 = vrot.lane.b32.xlu0 %v2872_v20, %s5752_s12 }
0x1383   :  { %v2976_v22 = vpop.permute.xlu0 %2975 }
0x1384   :  { %v2978_v29 = vmul.f32 %v5625_v50, %v2976_v22 }
0x1386   :  { %3294 = vrot.lane.b32.xlu0 %v2978_v29, %s5752_s12 }
0x13de   :  { %v2981_v27 = vpop.permute.xlu1 %2980 }
0x13df   :  { %4944 = vmatmul.mubr.msk.f32.vlgmr.msra.gmra.mrb[8].mxu1 %vm706_vm4, %v2981_v27 }
0x13e0   :  { %5382 = vmatpush3.bf16.msra.mxu1 %v6054_v7  ;;  %5000 = vmatprep.mubr.msk.f32.mxu1 %vm5750_vm0, %v5749_v0 }
0x13e1   :  { %5383 = vmatprep.subr.bf16.mxu1 %v5751_v18 }
0x13e4   :  { %v3083_v26 = vpop.permute.xlu0 %3082  ;;  %5385 = vmatpush3.bf16.msra.mxu1 %v6058_v12  ;;  %v3185_v31 = vpop.permute.xlu1 %3184 }
0x13e5   :  { %v3085_v30 = vsel %vm706_vm4, %v2981_v27, %v3083_v26  ;;  %5386 = vmatprep.subr.bf16.mxu1 %v5751_v18 }
0x13e6   :  { %4963 = vmatmul.mubr.msk.f32.vlgmr.msra.gmra.mrb[22].mxu0 %vm909_vm5, %v3085_v30 }
0x13e7   :  { %5370 = vmatpush3.bf16.msra.mxu0 %v5982_v48  ;;  %4981 = vmatprep.mubr.msk.f32.mxu0 %vm5750_vm0, %v5749_v0 }
0x13e8   :  { %5371 = vmatprep.subr.bf16.mxu0 %v5751_v18  ;;  %5388 = vmatpush3.bf16.msra.mxu1 %v6070_v19 }
0x13e9   :  { %5389 = vmatprep.subr.bf16.mxu1 %v5751_v18 }
0x13eb   :  { %5373 = vmatpush3.bf16.msra.mxu0 %v5992_v54 }
0x13ec   :  { %5374 = vmatprep.subr.bf16.mxu0 %v5751_v18  ;;  %5391 = vmatpush3.bf16.msra.mxu1 %v6076_v23 }
0x13ed   :  { %5404 = vmatprep.subr.bf16.mxu1 %v5751_v18 }
0x13ef   :  { %5376 = vmatpush3.bf16.msra.mxu0 %v6000_v57 }
0x13f0   :  { %5377 = vmatprep.subr.bf16.mxu0 %v5751_v18 }
0x13f3   :  { %5379 = vmatpush3.bf16.msra.mxu0 %v6006_v61 }
0x13f4   :  { %v3189_v36 = vpop.permute.xlu0 %3188  ;;  %5392 = vmatprep.subr.bf16.mxu0 %v5751_v18  ;;  %v3291_v32 = vpop.permute.xlu1 %3290 }
0x13f5   :  { %v3191_v33 = vsel %vm706_vm4, %v3185_v31, %v3189_v36 }
0x13f6   :  { %4982 = vmatmul.mubr.msk.f32.vlgmr.msra.gmra.mrb[24].mxu0 %vm909_vm5, %v3191_v33 }
0x13f7   :  { %5394 = vmatpush3.bf16.msra.mxu0 %v5887_v46  ;;  %5019 = vmatprep.mubr.msk.f32.mxu0 %vm5750_vm0, %v5749_v0 }
0x13f8   :  { %v3295_v34 = vpop.permute.xlu0 %3294  ;;  %5395 = vmatprep.subr.bf16.mxu0 %v5751_v18 }
0x13f9   :  { %v3297_v38 = vsel %vm706_vm4, %v3291_v32, %v3295_v34 }
0x13fa   :  { %5001 = vmatmul.mubr.msk.f32.vlgmr.msra.gmra.mrb[26].mxu1 %vm909_vm5, %v3297_v38 }
0x13fb   :  { %5397 = vmatpush3.bf16.msra.mxu0 %v5893_v49  ;;  %5406 = vmatpush3.bf16.msra.mxu1 %v5982_v48 }
0x13fc   :  { %5398 = vmatprep.subr.bf16.mxu0 %v5751_v18  ;;  %5407 = vmatprep.subr.bf16.mxu1 %v5751_v18 }
0x13fd   :  { %5038 = vmatprep.mubr.msk.f32.mxu1 %vm5750_vm0, %v5749_v0 }
0x13ff   :  { %5400 = vmatpush3.bf16.msra.mxu0 %v5915_v58  ;;  %5409 = vmatpush3.bf16.msra.mxu1 %v5992_v54 }
0x1400   :  { %5401 = vmatprep.subr.bf16.mxu0 %v5751_v18  ;;  %5410 = vmatprep.subr.bf16.mxu1 %v5751_v18 }
0x1403   :  { %5403 = vmatpush3.bf16.msra.mxu0 %v5926_v63  ;;  %5412 = vmatpush3.bf16.msra.mxu1 %v6000_v57 }
0x1404   :  { %5416 = vmatprep.subr.bf16.mxu0 %v5751_v18  ;;  %5413 = vmatprep.subr.bf16.mxu1 %v5751_v18 }
0x1407   :  { %5415 = vmatpush3.bf16.msra.mxu1 %v6006_v61 }
0x1408   :  { %5428 = vmatprep.subr.bf16.mxu1 %v5751_v18 }
0x14b2   :  { %v3050_v46 = vpop.f32.mrb[8].mxu1 }
0x14b3   :  { %v5478_v49 = vadd.f32 %v6274_v4, %v3050_v46  ;;  %v4945_v58 = vpop.f32.mrb[9].mxu1 }
0x14b5   :  { %v4225_v39 = vmul.f32 -1.442695, %v5478_v49 }
0x14b7   :  { %5634 = vpow2.f32 %v4225_v39 }
0x14b9   :  { %v3155_v40 = vpop.f32.mrb[22].mxu0 }
0x14ba   :  { %v3156_v24 = vadd.f32 %v6280_v9, %v3155_v40  ;;  %v4964_v63 = vpop.f32.mrb[23].mxu0 }
0x14bc   :  { %v4228_v50 = vmul.f32 -1.442695, %v3156_v24 }
0x14be   :  { %5636 = vpow2.f32 %v4228_v50 }
0x14c1   :  { %v5635_v43 = vpop.eup %5634 }
0x14c2   :  { %v3058_v41 = vadd.f32 1.0, %v5635_v43 }
0x14c4   :  { %5638 = vrcp.f32 %v3058_v41 }
0x14c8   :  { %v5637_v42 = vpop.eup %5636 }
0x14c9   :  { %v3162_v45 = vadd.f32 1.0, %v5637_v42  ;;  %v3261_v13 = vpop.f32.mrb[24].mxu0 }
0x14ca   :  { %v3262_v52 = vadd.f32 %v6367_v60, %v3261_v13  ;;  %v4983_v5 = vpop.f32.mrb[25].mxu0 }
0x14cb   :  { %5640 = vrcp.f32 %v3162_v45 }
0x14cc   :  { %v4231_v4 = vmul.f32 -1.442695, %v3262_v52 }
0x14cd   :  { %v3367_v47 = vpop.f32.mrb[26].mxu1 }
0x14ce   :  { %v6455_v51 = vpop.eup %5638  ;;  %5642 = vpow2.f32 %v4231_v4  ;;  %v3368_v55 = vadd.f32 %v6460_v17, %v3367_v47  ;;  %v5002_v44 = vpop.f32.mrb[27].mxu1 }
0x14cf   :  { %v3061_v35 = vmul.f32 2.0, %v6455_v51  ;;  %v3063_v32 = vmul.f32 %v6455_v51, %v6380_v53 }
0x14d0   :  { %v4234_v37 = vmul.f32 -1.442695, %v3368_v55 }
0x14d1   :  { %v4226_v56 = vadd.f32 -1.0, %v3061_v35 }
0x14d2   :  { %5644 = vpow2.f32 %v4234_v37 }
0x14d3   :  { %3065 = vrot.lane.b32.xlu1 %v4226_v56, %s5752_s12 }
0x14d5   :  { %v5641_v59 = vpop.eup %5640 }
0x14d6   :  { %v3165_v10 = vmul.f32 2.0, %v5641_v59  ;;  %v3167_v46 = vmul.f32 %v5641_v59, %v6384_v21 }
0x14d8   :  { %v5643_v62 = vpop.eup %5642  ;;  %v4229_v15 = vadd.f32 -1.0, %v3165_v10 }
0x14d9   :  { %v3268_v3 = vadd.f32 1.0, %v5643_v62 }
0x14da   :  { %3169 = vrot.lane.b32.xlu0 %v4229_v15, %s5752_s12 }
0x14db   :  { %5646 = vrcp.f32 %v3268_v3 }
0x14dc   :  { %v5645_v1 = vpop.eup %5644 }
0x14dd   :  { %v3374_v8 = vadd.f32 1.0, %v5645_v1 }
0x14df   :  { %5648 = vrcp.f32 %v3374_v8 }
0x14e5   :  { %v5647_v11 = vpop.eup %5646 }
0x14e6   :  { %v3271_v25 = vmul.f32 2.0, %v5647_v11  ;;  %v3273_v24 = vmul.f32 %v5647_v11, %v6390_v2 }
0x14e8   :  { %v4232_v14 = vadd.f32 -1.0, %v3271_v25 }
0x14e9   :  { %v5649_v16 = vpop.eup %5648 }
0x14ea   :  { %3275 = vrot.lane.b32.xlu1 %v4232_v14, %s5752_s12  ;;  %v3377_v28 = vmul.f32 2.0, %v5649_v16  ;;  %v3379_v21 = vmul.f32 %v5649_v16, %v6394_v6 }
0x14ec   :  { %v4235_v20 = vadd.f32 -1.0, %v3377_v28 }
0x14ee   :  { %3381 = vrot.lane.b32.xlu0 %v4235_v20, %s5752_s12 }
0x1545   :  { %v3066_v22 = vpop.permute.xlu1 %3065 }
0x1546   :  { %v3068_v29 = vmul.f32 %v6455_v51, %v3066_v22 }
0x1548   :  { %3070 = vrot.lane.b32.xlu1 %v3068_v29, %s5753_s13 }
0x154c   :  { %v3170_v27 = vpop.permute.xlu0 %3169 }
0x154d   :  { %v3172_v26 = vmul.f32 %v5641_v59, %v3170_v27 }
0x154f   :  { %3174 = vrot.lane.b32.xlu0 %v3172_v26, %s5753_s13 }
0x155c   :  { %v3276_v30 = vpop.permute.xlu1 %3275 }
0x155d   :  { %v3278_v31 = vmul.f32 %v5647_v11, %v3276_v30 }
0x155f   :  { %3280 = vrot.lane.b32.xlu1 %v3278_v31, %s5753_s13 }
0x1560   :  { %v3382_v36 = vpop.permute.xlu0 %3381 }
0x1561   :  { %v3384_v33 = vmul.f32 %v5649_v16, %v3382_v36 }
0x1563   :  { %3386 = vrot.lane.b32.xlu0 %v3384_v33, %s5753_s13 }
0x15ba   :  { %v3071_v34 = vpop.permute.xlu1 %3070 }
0x15bb   :  { %v3073_v38 = vadd.f32 %v3071_v34, %v3063_v32 }
0x15bd   :  { %5650 = vtanh.f32 %v3073_v38 }
0x15c1   :  { %v3175_v49 = vpop.permute.xlu0 %3174 }
0x15c2   :  { %v6476_v58 = vadd.f32 %v3175_v49, %v3167_v46 }
0x15c4   :  { %5652 = vtanh.f32 %v6476_v58 }
0x15c7   :  { %v5651_v39 = vpop.eup %5650 }
0x15c8   :  { %3076 = vrot.lane.b32.xlu1 %v5651_v39, %s5752_s12 }
0x15ce   :  { %v5653_v40 = vpop.eup %5652 }
0x15cf   :  { %3180 = vrot.lane.b32.xlu0 %v5653_v40, %s5752_s12 }
0x15d1   :  { %v3281_v63 = vpop.permute.xlu1 %3280 }
0x15d2   :  { %v6482_v53 = vadd.f32 %v3281_v63, %v3273_v24 }
0x15d4   :  { %5654 = vtanh.f32 %v6482_v53 }
0x15d5   :  { %v3387_v50 = vpop.permute.xlu0 %3386 }
0x15d6   :  { %v6486_v43 = vadd.f32 %v3387_v50, %v3379_v21 }
0x15d8   :  { %5656 = vtanh.f32 %v6486_v43 }
0x15de   :  { %v5655_v41 = vpop.eup %5654 }
0x15df   :  { %3286 = vrot.lane.b32.xlu1 %v5655_v41, %s5752_s12 }
0x15e2   :  { %v5657_v42 = vpop.eup %5656 }
0x15e3   :  { %3392 = vrot.lane.b32.xlu0 %v5657_v42, %s5752_s12 }
0x163a   :  { %v3077_v45 = vpop.permute.xlu1 %3076 }
0x163b   :  { %v3079_v2 = vmul.f32 %v6455_v51, %v3077_v45 }
0x163d   :  { %3397 = vrot.lane.b32.xlu1 %v3079_v2, %s5753_s13 }
0x1641   :  { %v3181_v13 = vpop.permute.xlu0 %3180 }
0x1642   :  { %v3183_v52 = vmul.f32 %v5641_v59, %v3181_v13 }
0x1644   :  { %3503 = vrot.lane.b32.xlu1 %v3183_v52, %s5753_s13  ;;  %3401 = vrot.lane.b32.xlu0 %v3183_v52, %s5752_s12 }
0x1651   :  { %v3287_v6 = vpop.permute.xlu1 %3286 }
0x1652   :  { %v3289_v5 = vmul.f32 %v5647_v11, %v3287_v6 }
0x1654   :  { %3609 = vrot.lane.b32.xlu1 %v3289_v5, %s5753_s13  ;;  %3507 = vrot.lane.b32.xlu0 %v3289_v5, %s5752_s12 }
0x1655   :  { %v3393_v4 = vpop.permute.xlu0 %3392 }
0x1656   :  { %v3395_v47 = vmul.f32 %v5649_v16, %v3393_v4 }
0x1658   :  { %3613 = vrot.lane.b32.xlu0 %v3395_v47, %s5752_s12 }
0x16af   :  { %v3398_v55 = vpop.permute.xlu1 %3397 }
0x16b6   :  { %v3402_v51 = vpop.permute.xlu0 %3401  ;;  %v3504_v35 = vpop.permute.xlu1 %3503 }
0x16b7   :  { %v3404_v44 = vsel %vm706_vm4, %v3398_v55, %v3402_v51 }
0x16b8   :  { %5020 = vmatmul.mubr.msk.f32.vlgmr.msra.gmra.mrb[26].mxu0 %vm909_vm5, %v3404_v44 }
0x16b9   :  { %5418 = vmatpush3.bf16.msra.mxu0 %v6054_v7  ;;  %5057 = vmatprep.mubr.msk.f32.mxu0 %vm5750_vm0, %v5749_v0 }
0x16ba   :  { %5419 = vmatprep.subr.bf16.mxu0 %v5751_v18 }
0x16bd   :  { %5421 = vmatpush3.bf16.msra.mxu0 %v6058_v12 }
0x16be   :  { %5422 = vmatprep.subr.bf16.mxu0 %v5751_v18 }
0x16c1   :  { %5424 = vmatpush3.bf16.msra.mxu0 %v6070_v19 }
0x16c2   :  { %5425 = vmatprep.subr.bf16.mxu0 %v5751_v18 }
0x16c5   :  { %5427 = vmatpush3.bf16.msra.mxu0 %v6076_v23 }
0x16c6   :  { %v3508_v37 = vpop.permute.xlu0 %3507  ;;  %5440 = vmatprep.subr.bf16.mxu0 %v5751_v18  ;;  %v3610_v59 = vpop.permute.xlu1 %3609 }
0x16c7   :  { %v3510_v56 = vsel %vm706_vm4, %v3504_v35, %v3508_v37 }
0x16c8   :  { %5039 = vmatmul.mubr.msk.f32.vlgmr.msra.gmra.mrb[28].mxu1 %vm909_vm5, %v3510_v56 }
0x16c9   :  { %5430 = vmatpush3.bf16.msra.mxu1 %v5982_v48  ;;  %5076 = vmatprep.mubr.msk.f32.mxu1 %vm5750_vm0, %v5749_v0 }
0x16ca   :  { %v3614_v10 = vpop.permute.xlu0 %3613  ;;  %5431 = vmatprep.subr.bf16.mxu1 %v5751_v18 }
0x16cb   :  { %v3616_v62 = vsel %vm706_vm4, %v3610_v59, %v3614_v10 }
0x16cc   :  { %5058 = vmatmul.mubr.msk.f32.vlgmr.msra.gmra.mrb[28].mxu0 %vm909_vm5, %v3616_v62 }
0x16cd   :  { %5433 = vmatpush3.bf16.msra.mxu1 %v5992_v54  ;;  %5442 = vmatpush3.bf16.msra.mxu0 %v6054_v7 }
0x16ce   :  { %5434 = vmatprep.subr.bf16.mxu1 %v5751_v18  ;;  %5443 = vmatprep.subr.bf16.mxu0 %v5751_v18 }
0x16cf   :  { %5095 = vmatprep.mubr.msk.f32.mxu0 %vm5750_vm0, %v5749_v0 }
0x16d1   :  { %5436 = vmatpush3.bf16.msra.mxu1 %v6000_v57  ;;  %5445 = vmatpush3.bf16.msra.mxu0 %v6058_v12 }
0x16d2   :  { %5437 = vmatprep.subr.bf16.mxu1 %v5751_v18  ;;  %5446 = vmatprep.subr.bf16.mxu0 %v5751_v18 }
0x16d5   :  { %5439 = vmatpush3.bf16.msra.mxu1 %v6006_v61  ;;  %5448 = vmatpush3.bf16.msra.mxu0 %v6070_v19 }
0x16d6   :  { %5449 = vmatprep.subr.bf16.mxu0 %v5751_v18  ;;  %5452 = vmatprep.subr.bf16.mxu1 %v5751_v18 }
0x16d9   :  { %5451 = vmatpush3.bf16.msra.mxu0 %v6076_v23 }
0x16da   :  { %5464 = vmatprep.subr.bf16.mxu0 %v5751_v18 }
0x178b   :  { %v3474_v48 = vpop.f32.mrb[26].mxu0 }
0x178c   :  { %v3475_v54 = vadd.f32 %v6280_v9, %v3474_v48  ;;  %v5021_v57 = vpop.f32.mrb[27].mxu0 }
0x178e   :  { %v4237_v15 = vmul.f32 -1.442695, %v3475_v54 }
0x1790   :  { %5658 = vpow2.f32 %v4237_v15 }
0x179a   :  { %v5659_v3 = vpop.eup %5658 }
0x179b   :  { %v3481_v1 = vadd.f32 1.0, %v5659_v3  ;;  %v3580_v8 = vpop.f32.mrb[28].mxu1 }
0x179c   :  { %v3581_v61 = vadd.f32 %v6367_v60, %v3580_v8  ;;  %v5040_v11 = vpop.f32.mrb[29].mxu1 }
0x179d   :  { %5660 = vrcp.f32 %v3481_v1 }
0x179e   :  { %v4240_v25 = vmul.f32 -1.442695, %v3581_v61 }
0x179f   :  { %v3686_v14 = vpop.f32.mrb[28].mxu0 }
0x17a0   :  { %5662 = vpow2.f32 %v4240_v25  ;;  %v3687_v16 = vadd.f32 %v6460_v17, %v3686_v14  ;;  %v5059_v28 = vpop.f32.mrb[29].mxu0 }
0x17a2   :  { %v4243_v20 = vmul.f32 -1.442695, %v3687_v16 }
0x17a4   :  { %5664 = vpow2.f32 %v4243_v20 }
0x17a7   :  { %v5661_v22 = vpop.eup %5660 }
0x17a8   :  { %v3484_v9 = vmul.f32 2.0, %v5661_v22  ;;  %v3486_v50 = vmul.f32 %v5661_v22, %v6476_v58 }
0x17aa   :  { %v5663_v29 = vpop.eup %5662  ;;  %v4238_v27 = vadd.f32 -1.0, %v3484_v9 }
0x17ab   :  { %v3587_v26 = vadd.f32 1.0, %v5663_v29 }
0x17ac   :  { %3488 = vrot.lane.b32.xlu1 %v4238_v27, %s5752_s12 }
0x17ad   :  { %5666 = vrcp.f32 %v3587_v26 }
0x17ae   :  { %v5665_v30 = vpop.eup %5664 }
0x17af   :  { %v3693_v31 = vadd.f32 1.0, %v5665_v30 }
0x17b1   :  { %5668 = vrcp.f32 %v3693_v31 }
0x17b7   :  { %v5667_v36 = vpop.eup %5666 }
0x17b8   :  { %v3590_v33 = vmul.f32 2.0, %v5667_v36  ;;  %v3592_v2 = vmul.f32 %v5667_v36, %v6482_v53 }
0x17ba   :  { %v4241_v32 = vadd.f32 -1.0, %v3590_v33 }
0x17bb   :  { %v5669_v34 = vpop.eup %5668 }
0x17bc   :  { %3594 = vrot.lane.b32.xlu0 %v4241_v32, %s5752_s12  ;;  %v3696_v38 = vmul.f32 2.0, %v5669_v34  ;;  %v3698_v6 = vmul.f32 %v5669_v34, %v6486_v43 }
0x17be   :  { %v4244_v46 = vadd.f32 -1.0, %v3696_v38 }
0x17c0   :  { %3700 = vrot.lane.b32.xlu1 %v4244_v46, %s5752_s12 }
0x181e   :  { %v3489_v49 = vpop.permute.xlu1 %3488 }
0x181f   :  { %v3491_v39 = vmul.f32 %v5661_v22, %v3489_v49 }
0x1821   :  { %3493 = vrot.lane.b32.xlu0 %v3491_v39, %s5753_s13 }
0x182e   :  { %v3595_v40 = vpop.permute.xlu0 %3594 }
0x182f   :  { %v3597_v24 = vmul.f32 %v5667_v36, %v3595_v40 }
0x1831   :  { %3599 = vrot.lane.b32.xlu1 %v3597_v24, %s5753_s13 }
0x1832   :  { %v3701_v63 = vpop.permute.xlu1 %3700 }
0x1833   :  { %v3703_v21 = vmul.f32 %v5669_v34, %v3701_v63 }
0x1835   :  { %3705 = vrot.lane.b32.xlu0 %v3703_v21, %s5753_s13 }
0x1893   :  { %v3494_v41 = vpop.permute.xlu0 %3493 }
0x1894   :  { %v3496_v42 = vadd.f32 %v3494_v41, %v3486_v50 }
0x1896   :  { %5670 = vtanh.f32 %v3496_v42 }
0x18a0   :  { %v5671_v45 = vpop.eup %5670 }
0x18a1   :  { %3499 = vrot.lane.b32.xlu1 %v5671_v45, %s5752_s12 }
0x18a3   :  { %v3600_v13 = vpop.permute.xlu1 %3599 }
0x18a4   :  { %v6546_v52 = vadd.f32 %v3600_v13, %v3592_v2 }
0x18a6   :  { %5672 = vtanh.f32 %v6546_v52 }
0x18a7   :  { %v3706_v5 = vpop.permute.xlu0 %3705 }
0x18a8   :  { %v6550_v4 = vadd.f32 %v3706_v5, %v3698_v6 }
0x18aa   :  { %5674 = vtanh.f32 %v6550_v4 }
0x18b0   :  { %v5673_v58 = vpop.eup %5672 }
0x18b1   :  { %3605 = vrot.lane.b32.xlu0 %v5673_v58, %s5752_s12 }
0x18b4   :  { %v5675_v47 = vpop.eup %5674 }
0x18b5   :  { %3711 = vrot.lane.b32.xlu1 %v5675_v47, %s5752_s12 }
0x1913   :  { %v3500_v55 = vpop.permute.xlu1 %3499 }
0x1914   :  { %v3502_v53 = vmul.f32 %v5661_v22, %v3500_v55 }
0x1916   :  { %3716 = vrot.lane.b32.xlu0 %v3502_v53, %s5753_s13  ;;  %v4036_v53 = vld [vmem:[%s6626_s4 + $0x8] sm:$0xff] }
0x1923   :  { %v3606_v51 = vpop.permute.xlu0 %3605 }
0x1924   :  { %v3608_v44 = vmul.f32 %v5667_v36, %v3606_v51  ;;  %v4037_v51 = vld [vmem:[%s6626_s4 + $0x10] sm:$0xff] }
0x1926   :  { %3822 = vrot.lane.b32.xlu0 %v3608_v44, %s5753_s13  ;;  %3720 = vrot.lane.b32.xlu1 %v3608_v44, %s5752_s12 }
0x1927   :  { %v3712_v43 = vpop.permute.xlu1 %3711 }
0x1928   :  { %v3714_v35 = vmul.f32 %v5669_v34, %v3712_v43  ;;  %v4038_v43 = vld [vmem:[%s6626_s4 + $0x18] sm:$0xff] }
0x192a   :  { %3826 = vrot.lane.b32.xlu1 %v3714_v35, %s5752_s12  ;;  %v5468_v35 = vpack.c.bf16 %v4038_v43, %v4037_v51 }
0x1988   :  { %v3717_v37 = vpop.permute.xlu0 %3716 }
0x1998   :  { %v3721_v56 = vpop.permute.xlu1 %3720  ;;  %v3823_v10 = vpop.permute.xlu0 %3822 }
0x1999   :  { %v3723_v59 = vsel %vm706_vm4, %v3717_v37, %v3721_v56 }
0x199a   :  { %5077 = vmatmul.mubr.msk.f32.vlgmr.msra.gmra.mrb[30].mxu1 %vm909_vm5, %v3723_v59 }
0x199b   :  { %5454 = vmatpush3.bf16.msra.mxu1 %v6054_v7  ;;  %5114 = vmatprep.mubr.msk.f32.mxu1 %vm5750_vm0, %v5749_v0 }
0x199c   :  { %v3827_v62 = vpop.permute.xlu1 %3826  ;;  %5455 = vmatprep.subr.bf16.mxu1 %v5751_v18 }
0x199d   :  { %v3829_v48 = vsel %vm706_vm4, %v3823_v10, %v3827_v62  ;;  %v4254_v62 = vld [vmem:[%s6626_s4 + $0x20] ss:$0 sm:$0xff] }
0x199e   :  { %5096 = vmatmul.mubr.msk.f32.vlgmr.msra.gmra.mrb[30].mxu0 %vm909_vm5, %v3829_v48 }
0x199f   :  { %5457 = vmatpush3.bf16.msra.mxu1 %v6058_v12  ;;  %5125 = vmatprep.mubr.msk.f32.mxu0 %vm5750_vm0, %v5749_v0 }
0x19a0   :  { %5458 = vmatprep.subr.bf16.mxu1 %v5751_v18 }
0x19a3   :  { %5460 = vmatpush3.bf16.msra.mxu1 %v6070_v19 }
0x19a4   :  { %5461 = vmatprep.subr.bf16.mxu1 %v5751_v18 }
0x19a7   :  { %5463 = vmatpush3.bf16.msra.mxu1 %v6076_v23 }
0x1a6d   :  { %v3793_v7 = vpop.f32.mrb[30].mxu1 }
0x1a6e   :  { %v3794_v54 = vadd.f32 %v6367_v60, %v3793_v7  ;;  %v5078_v57 = vpop.f32.mrb[31].mxu1 }
0x1a70   :  { %v4246_v15 = vmul.f32 -1.442695, %v3794_v54 }
0x1a71   :  { %v3899_v3 = vpop.f32.mrb[30].mxu0 }
0x1a72   :  { %5676 = vpow2.f32 %v4246_v15  ;;  %v3900_v12 = vadd.f32 %v6460_v17, %v3899_v3  ;;  %v5097_v1 = vpop.f32.mrb[31].mxu0 }
0x1a74   :  { %v4249_v8 = vmul.f32 -1.442695, %v3900_v12 }
0x1a76   :  { %5678 = vpow2.f32 %v4249_v8 }
0x1a7c   :  { %v5677_v0 = vpop.eup %5676 }
0x1a7d   :  { %v3800_v61 = vadd.f32 1.0, %v5677_v0 }
0x1a7f   :  { %5680 = vrcp.f32 %v3800_v61 }
0x1a80   :  { %v5679_v19 = vpop.eup %5678 }
0x1a81   :  { %v3906_v11 = vadd.f32 1.0, %v5679_v19 }
0x1a83   :  { %5682 = vrcp.f32 %v3906_v11 }
0x1a89   :  { %v5681_v25 = vpop.eup %5680 }
0x1a8a   :  { %v3803_v23 = vmul.f32 2.0, %v5681_v25  ;;  %v3805_v27 = vmul.f32 %v5681_v25, %v6546_v52 }
0x1a8c   :  { %v4247_v14 = vadd.f32 -1.0, %v3803_v23 }
0x1a8d   :  { %v5683_v16 = vpop.eup %5682 }
0x1a8e   :  { %3807 = vrot.lane.b32.xlu0 %v4247_v14, %s5752_s12  ;;  %v3909_v60 = vmul.f32 2.0, %v5683_v16  ;;  %v3911_v31 = vmul.f32 %v5683_v16, %v6550_v4 }
0x1a90   :  { %v4250_v28 = vadd.f32 -1.0, %v3909_v60 }
0x1a92   :  { %3913 = vrot.lane.b32.xlu1 %v4250_v28, %s5752_s12 }
0x1b00   :  { %v3808_v20 = vpop.permute.xlu0 %3807 }
0x1b01   :  { %v3810_v22 = vmul.f32 %v5681_v25, %v3808_v20 }
0x1b03   :  { %3812 = vrot.lane.b32.xlu0 %v3810_v22, %s5753_s13 }
0x1b04   :  { %v3914_v9 = vpop.permute.xlu1 %3913 }
0x1b05   :  { %v3916_v29 = vmul.f32 %v5683_v16, %v3914_v9 }
0x1b07   :  { %3918 = vrot.lane.b32.xlu1 %v3916_v29, %s5753_s13 }
0x1b75   :  { %v3813_v26 = vpop.permute.xlu0 %3812 }
0x1b76   :  { %v3815_v30 = vadd.f32 %v3813_v26, %v3805_v27 }
0x1b78   :  { %5684 = vtanh.f32 %v3815_v30 }
0x1b79   :  { %v3919_v36 = vpop.permute.xlu1 %3918 }
0x1b7a   :  { %v3921_v33 = vadd.f32 %v3919_v36, %v3911_v31 }
0x1b7c   :  { %5686 = vtanh.f32 %v3921_v33 }
0x1b82   :  { %v5685_v32 = vpop.eup %5684 }
0x1b83   :  { %3818 = vrot.lane.b32.xlu0 %v5685_v32, %s5752_s12 }
0x1b86   :  { %v5687_v34 = vpop.eup %5686 }
0x1b87   :  { %3924 = vrot.lane.b32.xlu1 %v5687_v34, %s5752_s12 }
0x1bf5   :  { %v3819_v38 = vpop.permute.xlu0 %3818 }
0x1bf6   :  { %v3821_v46 = vmul.f32 %v5681_v25, %v3819_v38 }
0x1bf8   :  { %3929 = vrot.lane.b32.xlu0 %v3821_v46, %s5753_s13 }
0x1bf9   :  { %v3925_v49 = vpop.permute.xlu1 %3924 }
0x1bfa   :  { %v3927_v39 = vmul.f32 %v5683_v16, %v3925_v49 }
0x1bfc   :  { %3933 = vrot.lane.b32.xlu1 %v3927_v39, %s5752_s12 }
0x1c6a   :  { %v3930_v40 = vpop.permute.xlu0 %3929 }
0x1c6e   :  { %v3934_v24 = vpop.permute.xlu1 %3933 }
0x1c6f   :  { %v3936_v63 = vsel %vm706_vm4, %v3930_v40, %v3934_v24 }
0x1c70   :  { %5115 = vmatmul.mubr.msk.f32.vlgmr.msra.gmra.mrb[32].mxu1 %vm909_vm5, %v3936_v63 }
0x1d43   :  { %v4006_v21 = vpop.f32.mrb[32].mxu1 }
0x1d44   :  { %v4007_v50 = vadd.f32 %v6460_v17, %v4006_v21  ;;  %v5116_v41 = vpop.f32.mrb[33].mxu1  ;;  %v4035_v17 = vld [vmem:[%s6626_s4] sm:$0xff] }
0x1d45   :  { %v5465_v44 = vpack.c.bf16 %v4036_v53, %v4035_v17 }
0x1d46   :  { %v4252_v42 = vmul.f32 -1.442695, %v4007_v50 }
0x1d47   :  { %5466 = vmatpush3.bf16.msra.mxu0 %v5465_v44 }
0x1d48   :  { %5688 = vpow2.f32 %v4252_v42  ;;  %5467 = vmatprep.subr.bf16.mxu0 %v5751_v18 }
0x1d4b   :  { %5469 = vmatpush3.bf16.msra.mxu0 %v5468_v35 }
0x1d52   :  { %v5689_v45 = vpop.eup %5688 }
0x1d53   :  { %v4013_v2 = vadd.f32 1.0, %v5689_v45 }
0x1d55   :  { %5690 = vrcp.f32 %v4013_v2 }
0x1d5f   :  { %v5691_v13 = vpop.eup %5690 }
0x1d60   :  { %v4016_v52 = vmul.f32 2.0, %v5691_v13  ;;  %v4018_v58 = vmul.f32 %v5691_v13, %v3921_v33 }
0x1d62   :  { %v4253_v6 = vadd.f32 -1.0, %v4016_v52 }
0x1d64   :  { %4020 = vrot.lane.b32.xlu0 %v4253_v6, %s5752_s12 }
0x1dd6   :  { %v4021_v5 = vpop.permute.xlu0 %4020 }
0x1dd7   :  { %v4023_v4 = vmul.f32 %v5691_v13, %v4021_v5 }
0x1dd9   :  { %4025 = vrot.lane.b32.xlu1 %v4023_v4, %s5753_s13 }
0x1e4b   :  { %v4026_v47 = vpop.permute.xlu1 %4025 }
0x1e4c   :  { %v4028_v55 = vadd.f32 %v4026_v47, %v4018_v58 }
0x1e4e   :  { %5692 = vtanh.f32 %v4028_v55 }
0x1e58   :  { %v5693_v37 = vpop.eup %5692 }
0x1e59   :  { %4031 = vrot.lane.b32.xlu0 %v5693_v37, %s5752_s12 }
0x1ecb   :  { %v4032_v56 = vpop.permute.xlu0 %4031 }
0x1ecc   :  { %v4034_v59 = vmul.f32 %v5691_v13, %v4032_v56 }
0x1ece   :  { %4045 = vrot.lane.b32.xlu1 %v4034_v59, %s5753_s13 }
0x1f40   :  { %v4046_v10 = vpop.permute.xlu1 %4045 }
0x1f41   :  { %5126 = vmatmul.mubr.msk.f32.vlgmr.msra.gmra.mrb[32].mxu0 %vm706_vm4, %v4046_v10 }
0x2014   :  { %v4115_v48 = vpop.f32.mrb[32].mxu0 }
0x2015   :  { %v4116_v18 = vadd.f32 %v4254_v62, %v4115_v48  ;;  %v5127_v7 = vpop.f32.mrb[33].mxu0 }
0x2017   :  { %4120 = vst.msk [vmem:[#allocation5] sm:$0x3] %vm4119_vm6, %v4116_v18 }
0x2018   :  { %5731 = shalt.err (!%p5728_p12)
}
0x2019   :  { %s5732_s14 = scalar_lea.hbm %s6627_s5, 32 }
0x201a   :  { %p5733_p13 = scmp.ne.s32.totalorder %s6627_s5, %s5732_s14  ;;  %p5736_p0 = scmp.lt.u32.totalorder %s5732_s14, %s6627_s5 }
0x201c   :  { %p5738_p1 = pnand %p5736_p0, %p5733_p13 }
0x201e   :  { %5741 = shalt.err (!%p5738_p1)
}
0x201f   :  { %4130 = dma.vmem_to_hbm [thread:$0]  %s4128_s0, 32, %s6627_s5, [#allocation4]  }
0x2020   :  { %5744 = dma.done.wait [#allocation4], 32  }
0x2021   :  { %5745 = vsyncadd [#allocation4], 4294967264 }
0x2022   :  { %4134 = vsyncpa [#allocation3], 1 }
0x2023   :  { %4135 = vsyncpa [#allocation4], 1 }

</bundles_post_ra>
